<compile_context>
chip_gen: v6e
topology: v6e:2x2x1
jax: 0.10.0
libtpu: 0.0.40
codegen_flags: <defaults>
</compile_context>

<pallas_src>
import functools

import jax
import jax.numpy as jnp
from jax.experimental import pallas as pl
from jax.experimental.pallas import tpu as pltpu

F32 = jnp.float32
BF16 = jnp.bfloat16
BIG = 1e30            # additive mask magnitude for the segment max pool


# ----------------------------------------------------------------- in-kernel math
def _mxu_bf16(a, b):
    """MXU matmul: bf16 operands, f32 accumulation (weights / feature gathers)."""
    return jnp.dot(a.astype(BF16), b.astype(BF16), preferred_element_type=F32)


def _mxu_f32(a, b):
    """MXU matmul kept fully f32 (softmax path, scatter-adds, pooling)."""
    return jnp.dot(a.astype(F32), b.astype(F32), preferred_element_type=F32)


def _elu(v):
    return jnp.where(v > 0, v, jnp.exp(jnp.minimum(v, 0.0)) - 1.0)


def _sigmoid(v):
    # exp on EUP + approx reciprocal on EUP: keeps the divide off the VALU.
    # (approx is fine here: it only gates the readout sum pool.)
    return pl.reciprocal(1.0 + jnp.exp(-v), approx=True)


def _leaky_relu(v, slope=0.2):
    return jnp.where(v >= 0, v, slope * v)


def _readout(feat, ro, w_read_ref, b_read_ref):
    """ReadoutPhase: sigmoid-gated sum pool || max pool per graph -> [B, 2D].

    ro["pool"]    : [B, R] f32  (host-pretransposed one-hot, plain matmul pool)
    ro["negmask"] : [B, R, 1] f32 (0 where row r belongs to graph b, else -1e30)
    """
    gate = _sigmoid(_mxu_bf16(feat, w_read_ref[...]) + b_read_ref[...])   # [R, 1]
    mol_sum = _mxu_f32(ro["pool"][...], feat * gate)                      # [B, D]
    # Single broadcast-masked reduction (no per-graph Python unroll):
    # feat[None] keeps its (sublane, lane) layout; mask broadcasts over lanes.
    masked = feat[None, :, :] + ro["negmask"][...]                        # [B, R, D]
    mol_max = jnp.max(masked, axis=1)                                     # [B, D]
    return jnp.concatenate([mol_sum, mol_max], axis=1)                    # [B, 2D]


def _gat_layer(x, g, p, head_mix_ref, ro):
    """GATv2Layer forward (concat=True, residual=True, bias=True, PReLU)."""
    src_p = _mxu_bf16(x, p["w_src"][...])                 # [N, HD]
    dst_p = _mxu_bf16(x, p["w_dst"][...])                 # [N, HD]
    e_src = _mxu_bf16(g["gsrc"][...], src_p)              # [E, HD] gather(src)
    e_dst = _mxu_bf16(g["gdst"][...], dst_p)              # [E, HD] gather(dst)
    s = _leaky_relu(e_src + e_dst) * p["attn"][...]       # double_attn (flat)
    # per-head sum broadcast back over head_dim in one [HD,HD] block matmul
    scores = _mxu_f32(s, head_mix_ref[...])               # [E, HD]
    # Global max shift == PyTorch reference (edge_attn.max()); guards overflow.
    exp_s = jnp.exp(scores - jnp.max(scores))             # f32
    node_sum = _mxu_f32(g["sdst"][...], exp_s)            # [N, HD] scatter-add
    denom = _mxu_f32(g["gdst"][...], node_sum)            # [E, HD] gather back
    alpha = exp_s / (denom + 1e-16)                       # exact normalisation
    agg = _mxu_f32(g["sdst"][...], e_src * alpha)         # [N, HD] scatter-add
    if p["w_res"] is None:                                # identity residual
        res = x
    else:
        res = _mxu_bf16(x, p["w_res"][...])
    out = agg + res + p["bias"][...]
    out = jnp.where(out >= 0, out, p["prelu"][...] * out)  # PReLU
    mol = _readout(out, ro, p["w_read"], p["b_read"])
    return out, mol


def _line_layer(x, l, p, ro):
    """LineEvoLayer forward (if_pos=False)."""
    h = _mxu_bf16(x, p["w"][...]) + p["b"][...]           # [Nin, D]
    h_src = _mxu_bf16(l["gsrc"][...], h)                  # [E, D]
    h_dst = _mxu_bf16(l["gdst"][...], h)                  # [E, D]
    atom = _elu(_elu(h_src + h_dst) * p["attn"][...])     # [E, D]
    mol = _readout(atom, ro, p["w_read"], p["b_read"])
    return atom, mol


# ----------------------------------------------------------------- fused kernel
def _fused_gln_kernel(*refs, treedef):
    out_ref = refs[-1]
    tree = jax.tree_util.tree_unflatten(treedef, refs[:-1])   # tree of *Refs*
    x_ref, st, pr = tree["x"], tree["structure"], tree["params"]
    hm = st["head_mix"]

    x = x_ref[...]
    # arrange = "GGLGGL"  (every operand below is read from VMEM at use-site)
    x, mol_all = _gat_layer(x, st["g0"], pr["gat"][0], hm, st["ro0"])
    x, m = _gat_layer(x, st["g0"], pr["gat"][1], hm, st["ro0"]); mol_all += m
    x, m = _line_layer(x, st["l0"], pr["line"][0], st["ro1"]);   mol_all += m
    x, m = _gat_layer(x, st["g1"], pr["gat"][2], hm, st["ro1"]); mol_all += m
    x, m = _gat_layer(x, st["g1"], pr["gat"][3], hm, st["ro1"]); mol_all += m
    x, m = _line_layer(x, st["l1"], pr["line"][1], st["ro2"]);   mol_all += m

    # MLP head: Linear -> ELU -> Linear (dropout = identity in eval mode)
    mlp = pr["mlp"]
    h = _elu(_mxu_bf16(mol_all, mlp["w1"][...]) + mlp["b1"][...])
    out_ref[...] = _mxu_bf16(h, mlp["w2"][...]) + mlp["b2"][...]


# ----------------------------------------------------------------- graph structure
def build_structure(edge_index, batch, edges_0, edges_1, num_nodes, num_graphs,
                    num_heads, head_dim):
    """Static gather/scatter/pool operands, pre-oriented so every in-kernel
    contraction is a plain [M,K]@[K,N] matmul (no Mosaic-inserted transposes)."""
    n0 = num_nodes
    l0 = edges_0.shape[0]                       # line-nodes after LineEvo 1
    B = num_graphs

    def gather_oh(idx, n):                      # [len(idx), n] bf16
        return jax.nn.one_hot(idx, n, dtype=BF16)

    def scatter_oh(idx, n):                     # [n, len(idx)] f32, host transpose
        return jax.nn.one_hot(idx, n, dtype=F32).T

    def pool_oh(bvec):                          # [B, R] f32 sum-pool matrix
        return jax.nn.one_hot(bvec, B, dtype=F32).T

    def neg_mask(bvec):                         # [B, R, 1] additive max-pool mask
        m = jax.nn.one_hot(bvec, B, dtype=F32).T
        return ((m - 1.0) * BIG)[..., None]     # 0 if member else -1e30

    # Level-1 GAT edge_index = to_undirected(edges_0.T): synthetic data gives
    # unique (a<b) pairs, so simple symmetrization matches torch_geometric
    # (edge order differs, but GAT aggregation is edge-permutation-invariant).
    src1 = jnp.concatenate([edges_0[:, 0], edges_0[:, 1]])
    dst1 = jnp.concatenate([edges_0[:, 1], edges_0[:, 0]])

    batch1 = batch[edges_0[:, 0]]               # batch ids for line-nodes lvl 1
    batch2 = batch1[edges_1[:, 0]]              # batch ids for line-nodes lvl 2

    head_mix = jnp.kron(jnp.eye(num_heads, dtype=F32),
                        jnp.ones((head_dim, head_dim), F32))

    return dict(
        head_mix=head_mix,
        # GAT layers 0,1 on original nodes
        g0=dict(gsrc=gather_oh(edge_index[0], n0),
                gdst=gather_oh(edge_index[1], n0),
                sdst=scatter_oh(edge_index[1], n0)),
        # GAT layers 2,3 on line-nodes (indices follow the reference's
        # to_undirected(edges_0) quirk; max index < l0 so it is well-defined)
        g1=dict(gsrc=gather_oh(src1, l0),
                gdst=gather_oh(dst1, l0),
                sdst=scatter_oh(dst1, l0)),
        # LineEvo 1 / 2 gathers
        l0=dict(gsrc=gather_oh(edges_0[:, 0], n0), gdst=gather_oh(edges_0[:, 1], n0)),
        l1=dict(gsrc=gather_oh(edges_1[:, 0], l0), gdst=gather_oh(edges_1[:, 1], l0)),
        # per-level readout operands
        ro0=dict(pool=pool_oh(batch),  negmask=neg_mask(batch)),
        ro1=dict(pool=pool_oh(batch1), negmask=neg_mask(batch1)),
        ro2=dict(pool=pool_oh(batch2), negmask=neg_mask(batch2)),
    )


# ----------------------------------------------------------------- VMEM budget
def _vmem_budget(flat_arrays):
    """Generation-aware VMEM limit: footprint + headroom, capped at ~75% of the
    physical per-core VMEM so Mosaic keeps scratch/spill room (v7x: 64 MiB)."""
    footprint = sum(int(a.size) * a.dtype.itemsize for a in flat_arrays)
    try:
        cap = int(pltpu.get_tpu_info().vmem_capacity_bytes)
    except Exception:
        cap = 64 * 1024 * 1024          # conservative: smallest (v7x per-TC)
    budget = 2 * footprint + (16 << 20)
    return int(max(32 << 20, min(budget, (cap * 3) // 4)))


# ----------------------------------------------------------------- forward wrapper
@functools.partial(jax.jit, static_argnames=("num_graphs", "num_heads", "output_dim"))
def gln_forward(params, x, edge_index, batch, edges_0, edges_1, *,
                num_graphs, num_heads, output_dim):
    hd = params["gat"][0]["w_src"].shape[1]
    head_dim = hd // num_heads
    structure = build_structure(edge_index, batch, edges_0, edges_1,
                                x.shape[0], num_graphs, num_heads, head_dim)
    inputs = dict(x=x, structure=structure, params=params)
    flat, treedef = jax.tree_util.tree_flatten(inputs)

    kernel = functools.partial(_fused_gln_kernel, treedef=treedef)
    # TODO(synk): gridless single-TC call; at production sizes switch to a
    #             PrefetchScalarGridSpec edge-tile grid with a "parallel"
    #             leading axis so the v7x 2-TC megacore is used and HBM
    #             fetches are pipelined (Buffered(2-3)).
    return pl.pallas_call(
        kernel,
        out_shape=jax.ShapeDtypeStruct((num_graphs, output_dim), F32),
        in_specs=[pl.BlockSpec(memory_space=pltpu.MemorySpace.VMEM)] * len(flat),
        out_specs=pl.BlockSpec(memory_space=pltpu.MemorySpace.VMEM),
        compiler_params=pltpu.CompilerParams(vmem_limit_bytes=_vmem_budget(flat)),
    )(*flat)


# ----------------------------------------------------------------- params
def _xavier(key, shape):
    fan_in, fan_out = shape
    limit = (6.0 / (fan_in + fan_out)) ** 0.5
    return jax.random.uniform(key, shape, F32, -limit, limit)


def init_gat_params(key, f_in, heads, head_dim):
    hd = heads * head_dim
    ks = jax.random.split(key, 5)
    return dict(
        w_src=_xavier(ks[0], (f_in, hd)).astype(BF16),
        w_dst=_xavier(ks[1], (f_in, hd)).astype(BF16),
        attn=_xavier(ks[2], (1, hd)),                       # f32, VPU elementwise
        # identity residual when f_in == HD -> no matmul / no weight at all
        w_res=None if f_in == hd else _xavier(ks[3], (f_in, hd)).astype(BF16),
        bias=jnp.zeros((1, hd), F32),
        prelu=jnp.full((1, 1), 0.25, F32),
        w_read=_xavier(ks[4], (hd, 1)).astype(BF16),
        b_read=jnp.zeros((1, 1), F32),
    )


def init_line_params(key, f_in, dim):
    ks = jax.random.split(key, 3)
    return dict(
        w=_xavier(ks[0], (f_in, dim)).astype(BF16),
        b=jnp.zeros((1, dim), F32),
        attn=_xavier(ks[1], (1, dim)),
        w_read=_xavier(ks[2], (dim, 1)).astype(BF16),
        b_read=jnp.zeros((1, 1), F32),
    )


def init_mlp_params(key, f_in, hidden, f_out):
    ks = jax.random.split(key, 2)
    return dict(
        w1=_xavier(ks[0], (f_in, hidden)).astype(BF16),
        b1=jnp.zeros((1, hidden), F32),
        w2=_xavier(ks[1], (hidden, f_out)).astype(BF16),
        b2=jnp.zeros((1, f_out), F32),
    )


def init_gln_params(key, input_dim, hidden_dim, num_heads, output_dim):
    head_dim = hidden_dim // num_heads
    ks = jax.random.split(key, 7)
    gat = [init_gat_params(ks[0], input_dim, num_heads, head_dim),
           init_gat_params(ks[1], hidden_dim, num_heads, head_dim),
           init_gat_params(ks[2], hidden_dim, num_heads, head_dim),
           init_gat_params(ks[3], hidden_dim, num_heads, head_dim)]
    line = [init_line_params(ks[4], hidden_dim, hidden_dim),
            init_line_params(ks[5], hidden_dim, hidden_dim)]
    mlp = init_mlp_params(ks[6], 2 * hidden_dim, 128, output_dim)
    return dict(gat=gat, line=line, mlp=mlp)


# ----------------------------------------------------------------- main
if __name__ == "__main__":
    INPUT_DIM, HIDDEN_DIM, NUM_HEADS, OUTPUT_DIM = 16, 32, 4, 2
    NUM_GRAPHS = 2
    NUM_NODES = 10

    key = jax.random.PRNGKey(0)
    k_x, k_p = jax.random.split(key)

    x = jax.random.normal(k_x, (NUM_NODES, INPUT_DIM), F32)
    batch = jnp.array([0, 0, 0, 0, 0, 1, 1, 1, 1, 1], jnp.int32)

    # original molecular graph edges (directed list, both graphs)
    edge_index = jnp.array(
        [[0, 1, 1, 2, 2, 3, 3, 4, 0, 2, 5, 6, 6, 7, 7, 8, 8, 9, 5, 7, 1, 4, 6, 9],
         [1, 0, 2, 1, 3, 2, 4, 3, 2, 0, 6, 5, 7, 6, 8, 7, 9, 8, 7, 5, 4, 1, 9, 6]],
        jnp.int32)

    # LineEvo evolution edges (unique a<b pairs; edges_0 indexes original nodes,
    # edges_1 indexes the 12 line-nodes produced by the first LineEvo layer)
    edges_0 = jnp.array([[0, 1], [1, 2], [2, 3], [3, 4], [0, 2], [1, 4],
                         [5, 6], [6, 7], [7, 8], [8, 9], [5, 7], [6, 9]], jnp.int32)
    edges_1 = jnp.array([[0, 1], [1, 2], [2, 3], [3, 5],
                         [6, 7], [7, 8], [8, 9], [6, 11]], jnp.int32)

    params = init_gln_params(k_p, INPUT_DIM, HIDDEN_DIM, NUM_HEADS, OUTPUT_DIM)

    out = gln_forward(params, x, edge_index, batch, edges_0, edges_1,
                      num_graphs=NUM_GRAPHS, num_heads=NUM_HEADS,
                      output_dim=OUTPUT_DIM)
    jax.block_until_ready(out)
    assert out.shape == (NUM_GRAPHS, OUTPUT_DIM)
    assert bool(jnp.all(jnp.isfinite(out)))
    print("KERNEL_OK")
</pallas_src>

<mosaic_0001>
module attributes {stable_mosaic.version = 11 : i64} {
  func.func @_fused_gln_kernel(%arg0: memref<1x32xf32, #tpu.memory_space<vmem>>, %arg1: memref<1x1xf32, #tpu.memory_space<vmem>>, %arg2: memref<1x32xf32, #tpu.memory_space<vmem>>, %arg3: memref<1x1xf32, #tpu.memory_space<vmem>>, %arg4: memref<16x32xbf16, #tpu.memory_space<vmem>>, %arg5: memref<32x1xbf16, #tpu.memory_space<vmem>>, %arg6: memref<16x32xbf16, #tpu.memory_space<vmem>>, %arg7: memref<16x32xbf16, #tpu.memory_space<vmem>>, %arg8: memref<1x32xf32, #tpu.memory_space<vmem>>, %arg9: memref<1x1xf32, #tpu.memory_space<vmem>>, %arg10: memref<1x32xf32, #tpu.memory_space<vmem>>, %arg11: memref<1x1xf32, #tpu.memory_space<vmem>>, %arg12: memref<32x32xbf16, #tpu.memory_space<vmem>>, %arg13: memref<32x1xbf16, #tpu.memory_space<vmem>>, %arg14: memref<32x32xbf16, #tpu.memory_space<vmem>>, %arg15: memref<1x32xf32, #tpu.memory_space<vmem>>, %arg16: memref<1x1xf32, #tpu.memory_space<vmem>>, %arg17: memref<1x32xf32, #tpu.memory_space<vmem>>, %arg18: memref<1x1xf32, #tpu.memory_space<vmem>>, %arg19: memref<32x32xbf16, #tpu.memory_space<vmem>>, %arg20: memref<32x1xbf16, #tpu.memory_space<vmem>>, %arg21: memref<32x32xbf16, #tpu.memory_space<vmem>>, %arg22: memref<1x32xf32, #tpu.memory_space<vmem>>, %arg23: memref<1x1xf32, #tpu.memory_space<vmem>>, %arg24: memref<1x32xf32, #tpu.memory_space<vmem>>, %arg25: memref<1x1xf32, #tpu.memory_space<vmem>>, %arg26: memref<32x32xbf16, #tpu.memory_space<vmem>>, %arg27: memref<32x1xbf16, #tpu.memory_space<vmem>>, %arg28: memref<32x32xbf16, #tpu.memory_space<vmem>>, %arg29: memref<1x32xf32, #tpu.memory_space<vmem>>, %arg30: memref<1x32xf32, #tpu.memory_space<vmem>>, %arg31: memref<1x1xf32, #tpu.memory_space<vmem>>, %arg32: memref<32x32xbf16, #tpu.memory_space<vmem>>, %arg33: memref<32x1xbf16, #tpu.memory_space<vmem>>, %arg34: memref<1x32xf32, #tpu.memory_space<vmem>>, %arg35: memref<1x32xf32, #tpu.memory_space<vmem>>, %arg36: memref<1x1xf32, #tpu.memory_space<vmem>>, %arg37: memref<32x32xbf16, #tpu.memory_space<vmem>>, %arg38: memref<32x1xbf16, #tpu.memory_space<vmem>>, %arg39: memref<1x128xf32, #tpu.memory_space<vmem>>, %arg40: memref<1x2xf32, #tpu.memory_space<vmem>>, %arg41: memref<64x128xbf16, #tpu.memory_space<vmem>>, %arg42: memref<128x2xbf16, #tpu.memory_space<vmem>>, %arg43: memref<24x10xbf16, #tpu.memory_space<vmem>>, %arg44: memref<24x10xbf16, #tpu.memory_space<vmem>>, %arg45: memref<10x24xf32, #tpu.memory_space<vmem>>, %arg46: memref<24x12xbf16, #tpu.memory_space<vmem>>, %arg47: memref<24x12xbf16, #tpu.memory_space<vmem>>, %arg48: memref<12x24xf32, #tpu.memory_space<vmem>>, %arg49: memref<32x32xf32, #tpu.memory_space<vmem>>, %arg50: memref<12x10xbf16, #tpu.memory_space<vmem>>, %arg51: memref<12x10xbf16, #tpu.memory_space<vmem>>, %arg52: memref<8x12xbf16, #tpu.memory_space<vmem>>, %arg53: memref<8x12xbf16, #tpu.memory_space<vmem>>, %arg54: memref<2x10x1xf32, #tpu.memory_space<vmem>>, %arg55: memref<2x10xf32, #tpu.memory_space<vmem>>, %arg56: memref<2x12x1xf32, #tpu.memory_space<vmem>>, %arg57: memref<2x12xf32, #tpu.memory_space<vmem>>, %arg58: memref<2x8x1xf32, #tpu.memory_space<vmem>>, %arg59: memref<2x8xf32, #tpu.memory_space<vmem>>, %arg60: memref<10x16xf32, #tpu.memory_space<vmem>>, %arg61: memref<2x2xf32, #tpu.memory_space<vmem>>) attributes {dimension_semantics = [], scalar_prefetch = 0 : i64, scratch_operands = 0 : i64, tpu.core_type = #tpu.core_type<tc>} {
    %c0 = arith.constant 0 : index
    %c0_0 = arith.constant 0 : index
    %0 = vector.load %arg60[%c0, %c0_0] : memref<10x16xf32, #tpu.memory_space<vmem>>, vector<10x16xf32>
    %c0_1 = arith.constant 0 : index
    %c0_2 = arith.constant 0 : index
    %1 = vector.load %arg7[%c0_1, %c0_2] : memref<16x32xbf16, #tpu.memory_space<vmem>>, vector<16x32xbf16>
    %2 = arith.truncf %0 : vector<10x16xf32> to vector<10x16xbf16>
    %cst = arith.constant dense<0.000000e+00> : vector<10x32xf32>
    %3 = tpu.matmul %2, %1, %cst {dimension_numbers = #tpu.dot_dimension_numbers<[1], [0], [0], [1], [0, 0, 1, 1], [], []>} : vector<10x16xbf16>, vector<16x32xbf16>, vector<10x32xf32> -> vector<10x32xf32>
    %c0_3 = arith.constant 0 : index
    %c0_4 = arith.constant 0 : index
    %4 = vector.load %arg4[%c0_3, %c0_4] : memref<16x32xbf16, #tpu.memory_space<vmem>>, vector<16x32xbf16>
    %5 = arith.truncf %0 : vector<10x16xf32> to vector<10x16xbf16>
    %cst_5 = arith.constant dense<0.000000e+00> : vector<10x32xf32>
    %6 = tpu.matmul %5, %4, %cst_5 {dimension_numbers = #tpu.dot_dimension_numbers<[1], [0], [0], [1], [0, 0, 1, 1], [], []>} : vector<10x16xbf16>, vector<16x32xbf16>, vector<10x32xf32> -> vector<10x32xf32>
    %c0_6 = arith.constant 0 : index
    %c0_7 = arith.constant 0 : index
    %7 = vector.load %arg44[%c0_6, %c0_7] : memref<24x10xbf16, #tpu.memory_space<vmem>>, vector<24x10xbf16>
    %8 = arith.truncf %3 : vector<10x32xf32> to vector<10x32xbf16>
    %cst_8 = arith.constant dense<0.000000e+00> : vector<24x32xf32>
    %9 = tpu.matmul %7, %8, %cst_8 {dimension_numbers = #tpu.dot_dimension_numbers<[1], [0], [0], [1], [0, 0, 1, 1], [], []>} : vector<24x10xbf16>, vector<10x32xbf16>, vector<24x32xf32> -> vector<24x32xf32>
    %c0_9 = arith.constant 0 : index
    %c0_10 = arith.constant 0 : index
    %10 = vector.load %arg43[%c0_9, %c0_10] : memref<24x10xbf16, #tpu.memory_space<vmem>>, vector<24x10xbf16>
    %11 = arith.truncf %6 : vector<10x32xf32> to vector<10x32xbf16>
    %cst_11 = arith.constant dense<0.000000e+00> : vector<24x32xf32>
    %12 = tpu.matmul %10, %11, %cst_11 {dimension_numbers = #tpu.dot_dimension_numbers<[1], [0], [0], [1], [0, 0, 1, 1], [], []>} : vector<24x10xbf16>, vector<10x32xbf16>, vector<24x32xf32> -> vector<24x32xf32>
    %13 = arith.addf %9, %12 : vector<24x32xf32>
    %cst_12 = arith.constant 0.000000e+00 : f32
    %14 = vector.broadcast %cst_12 : f32 to vector<24x32xf32>
    %15 = arith.cmpf oge, %13, %14 : vector<24x32xf32>
    %cst_13 = arith.constant 2.000000e-01 : f32
    %16 = vector.broadcast %cst_13 : f32 to vector<24x32xf32>
    %17 = arith.mulf %16, %13 : vector<24x32xf32>
    %18 = arith.select %15, %13, %17 : vector<24x32xi1>, vector<24x32xf32>
    %c0_14 = arith.constant 0 : index
    %c0_15 = arith.constant 0 : index
    %19 = vector.load %arg0[%c0_14, %c0_15] : memref<1x32xf32, #tpu.memory_space<vmem>>, vector<1x32xf32>
    %20 = vector.broadcast %19 : vector<1x32xf32> to vector<24x32xf32>
    %21 = arith.mulf %18, %20 : vector<24x32xf32>
    %c0_16 = arith.constant 0 : index
    %c0_17 = arith.constant 0 : index
    %22 = vector.load %arg49[%c0_16, %c0_17] : memref<32x32xf32, #tpu.memory_space<vmem>>, vector<32x32xf32>
    %cst_18 = arith.constant dense<0.000000e+00> : vector<24x32xf32>
    %23 = tpu.matmul %21, %22, %cst_18 {dimension_numbers = #tpu.dot_dimension_numbers<[1], [0], [0], [1], [0, 0, 1, 1], [], []>} : vector<24x32xf32>, vector<32x32xf32>, vector<24x32xf32> -> vector<24x32xf32>
    %24 = vector.shape_cast %23 : vector<24x32xf32> to vector<1x24x32xf32>
    %cst_19 = arith.constant dense<0xFF800000> : vector<1xf32>
    %25 = vector.multi_reduction <maximumf>, %24, %cst_19 [1, 2] : vector<1x24x32xf32> to vector<1xf32>
    %26 = vector.shape_cast %25 : vector<1xf32> to vector<1x1x1xf32>
    %27 = vector.extract %26[0, 0, 0] : f32 from vector<1x1x1xf32>
    %28 = vector.broadcast %27 : f32 to vector<24x32xf32>
    %29 = arith.subf %23, %28 : vector<24x32xf32>
    %30 = math.exp %29 : vector<24x32xf32>
    %c0_20 = arith.constant 0 : index
    %c0_21 = arith.constant 0 : index
    %31 = vector.load %arg45[%c0_20, %c0_21] : memref<10x24xf32, #tpu.memory_space<vmem>>, vector<10x24xf32>
    %cst_22 = arith.constant dense<0.000000e+00> : vector<10x32xf32>
    %32 = tpu.matmul %31, %30, %cst_22 {dimension_numbers = #tpu.dot_dimension_numbers<[1], [0], [0], [1], [0, 0, 1, 1], [], []>} : vector<10x24xf32>, vector<24x32xf32>, vector<10x32xf32> -> vector<10x32xf32>
    %c0_23 = arith.constant 0 : index
    %c0_24 = arith.constant 0 : index
    %33 = vector.load %arg43[%c0_23, %c0_24] : memref<24x10xbf16, #tpu.memory_space<vmem>>, vector<24x10xbf16>
    %34 = arith.extf %33 : vector<24x10xbf16> to vector<24x10xf32>
    %cst_25 = arith.constant dense<0.000000e+00> : vector<24x32xf32>
    %35 = tpu.matmul %34, %32, %cst_25 {dimension_numbers = #tpu.dot_dimension_numbers<[1], [0], [0], [1], [0, 0, 1, 1], [], []>} : vector<24x10xf32>, vector<10x32xf32>, vector<24x32xf32> -> vector<24x32xf32>
    %cst_26 = arith.constant 1.000000e-16 : f32
    %36 = vector.broadcast %cst_26 : f32 to vector<24x32xf32>
    %37 = arith.addf %35, %36 : vector<24x32xf32>
    %38 = arith.divf %30, %37 : vector<24x32xf32>
    %c0_27 = arith.constant 0 : index
    %c0_28 = arith.constant 0 : index
    %39 = vector.load %arg45[%c0_27, %c0_28] : memref<10x24xf32, #tpu.memory_space<vmem>>, vector<10x24xf32>
    %40 = arith.mulf %9, %38 : vector<24x32xf32>
    %cst_29 = arith.constant dense<0.000000e+00> : vector<10x32xf32>
    %41 = tpu.matmul %39, %40, %cst_29 {dimension_numbers = #tpu.dot_dimension_numbers<[1], [0], [0], [1], [0, 0, 1, 1], [], []>} : vector<10x24xf32>, vector<24x32xf32>, vector<10x32xf32> -> vector<10x32xf32>
    %c0_30 = arith.constant 0 : index
    %c0_31 = arith.constant 0 : index
    %42 = vector.load %arg6[%c0_30, %c0_31] : memref<16x32xbf16, #tpu.memory_space<vmem>>, vector<16x32xbf16>
    %43 = arith.truncf %0 : vector<10x16xf32> to vector<10x16xbf16>
    %cst_32 = arith.constant dense<0.000000e+00> : vector<10x32xf32>
    %44 = tpu.matmul %43, %42, %cst_32 {dimension_numbers = #tpu.dot_dimension_numbers<[1], [0], [0], [1], [0, 0, 1, 1], [], []>} : vector<10x16xbf16>, vector<16x32xbf16>, vector<10x32xf32> -> vector<10x32xf32>
    %45 = arith.addf %41, %44 : vector<10x32xf32>
    %c0_33 = arith.constant 0 : index
    %c0_34 = arith.constant 0 : index
    %46 = vector.load %arg2[%c0_33, %c0_34] : memref<1x32xf32, #tpu.memory_space<vmem>>, vector<1x32xf32>
    %47 = vector.broadcast %46 : vector<1x32xf32> to vector<10x32xf32>
    %48 = arith.addf %45, %47 : vector<10x32xf32>
    %cst_35 = arith.constant 0.000000e+00 : f32
    %49 = vector.broadcast %cst_35 : f32 to vector<10x32xf32>
    %50 = arith.cmpf oge, %48, %49 : vector<10x32xf32>
    %c0_36 = arith.constant 0 : index
    %c0_37 = arith.constant 0 : index
    %51 = vector.load %arg3[%c0_36, %c0_37] : memref<1x1xf32, #tpu.memory_space<vmem>>, vector<1x1xf32>
    %52 = vector.broadcast %51 : vector<1x1xf32> to vector<10x32xf32>
    %53 = arith.mulf %52, %48 : vector<10x32xf32>
    %54 = arith.select %50, %48, %53 : vector<10x32xi1>, vector<10x32xf32>
    %c0_38 = arith.constant 0 : index
    %c0_39 = arith.constant 0 : index
    %55 = vector.load %arg5[%c0_38, %c0_39] : memref<32x1xbf16, #tpu.memory_space<vmem>>, vector<32x1xbf16>
    %56 = arith.truncf %54 : vector<10x32xf32> to vector<10x32xbf16>
    %cst_40 = arith.constant dense<0.000000e+00> : vector<10x1xf32>
    %57 = tpu.matmul %56, %55, %cst_40 {dimension_numbers = #tpu.dot_dimension_numbers<[1], [0], [0], [1], [0, 0, 1, 1], [], []>} : vector<10x32xbf16>, vector<32x1xbf16>, vector<10x1xf32> -> vector<10x1xf32>
    %c0_41 = arith.constant 0 : index
    %c0_42 = arith.constant 0 : index
    %58 = vector.load %arg1[%c0_41, %c0_42] : memref<1x1xf32, #tpu.memory_space<vmem>>, vector<1x1xf32>
    %59 = vector.broadcast %58 : vector<1x1xf32> to vector<10x1xf32>
    %60 = arith.addf %57, %59 : vector<10x1xf32>
    %cst_43 = arith.constant 0.000000e+00 : f32
    %61 = vector.broadcast %cst_43 : f32 to vector<10x1xf32>
    %62 = arith.subf %61, %60 : vector<10x1xf32>
    %63 = math.exp %62 : vector<10x1xf32>
    %cst_44 = arith.constant 1.000000e+00 : f32
    %64 = vector.broadcast %cst_44 : f32 to vector<10x1xf32>
    %65 = arith.addf %64, %63 : vector<10x1xf32>
    %66 = tpu.reciprocal %65 {approx = true} : vector<10x1xf32> -> vector<10x1xf32>
    %c0_45 = arith.constant 0 : index
    %c0_46 = arith.constant 0 : index
    %67 = vector.load %arg55[%c0_45, %c0_46] : memref<2x10xf32, #tpu.memory_space<vmem>>, vector<2x10xf32>
    %68 = vector.broadcast %66 : vector<10x1xf32> to vector<10x32xf32>
    %69 = arith.mulf %54, %68 : vector<10x32xf32>
    %cst_47 = arith.constant dense<0.000000e+00> : vector<2x32xf32>
    %70 = tpu.matmul %67, %69, %cst_47 {dimension_numbers = #tpu.dot_dimension_numbers<[1], [0], [0], [1], [0, 0, 1, 1], [], []>} : vector<2x10xf32>, vector<10x32xf32>, vector<2x32xf32> -> vector<2x32xf32>
    %71 = vector.shape_cast %54 : vector<10x32xf32> to vector<1x10x32xf32>
    %c0_48 = arith.constant 0 : index
    %c0_49 = arith.constant 0 : index
    %c0_50 = arith.constant 0 : index
    %72 = vector.load %arg54[%c0_48, %c0_49, %c0_50] : memref<2x10x1xf32, #tpu.memory_space<vmem>>, vector<2x10x1xf32>
    %73 = vector.broadcast %71 : vector<1x10x32xf32> to vector<2x10x32xf32>
    %74 = vector.broadcast %72 : vector<2x10x1xf32> to vector<2x10x32xf32>
    %75 = arith.addf %73, %74 : vector<2x10x32xf32>
    %cst_51 = arith.constant dense<0xFF800000> : vector<2x32xf32>
    %76 = vector.multi_reduction <maximumf>, %75, %cst_51 [1] : vector<2x10x32xf32> to vector<2x32xf32>
    %77 = tpu.concatenate %70, %76 in 1 : vector<2x32xf32>, vector<2x32xf32> -> vector<2x64xf32>
    %c0_52 = arith.constant 0 : index
    %c0_53 = arith.constant 0 : index
    %78 = vector.load %arg14[%c0_52, %c0_53] : memref<32x32xbf16, #tpu.memory_space<vmem>>, vector<32x32xbf16>
    %79 = arith.truncf %54 : vector<10x32xf32> to vector<10x32xbf16>
    %cst_54 = arith.constant dense<0.000000e+00> : vector<10x32xf32>
    %80 = tpu.matmul %79, %78, %cst_54 {dimension_numbers = #tpu.dot_dimension_numbers<[1], [0], [0], [1], [0, 0, 1, 1], [], []>} : vector<10x32xbf16>, vector<32x32xbf16>, vector<10x32xf32> -> vector<10x32xf32>
    %c0_55 = arith.constant 0 : index
    %c0_56 = arith.constant 0 : index
    %81 = vector.load %arg12[%c0_55, %c0_56] : memref<32x32xbf16, #tpu.memory_space<vmem>>, vector<32x32xbf16>
    %82 = arith.truncf %54 : vector<10x32xf32> to vector<10x32xbf16>
    %cst_57 = arith.constant dense<0.000000e+00> : vector<10x32xf32>
    %83 = tpu.matmul %82, %81, %cst_57 {dimension_numbers = #tpu.dot_dimension_numbers<[1], [0], [0], [1], [0, 0, 1, 1], [], []>} : vector<10x32xbf16>, vector<32x32xbf16>, vector<10x32xf32> -> vector<10x32xf32>
    %c0_58 = arith.constant 0 : index
    %c0_59 = arith.constant 0 : index
    %84 = vector.load %arg44[%c0_58, %c0_59] : memref<24x10xbf16, #tpu.memory_space<vmem>>, vector<24x10xbf16>
    %85 = arith.truncf %80 : vector<10x32xf32> to vector<10x32xbf16>
    %cst_60 = arith.constant dense<0.000000e+00> : vector<24x32xf32>
    %86 = tpu.matmul %84, %85, %cst_60 {dimension_numbers = #tpu.dot_dimension_numbers<[1], [0], [0], [1], [0, 0, 1, 1], [], []>} : vector<24x10xbf16>, vector<10x32xbf16>, vector<24x32xf32> -> vector<24x32xf32>
    %c0_61 = arith.constant 0 : index
    %c0_62 = arith.constant 0 : index
    %87 = vector.load %arg43[%c0_61, %c0_62] : memref<24x10xbf16, #tpu.memory_space<vmem>>, vector<24x10xbf16>
    %88 = arith.truncf %83 : vector<10x32xf32> to vector<10x32xbf16>
    %cst_63 = arith.constant dense<0.000000e+00> : vector<24x32xf32>
    %89 = tpu.matmul %87, %88, %cst_63 {dimension_numbers = #tpu.dot_dimension_numbers<[1], [0], [0], [1], [0, 0, 1, 1], [], []>} : vector<24x10xbf16>, vector<10x32xbf16>, vector<24x32xf32> -> vector<24x32xf32>
    %90 = arith.addf %86, %89 : vector<24x32xf32>
    %cst_64 = arith.constant 0.000000e+00 : f32
    %91 = vector.broadcast %cst_64 : f32 to vector<24x32xf32>
    %92 = arith.cmpf oge, %90, %91 : vector<24x32xf32>
    %cst_65 = arith.constant 2.000000e-01 : f32
    %93 = vector.broadcast %cst_65 : f32 to vector<24x32xf32>
    %94 = arith.mulf %93, %90 : vector<24x32xf32>
    %95 = arith.select %92, %90, %94 : vector<24x32xi1>, vector<24x32xf32>
    %c0_66 = arith.constant 0 : index
    %c0_67 = arith.constant 0 : index
    %96 = vector.load %arg8[%c0_66, %c0_67] : memref<1x32xf32, #tpu.memory_space<vmem>>, vector<1x32xf32>
    %97 = vector.broadcast %96 : vector<1x32xf32> to vector<24x32xf32>
    %98 = arith.mulf %95, %97 : vector<24x32xf32>
    %c0_68 = arith.constant 0 : index
    %c0_69 = arith.constant 0 : index
    %99 = vector.load %arg49[%c0_68, %c0_69] : memref<32x32xf32, #tpu.memory_space<vmem>>, vector<32x32xf32>
    %cst_70 = arith.constant dense<0.000000e+00> : vector<24x32xf32>
    %100 = tpu.matmul %98, %99, %cst_70 {dimension_numbers = #tpu.dot_dimension_numbers<[1], [0], [0], [1], [0, 0, 1, 1], [], []>} : vector<24x32xf32>, vector<32x32xf32>, vector<24x32xf32> -> vector<24x32xf32>
    %101 = vector.shape_cast %100 : vector<24x32xf32> to vector<1x24x32xf32>
    %cst_71 = arith.constant dense<0xFF800000> : vector<1xf32>
    %102 = vector.multi_reduction <maximumf>, %101, %cst_71 [1, 2] : vector<1x24x32xf32> to vector<1xf32>
    %103 = vector.shape_cast %102 : vector<1xf32> to vector<1x1x1xf32>
    %104 = vector.extract %103[0, 0, 0] : f32 from vector<1x1x1xf32>
    %105 = vector.broadcast %104 : f32 to vector<24x32xf32>
    %106 = arith.subf %100, %105 : vector<24x32xf32>
    %107 = math.exp %106 : vector<24x32xf32>
    %c0_72 = arith.constant 0 : index
    %c0_73 = arith.constant 0 : index
    %108 = vector.load %arg45[%c0_72, %c0_73] : memref<10x24xf32, #tpu.memory_space<vmem>>, vector<10x24xf32>
    %cst_74 = arith.constant dense<0.000000e+00> : vector<10x32xf32>
    %109 = tpu.matmul %108, %107, %cst_74 {dimension_numbers = #tpu.dot_dimension_numbers<[1], [0], [0], [1], [0, 0, 1, 1], [], []>} : vector<10x24xf32>, vector<24x32xf32>, vector<10x32xf32> -> vector<10x32xf32>
    %c0_75 = arith.constant 0 : index
    %c0_76 = arith.constant 0 : index
    %110 = vector.load %arg43[%c0_75, %c0_76] : memref<24x10xbf16, #tpu.memory_space<vmem>>, vector<24x10xbf16>
    %111 = arith.extf %110 : vector<24x10xbf16> to vector<24x10xf32>
    %cst_77 = arith.constant dense<0.000000e+00> : vector<24x32xf32>
    %112 = tpu.matmul %111, %109, %cst_77 {dimension_numbers = #tpu.dot_dimension_numbers<[1], [0], [0], [1], [0, 0, 1, 1], [], []>} : vector<24x10xf32>, vector<10x32xf32>, vector<24x32xf32> -> vector<24x32xf32>
    %cst_78 = arith.constant 1.000000e-16 : f32
    %113 = vector.broadcast %cst_78 : f32 to vector<24x32xf32>
    %114 = arith.addf %112, %113 : vector<24x32xf32>
    %115 = arith.divf %107, %114 : vector<24x32xf32>
    %c0_79 = arith.constant 0 : index
    %c0_80 = arith.constant 0 : index
    %116 = vector.load %arg45[%c0_79, %c0_80] : memref<10x24xf32, #tpu.memory_space<vmem>>, vector<10x24xf32>
    %117 = arith.mulf %86, %115 : vector<24x32xf32>
    %cst_81 = arith.constant dense<0.000000e+00> : vector<10x32xf32>
    %118 = tpu.matmul %116, %117, %cst_81 {dimension_numbers = #tpu.dot_dimension_numbers<[1], [0], [0], [1], [0, 0, 1, 1], [], []>} : vector<10x24xf32>, vector<24x32xf32>, vector<10x32xf32> -> vector<10x32xf32>
    %119 = arith.addf %118, %54 : vector<10x32xf32>
    %c0_82 = arith.constant 0 : index
    %c0_83 = arith.constant 0 : index
    %120 = vector.load %arg10[%c0_82, %c0_83] : memref<1x32xf32, #tpu.memory_space<vmem>>, vector<1x32xf32>
    %121 = vector.broadcast %120 : vector<1x32xf32> to vector<10x32xf32>
    %122 = arith.addf %119, %121 : vector<10x32xf32>
    %cst_84 = arith.constant 0.000000e+00 : f32
    %123 = vector.broadcast %cst_84 : f32 to vector<10x32xf32>
    %124 = arith.cmpf oge, %122, %123 : vector<10x32xf32>
    %c0_85 = arith.constant 0 : index
    %c0_86 = arith.constant 0 : index
    %125 = vector.load %arg11[%c0_85, %c0_86] : memref<1x1xf32, #tpu.memory_space<vmem>>, vector<1x1xf32>
    %126 = vector.broadcast %125 : vector<1x1xf32> to vector<10x32xf32>
    %127 = arith.mulf %126, %122 : vector<10x32xf32>
    %128 = arith.select %124, %122, %127 : vector<10x32xi1>, vector<10x32xf32>
    %c0_87 = arith.constant 0 : index
    %c0_88 = arith.constant 0 : index
    %129 = vector.load %arg13[%c0_87, %c0_88] : memref<32x1xbf16, #tpu.memory_space<vmem>>, vector<32x1xbf16>
    %130 = arith.truncf %128 : vector<10x32xf32> to vector<10x32xbf16>
    %cst_89 = arith.constant dense<0.000000e+00> : vector<10x1xf32>
    %131 = tpu.matmul %130, %129, %cst_89 {dimension_numbers = #tpu.dot_dimension_numbers<[1], [0], [0], [1], [0, 0, 1, 1], [], []>} : vector<10x32xbf16>, vector<32x1xbf16>, vector<10x1xf32> -> vector<10x1xf32>
    %c0_90 = arith.constant 0 : index
    %c0_91 = arith.constant 0 : index
    %132 = vector.load %arg9[%c0_90, %c0_91] : memref<1x1xf32, #tpu.memory_space<vmem>>, vector<1x1xf32>
    %133 = vector.broadcast %132 : vector<1x1xf32> to vector<10x1xf32>
    %134 = arith.addf %131, %133 : vector<10x1xf32>
    %cst_92 = arith.constant 0.000000e+00 : f32
    %135 = vector.broadcast %cst_92 : f32 to vector<10x1xf32>
    %136 = arith.subf %135, %134 : vector<10x1xf32>
    %137 = math.exp %136 : vector<10x1xf32>
    %cst_93 = arith.constant 1.000000e+00 : f32
    %138 = vector.broadcast %cst_93 : f32 to vector<10x1xf32>
    %139 = arith.addf %138, %137 : vector<10x1xf32>
    %140 = tpu.reciprocal %139 {approx = true} : vector<10x1xf32> -> vector<10x1xf32>
    %c0_94 = arith.constant 0 : index
    %c0_95 = arith.constant 0 : index
    %141 = vector.load %arg55[%c0_94, %c0_95] : memref<2x10xf32, #tpu.memory_space<vmem>>, vector<2x10xf32>
    %142 = vector.broadcast %140 : vector<10x1xf32> to vector<10x32xf32>
    %143 = arith.mulf %128, %142 : vector<10x32xf32>
    %cst_96 = arith.constant dense<0.000000e+00> : vector<2x32xf32>
    %144 = tpu.matmul %141, %143, %cst_96 {dimension_numbers = #tpu.dot_dimension_numbers<[1], [0], [0], [1], [0, 0, 1, 1], [], []>} : vector<2x10xf32>, vector<10x32xf32>, vector<2x32xf32> -> vector<2x32xf32>
    %145 = vector.shape_cast %128 : vector<10x32xf32> to vector<1x10x32xf32>
    %c0_97 = arith.constant 0 : index
    %c0_98 = arith.constant 0 : index
    %c0_99 = arith.constant 0 : index
    %146 = vector.load %arg54[%c0_97, %c0_98, %c0_99] : memref<2x10x1xf32, #tpu.memory_space<vmem>>, vector<2x10x1xf32>
    %147 = vector.broadcast %145 : vector<1x10x32xf32> to vector<2x10x32xf32>
    %148 = vector.broadcast %146 : vector<2x10x1xf32> to vector<2x10x32xf32>
    %149 = arith.addf %147, %148 : vector<2x10x32xf32>
    %cst_100 = arith.constant dense<0xFF800000> : vector<2x32xf32>
    %150 = vector.multi_reduction <maximumf>, %149, %cst_100 [1] : vector<2x10x32xf32> to vector<2x32xf32>
    %151 = tpu.concatenate %144, %150 in 1 : vector<2x32xf32>, vector<2x32xf32> -> vector<2x64xf32>
    %152 = arith.addf %77, %151 : vector<2x64xf32>
    %c0_101 = arith.constant 0 : index
    %c0_102 = arith.constant 0 : index
    %153 = vector.load %arg32[%c0_101, %c0_102] : memref<32x32xbf16, #tpu.memory_space<vmem>>, vector<32x32xbf16>
    %154 = arith.truncf %128 : vector<10x32xf32> to vector<10x32xbf16>
    %cst_103 = arith.constant dense<0.000000e+00> : vector<10x32xf32>
    %155 = tpu.matmul %154, %153, %cst_103 {dimension_numbers = #tpu.dot_dimension_numbers<[1], [0], [0], [1], [0, 0, 1, 1], [], []>} : vector<10x32xbf16>, vector<32x32xbf16>, vector<10x32xf32> -> vector<10x32xf32>
    %c0_104 = arith.constant 0 : index
    %c0_105 = arith.constant 0 : index
    %156 = vector.load %arg30[%c0_104, %c0_105] : memref<1x32xf32, #tpu.memory_space<vmem>>, vector<1x32xf32>
    %157 = vector.broadcast %156 : vector<1x32xf32> to vector<10x32xf32>
    %158 = arith.addf %155, %157 : vector<10x32xf32>
    %c0_106 = arith.constant 0 : index
    %c0_107 = arith.constant 0 : index
    %159 = vector.load %arg51[%c0_106, %c0_107] : memref<12x10xbf16, #tpu.memory_space<vmem>>, vector<12x10xbf16>
    %160 = arith.truncf %158 : vector<10x32xf32> to vector<10x32xbf16>
    %cst_108 = arith.constant dense<0.000000e+00> : vector<12x32xf32>
    %161 = tpu.matmul %159, %160, %cst_108 {dimension_numbers = #tpu.dot_dimension_numbers<[1], [0], [0], [1], [0, 0, 1, 1], [], []>} : vector<12x10xbf16>, vector<10x32xbf16>, vector<12x32xf32> -> vector<12x32xf32>
    %c0_109 = arith.constant 0 : index
    %c0_110 = arith.constant 0 : index
    %162 = vector.load %arg50[%c0_109, %c0_110] : memref<12x10xbf16, #tpu.memory_space<vmem>>, vector<12x10xbf16>
    %163 = arith.truncf %158 : vector<10x32xf32> to vector<10x32xbf16>
    %cst_111 = arith.constant dense<0.000000e+00> : vector<12x32xf32>
    %164 = tpu.matmul %162, %163, %cst_111 {dimension_numbers = #tpu.dot_dimension_numbers<[1], [0], [0], [1], [0, 0, 1, 1], [], []>} : vector<12x10xbf16>, vector<10x32xbf16>, vector<12x32xf32> -> vector<12x32xf32>
    %165 = arith.addf %161, %164 : vector<12x32xf32>
    %cst_112 = arith.constant 0.000000e+00 : f32
    %166 = vector.broadcast %cst_112 : f32 to vector<12x32xf32>
    %167 = arith.cmpf ogt, %165, %166 : vector<12x32xf32>
    %cst_113 = arith.constant 0.000000e+00 : f32
    %168 = vector.broadcast %cst_113 : f32 to vector<12x32xf32>
    %169 = arith.minimumf %165, %168 : vector<12x32xf32>
    %170 = math.exp %169 : vector<12x32xf32>
    %cst_114 = arith.constant 1.000000e+00 : f32
    %171 = vector.broadcast %cst_114 : f32 to vector<12x32xf32>
    %172 = arith.subf %170, %171 : vector<12x32xf32>
    %173 = arith.select %167, %165, %172 : vector<12x32xi1>, vector<12x32xf32>
    %c0_115 = arith.constant 0 : index
    %c0_116 = arith.constant 0 : index
    %174 = vector.load %arg29[%c0_115, %c0_116] : memref<1x32xf32, #tpu.memory_space<vmem>>, vector<1x32xf32>
    %175 = vector.broadcast %174 : vector<1x32xf32> to vector<12x32xf32>
    %176 = arith.mulf %173, %175 : vector<12x32xf32>
    %cst_117 = arith.constant 0.000000e+00 : f32
    %177 = vector.broadcast %cst_117 : f32 to vector<12x32xf32>
    %178 = arith.cmpf ogt, %176, %177 : vector<12x32xf32>
    %cst_118 = arith.constant 0.000000e+00 : f32
    %179 = vector.broadcast %cst_118 : f32 to vector<12x32xf32>
    %180 = arith.minimumf %176, %179 : vector<12x32xf32>
    %181 = math.exp %180 : vector<12x32xf32>
    %cst_119 = arith.constant 1.000000e+00 : f32
    %182 = vector.broadcast %cst_119 : f32 to vector<12x32xf32>
    %183 = arith.subf %181, %182 : vector<12x32xf32>
    %184 = arith.select %178, %176, %183 : vector<12x32xi1>, vector<12x32xf32>
    %c0_120 = arith.constant 0 : index
    %c0_121 = arith.constant 0 : index
    %185 = vector.load %arg33[%c0_120, %c0_121] : memref<32x1xbf16, #tpu.memory_space<vmem>>, vector<32x1xbf16>
    %186 = arith.truncf %184 : vector<12x32xf32> to vector<12x32xbf16>
    %cst_122 = arith.constant dense<0.000000e+00> : vector<12x1xf32>
    %187 = tpu.matmul %186, %185, %cst_122 {dimension_numbers = #tpu.dot_dimension_numbers<[1], [0], [0], [1], [0, 0, 1, 1], [], []>} : vector<12x32xbf16>, vector<32x1xbf16>, vector<12x1xf32> -> vector<12x1xf32>
    %c0_123 = arith.constant 0 : index
    %c0_124 = arith.constant 0 : index
    %188 = vector.load %arg31[%c0_123, %c0_124] : memref<1x1xf32, #tpu.memory_space<vmem>>, vector<1x1xf32>
    %189 = vector.broadcast %188 : vector<1x1xf32> to vector<12x1xf32>
    %190 = arith.addf %187, %189 : vector<12x1xf32>
    %cst_125 = arith.constant 0.000000e+00 : f32
    %191 = vector.broadcast %cst_125 : f32 to vector<12x1xf32>
    %192 = arith.subf %191, %190 : vector<12x1xf32>
    %193 = math.exp %192 : vector<12x1xf32>
    %cst_126 = arith.constant 1.000000e+00 : f32
    %194 = vector.broadcast %cst_126 : f32 to vector<12x1xf32>
    %195 = arith.addf %194, %193 : vector<12x1xf32>
    %196 = tpu.reciprocal %195 {approx = true} : vector<12x1xf32> -> vector<12x1xf32>
    %c0_127 = arith.constant 0 : index
    %c0_128 = arith.constant 0 : index
    %197 = vector.load %arg57[%c0_127, %c0_128] : memref<2x12xf32, #tpu.memory_space<vmem>>, vector<2x12xf32>
    %198 = vector.broadcast %196 : vector<12x1xf32> to vector<12x32xf32>
    %199 = arith.mulf %184, %198 : vector<12x32xf32>
    %cst_129 = arith.constant dense<0.000000e+00> : vector<2x32xf32>
    %200 = tpu.matmul %197, %199, %cst_129 {dimension_numbers = #tpu.dot_dimension_numbers<[1], [0], [0], [1], [0, 0, 1, 1], [], []>} : vector<2x12xf32>, vector<12x32xf32>, vector<2x32xf32> -> vector<2x32xf32>
    %201 = vector.shape_cast %184 : vector<12x32xf32> to vector<1x12x32xf32>
    %c0_130 = arith.constant 0 : index
    %c0_131 = arith.constant 0 : index
    %c0_132 = arith.constant 0 : index
    %202 = vector.load %arg56[%c0_130, %c0_131, %c0_132] : memref<2x12x1xf32, #tpu.memory_space<vmem>>, vector<2x12x1xf32>
    %203 = vector.broadcast %201 : vector<1x12x32xf32> to vector<2x12x32xf32>
    %204 = vector.broadcast %202 : vector<2x12x1xf32> to vector<2x12x32xf32>
    %205 = arith.addf %203, %204 : vector<2x12x32xf32>
    %cst_133 = arith.constant dense<0xFF800000> : vector<2x32xf32>
    %206 = vector.multi_reduction <maximumf>, %205, %cst_133 [1] : vector<2x12x32xf32> to vector<2x32xf32>
    %207 = tpu.concatenate %200, %206 in 1 : vector<2x32xf32>, vector<2x32xf32> -> vector<2x64xf32>
    %208 = arith.addf %152, %207 : vector<2x64xf32>
    %c0_134 = arith.constant 0 : index
    %c0_135 = arith.constant 0 : index
    %209 = vector.load %arg21[%c0_134, %c0_135] : memref<32x32xbf16, #tpu.memory_space<vmem>>, vector<32x32xbf16>
    %210 = arith.truncf %184 : vector<12x32xf32> to vector<12x32xbf16>
    %cst_136 = arith.constant dense<0.000000e+00> : vector<12x32xf32>
    %211 = tpu.matmul %210, %209, %cst_136 {dimension_numbers = #tpu.dot_dimension_numbers<[1], [0], [0], [1], [0, 0, 1, 1], [], []>} : vector<12x32xbf16>, vector<32x32xbf16>, vector<12x32xf32> -> vector<12x32xf32>
    %c0_137 = arith.constant 0 : index
    %c0_138 = arith.constant 0 : index
    %212 = vector.load %arg19[%c0_137, %c0_138] : memref<32x32xbf16, #tpu.memory_space<vmem>>, vector<32x32xbf16>
    %213 = arith.truncf %184 : vector<12x32xf32> to vector<12x32xbf16>
    %cst_139 = arith.constant dense<0.000000e+00> : vector<12x32xf32>
    %214 = tpu.matmul %213, %212, %cst_139 {dimension_numbers = #tpu.dot_dimension_numbers<[1], [0], [0], [1], [0, 0, 1, 1], [], []>} : vector<12x32xbf16>, vector<32x32xbf16>, vector<12x32xf32> -> vector<12x32xf32>
    %c0_140 = arith.constant 0 : index
    %c0_141 = arith.constant 0 : index
    %215 = vector.load %arg47[%c0_140, %c0_141] : memref<24x12xbf16, #tpu.memory_space<vmem>>, vector<24x12xbf16>
    %216 = arith.truncf %211 : vector<12x32xf32> to vector<12x32xbf16>
    %cst_142 = arith.constant dense<0.000000e+00> : vector<24x32xf32>
    %217 = tpu.matmul %215, %216, %cst_142 {dimension_numbers = #tpu.dot_dimension_numbers<[1], [0], [0], [1], [0, 0, 1, 1], [], []>} : vector<24x12xbf16>, vector<12x32xbf16>, vector<24x32xf32> -> vector<24x32xf32>
    %c0_143 = arith.constant 0 : index
    %c0_144 = arith.constant 0 : index
    %218 = vector.load %arg46[%c0_143, %c0_144] : memref<24x12xbf16, #tpu.memory_space<vmem>>, vector<24x12xbf16>
    %219 = arith.truncf %214 : vector<12x32xf32> to vector<12x32xbf16>
    %cst_145 = arith.constant dense<0.000000e+00> : vector<24x32xf32>
    %220 = tpu.matmul %218, %219, %cst_145 {dimension_numbers = #tpu.dot_dimension_numbers<[1], [0], [0], [1], [0, 0, 1, 1], [], []>} : vector<24x12xbf16>, vector<12x32xbf16>, vector<24x32xf32> -> vector<24x32xf32>
    %221 = arith.addf %217, %220 : vector<24x32xf32>
    %cst_146 = arith.constant 0.000000e+00 : f32
    %222 = vector.broadcast %cst_146 : f32 to vector<24x32xf32>
    %223 = arith.cmpf oge, %221, %222 : vector<24x32xf32>
    %cst_147 = arith.constant 2.000000e-01 : f32
    %224 = vector.broadcast %cst_147 : f32 to vector<24x32xf32>
    %225 = arith.mulf %224, %221 : vector<24x32xf32>
    %226 = arith.select %223, %221, %225 : vector<24x32xi1>, vector<24x32xf32>
    %c0_148 = arith.constant 0 : index
    %c0_149 = arith.constant 0 : index
    %227 = vector.load %arg15[%c0_148, %c0_149] : memref<1x32xf32, #tpu.memory_space<vmem>>, vector<1x32xf32>
    %228 = vector.broadcast %227 : vector<1x32xf32> to vector<24x32xf32>
    %229 = arith.mulf %226, %228 : vector<24x32xf32>
    %c0_150 = arith.constant 0 : index
    %c0_151 = arith.constant 0 : index
    %230 = vector.load %arg49[%c0_150, %c0_151] : memref<32x32xf32, #tpu.memory_space<vmem>>, vector<32x32xf32>
    %cst_152 = arith.constant dense<0.000000e+00> : vector<24x32xf32>
    %231 = tpu.matmul %229, %230, %cst_152 {dimension_numbers = #tpu.dot_dimension_numbers<[1], [0], [0], [1], [0, 0, 1, 1], [], []>} : vector<24x32xf32>, vector<32x32xf32>, vector<24x32xf32> -> vector<24x32xf32>
    %232 = vector.shape_cast %231 : vector<24x32xf32> to vector<1x24x32xf32>
    %cst_153 = arith.constant dense<0xFF800000> : vector<1xf32>
    %233 = vector.multi_reduction <maximumf>, %232, %cst_153 [1, 2] : vector<1x24x32xf32> to vector<1xf32>
    %234 = vector.shape_cast %233 : vector<1xf32> to vector<1x1x1xf32>
    %235 = vector.extract %234[0, 0, 0] : f32 from vector<1x1x1xf32>
    %236 = vector.broadcast %235 : f32 to vector<24x32xf32>
    %237 = arith.subf %231, %236 : vector<24x32xf32>
    %238 = math.exp %237 : vector<24x32xf32>
    %c0_154 = arith.constant 0 : index
    %c0_155 = arith.constant 0 : index
    %239 = vector.load %arg48[%c0_154, %c0_155] : memref<12x24xf32, #tpu.memory_space<vmem>>, vector<12x24xf32>
    %cst_156 = arith.constant dense<0.000000e+00> : vector<12x32xf32>
    %240 = tpu.matmul %239, %238, %cst_156 {dimension_numbers = #tpu.dot_dimension_numbers<[1], [0], [0], [1], [0, 0, 1, 1], [], []>} : vector<12x24xf32>, vector<24x32xf32>, vector<12x32xf32> -> vector<12x32xf32>
    %c0_157 = arith.constant 0 : index
    %c0_158 = arith.constant 0 : index
    %241 = vector.load %arg46[%c0_157, %c0_158] : memref<24x12xbf16, #tpu.memory_space<vmem>>, vector<24x12xbf16>
    %242 = arith.extf %241 : vector<24x12xbf16> to vector<24x12xf32>
    %cst_159 = arith.constant dense<0.000000e+00> : vector<24x32xf32>
    %243 = tpu.matmul %242, %240, %cst_159 {dimension_numbers = #tpu.dot_dimension_numbers<[1], [0], [0], [1], [0, 0, 1, 1], [], []>} : vector<24x12xf32>, vector<12x32xf32>, vector<24x32xf32> -> vector<24x32xf32>
    %cst_160 = arith.constant 1.000000e-16 : f32
    %244 = vector.broadcast %cst_160 : f32 to vector<24x32xf32>
    %245 = arith.addf %243, %244 : vector<24x32xf32>
    %246 = arith.divf %238, %245 : vector<24x32xf32>
    %c0_161 = arith.constant 0 : index
    %c0_162 = arith.constant 0 : index
    %247 = vector.load %arg48[%c0_161, %c0_162] : memref<12x24xf32, #tpu.memory_space<vmem>>, vector<12x24xf32>
    %248 = arith.mulf %217, %246 : vector<24x32xf32>
    %cst_163 = arith.constant dense<0.000000e+00> : vector<12x32xf32>
    %249 = tpu.matmul %247, %248, %cst_163 {dimension_numbers = #tpu.dot_dimension_numbers<[1], [0], [0], [1], [0, 0, 1, 1], [], []>} : vector<12x24xf32>, vector<24x32xf32>, vector<12x32xf32> -> vector<12x32xf32>
    %250 = arith.addf %249, %184 : vector<12x32xf32>
    %c0_164 = arith.constant 0 : index
    %c0_165 = arith.constant 0 : index
    %251 = vector.load %arg17[%c0_164, %c0_165] : memref<1x32xf32, #tpu.memory_space<vmem>>, vector<1x32xf32>
    %252 = vector.broadcast %251 : vector<1x32xf32> to vector<12x32xf32>
    %253 = arith.addf %250, %252 : vector<12x32xf32>
    %cst_166 = arith.constant 0.000000e+00 : f32
    %254 = vector.broadcast %cst_166 : f32 to vector<12x32xf32>
    %255 = arith.cmpf oge, %253, %254 : vector<12x32xf32>
    %c0_167 = arith.constant 0 : index
    %c0_168 = arith.constant 0 : index
    %256 = vector.load %arg18[%c0_167, %c0_168] : memref<1x1xf32, #tpu.memory_space<vmem>>, vector<1x1xf32>
    %257 = vector.broadcast %256 : vector<1x1xf32> to vector<12x32xf32>
    %258 = arith.mulf %257, %253 : vector<12x32xf32>
    %259 = arith.select %255, %253, %258 : vector<12x32xi1>, vector<12x32xf32>
    %c0_169 = arith.constant 0 : index
    %c0_170 = arith.constant 0 : index
    %260 = vector.load %arg20[%c0_169, %c0_170] : memref<32x1xbf16, #tpu.memory_space<vmem>>, vector<32x1xbf16>
    %261 = arith.truncf %259 : vector<12x32xf32> to vector<12x32xbf16>
    %cst_171 = arith.constant dense<0.000000e+00> : vector<12x1xf32>
    %262 = tpu.matmul %261, %260, %cst_171 {dimension_numbers = #tpu.dot_dimension_numbers<[1], [0], [0], [1], [0, 0, 1, 1], [], []>} : vector<12x32xbf16>, vector<32x1xbf16>, vector<12x1xf32> -> vector<12x1xf32>
    %c0_172 = arith.constant 0 : index
    %c0_173 = arith.constant 0 : index
    %263 = vector.load %arg16[%c0_172, %c0_173] : memref<1x1xf32, #tpu.memory_space<vmem>>, vector<1x1xf32>
    %264 = vector.broadcast %263 : vector<1x1xf32> to vector<12x1xf32>
    %265 = arith.addf %262, %264 : vector<12x1xf32>
    %cst_174 = arith.constant 0.000000e+00 : f32
    %266 = vector.broadcast %cst_174 : f32 to vector<12x1xf32>
    %267 = arith.subf %266, %265 : vector<12x1xf32>
    %268 = math.exp %267 : vector<12x1xf32>
    %cst_175 = arith.constant 1.000000e+00 : f32
    %269 = vector.broadcast %cst_175 : f32 to vector<12x1xf32>
    %270 = arith.addf %269, %268 : vector<12x1xf32>
    %271 = tpu.reciprocal %270 {approx = true} : vector<12x1xf32> -> vector<12x1xf32>
    %c0_176 = arith.constant 0 : index
    %c0_177 = arith.constant 0 : index
    %272 = vector.load %arg57[%c0_176, %c0_177] : memref<2x12xf32, #tpu.memory_space<vmem>>, vector<2x12xf32>
    %273 = vector.broadcast %271 : vector<12x1xf32> to vector<12x32xf32>
    %274 = arith.mulf %259, %273 : vector<12x32xf32>
    %cst_178 = arith.constant dense<0.000000e+00> : vector<2x32xf32>
    %275 = tpu.matmul %272, %274, %cst_178 {dimension_numbers = #tpu.dot_dimension_numbers<[1], [0], [0], [1], [0, 0, 1, 1], [], []>} : vector<2x12xf32>, vector<12x32xf32>, vector<2x32xf32> -> vector<2x32xf32>
    %276 = vector.shape_cast %259 : vector<12x32xf32> to vector<1x12x32xf32>
    %c0_179 = arith.constant 0 : index
    %c0_180 = arith.constant 0 : index
    %c0_181 = arith.constant 0 : index
    %277 = vector.load %arg56[%c0_179, %c0_180, %c0_181] : memref<2x12x1xf32, #tpu.memory_space<vmem>>, vector<2x12x1xf32>
    %278 = vector.broadcast %276 : vector<1x12x32xf32> to vector<2x12x32xf32>
    %279 = vector.broadcast %277 : vector<2x12x1xf32> to vector<2x12x32xf32>
    %280 = arith.addf %278, %279 : vector<2x12x32xf32>
    %cst_182 = arith.constant dense<0xFF800000> : vector<2x32xf32>
    %281 = vector.multi_reduction <maximumf>, %280, %cst_182 [1] : vector<2x12x32xf32> to vector<2x32xf32>
    %282 = tpu.concatenate %275, %281 in 1 : vector<2x32xf32>, vector<2x32xf32> -> vector<2x64xf32>
    %283 = arith.addf %208, %282 : vector<2x64xf32>
    %c0_183 = arith.constant 0 : index
    %c0_184 = arith.constant 0 : index
    %284 = vector.load %arg28[%c0_183, %c0_184] : memref<32x32xbf16, #tpu.memory_space<vmem>>, vector<32x32xbf16>
    %285 = arith.truncf %259 : vector<12x32xf32> to vector<12x32xbf16>
    %cst_185 = arith.constant dense<0.000000e+00> : vector<12x32xf32>
    %286 = tpu.matmul %285, %284, %cst_185 {dimension_numbers = #tpu.dot_dimension_numbers<[1], [0], [0], [1], [0, 0, 1, 1], [], []>} : vector<12x32xbf16>, vector<32x32xbf16>, vector<12x32xf32> -> vector<12x32xf32>
    %c0_186 = arith.constant 0 : index
    %c0_187 = arith.constant 0 : index
    %287 = vector.load %arg26[%c0_186, %c0_187] : memref<32x32xbf16, #tpu.memory_space<vmem>>, vector<32x32xbf16>
    %288 = arith.truncf %259 : vector<12x32xf32> to vector<12x32xbf16>
    %cst_188 = arith.constant dense<0.000000e+00> : vector<12x32xf32>
    %289 = tpu.matmul %288, %287, %cst_188 {dimension_numbers = #tpu.dot_dimension_numbers<[1], [0], [0], [1], [0, 0, 1, 1], [], []>} : vector<12x32xbf16>, vector<32x32xbf16>, vector<12x32xf32> -> vector<12x32xf32>
    %c0_189 = arith.constant 0 : index
    %c0_190 = arith.constant 0 : index
    %290 = vector.load %arg47[%c0_189, %c0_190] : memref<24x12xbf16, #tpu.memory_space<vmem>>, vector<24x12xbf16>
    %291 = arith.truncf %286 : vector<12x32xf32> to vector<12x32xbf16>
    %cst_191 = arith.constant dense<0.000000e+00> : vector<24x32xf32>
    %292 = tpu.matmul %290, %291, %cst_191 {dimension_numbers = #tpu.dot_dimension_numbers<[1], [0], [0], [1], [0, 0, 1, 1], [], []>} : vector<24x12xbf16>, vector<12x32xbf16>, vector<24x32xf32> -> vector<24x32xf32>
    %c0_192 = arith.constant 0 : index
    %c0_193 = arith.constant 0 : index
    %293 = vector.load %arg46[%c0_192, %c0_193] : memref<24x12xbf16, #tpu.memory_space<vmem>>, vector<24x12xbf16>
    %294 = arith.truncf %289 : vector<12x32xf32> to vector<12x32xbf16>
    %cst_194 = arith.constant dense<0.000000e+00> : vector<24x32xf32>
    %295 = tpu.matmul %293, %294, %cst_194 {dimension_numbers = #tpu.dot_dimension_numbers<[1], [0], [0], [1], [0, 0, 1, 1], [], []>} : vector<24x12xbf16>, vector<12x32xbf16>, vector<24x32xf32> -> vector<24x32xf32>
    %296 = arith.addf %292, %295 : vector<24x32xf32>
    %cst_195 = arith.constant 0.000000e+00 : f32
    %297 = vector.broadcast %cst_195 : f32 to vector<24x32xf32>
    %298 = arith.cmpf oge, %296, %297 : vector<24x32xf32>
    %cst_196 = arith.constant 2.000000e-01 : f32
    %299 = vector.broadcast %cst_196 : f32 to vector<24x32xf32>
    %300 = arith.mulf %299, %296 : vector<24x32xf32>
    %301 = arith.select %298, %296, %300 : vector<24x32xi1>, vector<24x32xf32>
    %c0_197 = arith.constant 0 : index
    %c0_198 = arith.constant 0 : index
    %302 = vector.load %arg22[%c0_197, %c0_198] : memref<1x32xf32, #tpu.memory_space<vmem>>, vector<1x32xf32>
    %303 = vector.broadcast %302 : vector<1x32xf32> to vector<24x32xf32>
    %304 = arith.mulf %301, %303 : vector<24x32xf32>
    %c0_199 = arith.constant 0 : index
    %c0_200 = arith.constant 0 : index
    %305 = vector.load %arg49[%c0_199, %c0_200] : memref<32x32xf32, #tpu.memory_space<vmem>>, vector<32x32xf32>
    %cst_201 = arith.constant dense<0.000000e+00> : vector<24x32xf32>
    %306 = tpu.matmul %304, %305, %cst_201 {dimension_numbers = #tpu.dot_dimension_numbers<[1], [0], [0], [1], [0, 0, 1, 1], [], []>} : vector<24x32xf32>, vector<32x32xf32>, vector<24x32xf32> -> vector<24x32xf32>
    %307 = vector.shape_cast %306 : vector<24x32xf32> to vector<1x24x32xf32>
    %cst_202 = arith.constant dense<0xFF800000> : vector<1xf32>
    %308 = vector.multi_reduction <maximumf>, %307, %cst_202 [1, 2] : vector<1x24x32xf32> to vector<1xf32>
    %309 = vector.shape_cast %308 : vector<1xf32> to vector<1x1x1xf32>
    %310 = vector.extract %309[0, 0, 0] : f32 from vector<1x1x1xf32>
    %311 = vector.broadcast %310 : f32 to vector<24x32xf32>
    %312 = arith.subf %306, %311 : vector<24x32xf32>
    %313 = math.exp %312 : vector<24x32xf32>
    %c0_203 = arith.constant 0 : index
    %c0_204 = arith.constant 0 : index
    %314 = vector.load %arg48[%c0_203, %c0_204] : memref<12x24xf32, #tpu.memory_space<vmem>>, vector<12x24xf32>
    %cst_205 = arith.constant dense<0.000000e+00> : vector<12x32xf32>
    %315 = tpu.matmul %314, %313, %cst_205 {dimension_numbers = #tpu.dot_dimension_numbers<[1], [0], [0], [1], [0, 0, 1, 1], [], []>} : vector<12x24xf32>, vector<24x32xf32>, vector<12x32xf32> -> vector<12x32xf32>
    %c0_206 = arith.constant 0 : index
    %c0_207 = arith.constant 0 : index
    %316 = vector.load %arg46[%c0_206, %c0_207] : memref<24x12xbf16, #tpu.memory_space<vmem>>, vector<24x12xbf16>
    %317 = arith.extf %316 : vector<24x12xbf16> to vector<24x12xf32>
    %cst_208 = arith.constant dense<0.000000e+00> : vector<24x32xf32>
    %318 = tpu.matmul %317, %315, %cst_208 {dimension_numbers = #tpu.dot_dimension_numbers<[1], [0], [0], [1], [0, 0, 1, 1], [], []>} : vector<24x12xf32>, vector<12x32xf32>, vector<24x32xf32> -> vector<24x32xf32>
    %cst_209 = arith.constant 1.000000e-16 : f32
    %319 = vector.broadcast %cst_209 : f32 to vector<24x32xf32>
    %320 = arith.addf %318, %319 : vector<24x32xf32>
    %321 = arith.divf %313, %320 : vector<24x32xf32>
    %c0_210 = arith.constant 0 : index
    %c0_211 = arith.constant 0 : index
    %322 = vector.load %arg48[%c0_210, %c0_211] : memref<12x24xf32, #tpu.memory_space<vmem>>, vector<12x24xf32>
    %323 = arith.mulf %292, %321 : vector<24x32xf32>
    %cst_212 = arith.constant dense<0.000000e+00> : vector<12x32xf32>
    %324 = tpu.matmul %322, %323, %cst_212 {dimension_numbers = #tpu.dot_dimension_numbers<[1], [0], [0], [1], [0, 0, 1, 1], [], []>} : vector<12x24xf32>, vector<24x32xf32>, vector<12x32xf32> -> vector<12x32xf32>
    %325 = arith.addf %324, %259 : vector<12x32xf32>
    %c0_213 = arith.constant 0 : index
    %c0_214 = arith.constant 0 : index
    %326 = vector.load %arg24[%c0_213, %c0_214] : memref<1x32xf32, #tpu.memory_space<vmem>>, vector<1x32xf32>
    %327 = vector.broadcast %326 : vector<1x32xf32> to vector<12x32xf32>
    %328 = arith.addf %325, %327 : vector<12x32xf32>
    %cst_215 = arith.constant 0.000000e+00 : f32
    %329 = vector.broadcast %cst_215 : f32 to vector<12x32xf32>
    %330 = arith.cmpf oge, %328, %329 : vector<12x32xf32>
    %c0_216 = arith.constant 0 : index
    %c0_217 = arith.constant 0 : index
    %331 = vector.load %arg25[%c0_216, %c0_217] : memref<1x1xf32, #tpu.memory_space<vmem>>, vector<1x1xf32>
    %332 = vector.broadcast %331 : vector<1x1xf32> to vector<12x32xf32>
    %333 = arith.mulf %332, %328 : vector<12x32xf32>
    %334 = arith.select %330, %328, %333 : vector<12x32xi1>, vector<12x32xf32>
    %c0_218 = arith.constant 0 : index
    %c0_219 = arith.constant 0 : index
    %335 = vector.load %arg27[%c0_218, %c0_219] : memref<32x1xbf16, #tpu.memory_space<vmem>>, vector<32x1xbf16>
    %336 = arith.truncf %334 : vector<12x32xf32> to vector<12x32xbf16>
    %cst_220 = arith.constant dense<0.000000e+00> : vector<12x1xf32>
    %337 = tpu.matmul %336, %335, %cst_220 {dimension_numbers = #tpu.dot_dimension_numbers<[1], [0], [0], [1], [0, 0, 1, 1], [], []>} : vector<12x32xbf16>, vector<32x1xbf16>, vector<12x1xf32> -> vector<12x1xf32>
    %c0_221 = arith.constant 0 : index
    %c0_222 = arith.constant 0 : index
    %338 = vector.load %arg23[%c0_221, %c0_222] : memref<1x1xf32, #tpu.memory_space<vmem>>, vector<1x1xf32>
    %339 = vector.broadcast %338 : vector<1x1xf32> to vector<12x1xf32>
    %340 = arith.addf %337, %339 : vector<12x1xf32>
    %cst_223 = arith.constant 0.000000e+00 : f32
    %341 = vector.broadcast %cst_223 : f32 to vector<12x1xf32>
    %342 = arith.subf %341, %340 : vector<12x1xf32>
    %343 = math.exp %342 : vector<12x1xf32>
    %cst_224 = arith.constant 1.000000e+00 : f32
    %344 = vector.broadcast %cst_224 : f32 to vector<12x1xf32>
    %345 = arith.addf %344, %343 : vector<12x1xf32>
    %346 = tpu.reciprocal %345 {approx = true} : vector<12x1xf32> -> vector<12x1xf32>
    %c0_225 = arith.constant 0 : index
    %c0_226 = arith.constant 0 : index
    %347 = vector.load %arg57[%c0_225, %c0_226] : memref<2x12xf32, #tpu.memory_space<vmem>>, vector<2x12xf32>
    %348 = vector.broadcast %346 : vector<12x1xf32> to vector<12x32xf32>
    %349 = arith.mulf %334, %348 : vector<12x32xf32>
    %cst_227 = arith.constant dense<0.000000e+00> : vector<2x32xf32>
    %350 = tpu.matmul %347, %349, %cst_227 {dimension_numbers = #tpu.dot_dimension_numbers<[1], [0], [0], [1], [0, 0, 1, 1], [], []>} : vector<2x12xf32>, vector<12x32xf32>, vector<2x32xf32> -> vector<2x32xf32>
    %351 = vector.shape_cast %334 : vector<12x32xf32> to vector<1x12x32xf32>
    %c0_228 = arith.constant 0 : index
    %c0_229 = arith.constant 0 : index
    %c0_230 = arith.constant 0 : index
    %352 = vector.load %arg56[%c0_228, %c0_229, %c0_230] : memref<2x12x1xf32, #tpu.memory_space<vmem>>, vector<2x12x1xf32>
    %353 = vector.broadcast %351 : vector<1x12x32xf32> to vector<2x12x32xf32>
    %354 = vector.broadcast %352 : vector<2x12x1xf32> to vector<2x12x32xf32>
    %355 = arith.addf %353, %354 : vector<2x12x32xf32>
    %cst_231 = arith.constant dense<0xFF800000> : vector<2x32xf32>
    %356 = vector.multi_reduction <maximumf>, %355, %cst_231 [1] : vector<2x12x32xf32> to vector<2x32xf32>
    %357 = tpu.concatenate %350, %356 in 1 : vector<2x32xf32>, vector<2x32xf32> -> vector<2x64xf32>
    %358 = arith.addf %283, %357 : vector<2x64xf32>
    %c0_232 = arith.constant 0 : index
    %c0_233 = arith.constant 0 : index
    %359 = vector.load %arg37[%c0_232, %c0_233] : memref<32x32xbf16, #tpu.memory_space<vmem>>, vector<32x32xbf16>
    %360 = arith.truncf %334 : vector<12x32xf32> to vector<12x32xbf16>
    %cst_234 = arith.constant dense<0.000000e+00> : vector<12x32xf32>
    %361 = tpu.matmul %360, %359, %cst_234 {dimension_numbers = #tpu.dot_dimension_numbers<[1], [0], [0], [1], [0, 0, 1, 1], [], []>} : vector<12x32xbf16>, vector<32x32xbf16>, vector<12x32xf32> -> vector<12x32xf32>
    %c0_235 = arith.constant 0 : index
    %c0_236 = arith.constant 0 : index
    %362 = vector.load %arg35[%c0_235, %c0_236] : memref<1x32xf32, #tpu.memory_space<vmem>>, vector<1x32xf32>
    %363 = vector.broadcast %362 : vector<1x32xf32> to vector<12x32xf32>
    %364 = arith.addf %361, %363 : vector<12x32xf32>
    %c0_237 = arith.constant 0 : index
    %c0_238 = arith.constant 0 : index
    %365 = vector.load %arg53[%c0_237, %c0_238] : memref<8x12xbf16, #tpu.memory_space<vmem>>, vector<8x12xbf16>
    %366 = arith.truncf %364 : vector<12x32xf32> to vector<12x32xbf16>
    %cst_239 = arith.constant dense<0.000000e+00> : vector<8x32xf32>
    %367 = tpu.matmul %365, %366, %cst_239 {dimension_numbers = #tpu.dot_dimension_numbers<[1], [0], [0], [1], [0, 0, 1, 1], [], []>} : vector<8x12xbf16>, vector<12x32xbf16>, vector<8x32xf32> -> vector<8x32xf32>
    %c0_240 = arith.constant 0 : index
    %c0_241 = arith.constant 0 : index
    %368 = vector.load %arg52[%c0_240, %c0_241] : memref<8x12xbf16, #tpu.memory_space<vmem>>, vector<8x12xbf16>
    %369 = arith.truncf %364 : vector<12x32xf32> to vector<12x32xbf16>
    %cst_242 = arith.constant dense<0.000000e+00> : vector<8x32xf32>
    %370 = tpu.matmul %368, %369, %cst_242 {dimension_numbers = #tpu.dot_dimension_numbers<[1], [0], [0], [1], [0, 0, 1, 1], [], []>} : vector<8x12xbf16>, vector<12x32xbf16>, vector<8x32xf32> -> vector<8x32xf32>
    %371 = arith.addf %367, %370 : vector<8x32xf32>
    %cst_243 = arith.constant 0.000000e+00 : f32
    %372 = vector.broadcast %cst_243 : f32 to vector<8x32xf32>
    %373 = arith.cmpf ogt, %371, %372 : vector<8x32xf32>
    %cst_244 = arith.constant 0.000000e+00 : f32
    %374 = vector.broadcast %cst_244 : f32 to vector<8x32xf32>
    %375 = arith.minimumf %371, %374 : vector<8x32xf32>
    %376 = math.exp %375 : vector<8x32xf32>
    %cst_245 = arith.constant 1.000000e+00 : f32
    %377 = vector.broadcast %cst_245 : f32 to vector<8x32xf32>
    %378 = arith.subf %376, %377 : vector<8x32xf32>
    %379 = arith.select %373, %371, %378 : vector<8x32xi1>, vector<8x32xf32>
    %c0_246 = arith.constant 0 : index
    %c0_247 = arith.constant 0 : index
    %380 = vector.load %arg34[%c0_246, %c0_247] : memref<1x32xf32, #tpu.memory_space<vmem>>, vector<1x32xf32>
    %381 = vector.broadcast %380 : vector<1x32xf32> to vector<8x32xf32>
    %382 = arith.mulf %379, %381 : vector<8x32xf32>
    %cst_248 = arith.constant 0.000000e+00 : f32
    %383 = vector.broadcast %cst_248 : f32 to vector<8x32xf32>
    %384 = arith.cmpf ogt, %382, %383 : vector<8x32xf32>
    %cst_249 = arith.constant 0.000000e+00 : f32
    %385 = vector.broadcast %cst_249 : f32 to vector<8x32xf32>
    %386 = arith.minimumf %382, %385 : vector<8x32xf32>
    %387 = math.exp %386 : vector<8x32xf32>
    %cst_250 = arith.constant 1.000000e+00 : f32
    %388 = vector.broadcast %cst_250 : f32 to vector<8x32xf32>
    %389 = arith.subf %387, %388 : vector<8x32xf32>
    %390 = arith.select %384, %382, %389 : vector<8x32xi1>, vector<8x32xf32>
    %c0_251 = arith.constant 0 : index
    %c0_252 = arith.constant 0 : index
    %391 = vector.load %arg38[%c0_251, %c0_252] : memref<32x1xbf16, #tpu.memory_space<vmem>>, vector<32x1xbf16>
    %392 = arith.truncf %390 : vector<8x32xf32> to vector<8x32xbf16>
    %cst_253 = arith.constant dense<0.000000e+00> : vector<8x1xf32>
    %393 = tpu.matmul %392, %391, %cst_253 {dimension_numbers = #tpu.dot_dimension_numbers<[1], [0], [0], [1], [0, 0, 1, 1], [], []>} : vector<8x32xbf16>, vector<32x1xbf16>, vector<8x1xf32> -> vector<8x1xf32>
    %c0_254 = arith.constant 0 : index
    %c0_255 = arith.constant 0 : index
    %394 = vector.load %arg36[%c0_254, %c0_255] : memref<1x1xf32, #tpu.memory_space<vmem>>, vector<1x1xf32>
    %395 = vector.broadcast %394 : vector<1x1xf32> to vector<8x1xf32>
    %396 = arith.addf %393, %395 : vector<8x1xf32>
    %cst_256 = arith.constant 0.000000e+00 : f32
    %397 = vector.broadcast %cst_256 : f32 to vector<8x1xf32>
    %398 = arith.subf %397, %396 : vector<8x1xf32>
    %399 = math.exp %398 : vector<8x1xf32>
    %cst_257 = arith.constant 1.000000e+00 : f32
    %400 = vector.broadcast %cst_257 : f32 to vector<8x1xf32>
    %401 = arith.addf %400, %399 : vector<8x1xf32>
    %402 = tpu.reciprocal %401 {approx = true} : vector<8x1xf32> -> vector<8x1xf32>
    %c0_258 = arith.constant 0 : index
    %c0_259 = arith.constant 0 : index
    %403 = vector.load %arg59[%c0_258, %c0_259] : memref<2x8xf32, #tpu.memory_space<vmem>>, vector<2x8xf32>
    %404 = vector.broadcast %402 : vector<8x1xf32> to vector<8x32xf32>
    %405 = arith.mulf %390, %404 : vector<8x32xf32>
    %cst_260 = arith.constant dense<0.000000e+00> : vector<2x32xf32>
    %406 = tpu.matmul %403, %405, %cst_260 {dimension_numbers = #tpu.dot_dimension_numbers<[1], [0], [0], [1], [0, 0, 1, 1], [], []>} : vector<2x8xf32>, vector<8x32xf32>, vector<2x32xf32> -> vector<2x32xf32>
    %407 = vector.shape_cast %390 : vector<8x32xf32> to vector<1x8x32xf32>
    %c0_261 = arith.constant 0 : index
    %c0_262 = arith.constant 0 : index
    %c0_263 = arith.constant 0 : index
    %408 = vector.load %arg58[%c0_261, %c0_262, %c0_263] : memref<2x8x1xf32, #tpu.memory_space<vmem>>, vector<2x8x1xf32>
    %409 = vector.broadcast %407 : vector<1x8x32xf32> to vector<2x8x32xf32>
    %410 = vector.broadcast %408 : vector<2x8x1xf32> to vector<2x8x32xf32>
    %411 = arith.addf %409, %410 : vector<2x8x32xf32>
    %cst_264 = arith.constant dense<0xFF800000> : vector<2x32xf32>
    %412 = vector.multi_reduction <maximumf>, %411, %cst_264 [1] : vector<2x8x32xf32> to vector<2x32xf32>
    %413 = tpu.concatenate %406, %412 in 1 : vector<2x32xf32>, vector<2x32xf32> -> vector<2x64xf32>
    %414 = arith.addf %358, %413 : vector<2x64xf32>
    %c0_265 = arith.constant 0 : index
    %c0_266 = arith.constant 0 : index
    %415 = vector.load %arg41[%c0_265, %c0_266] : memref<64x128xbf16, #tpu.memory_space<vmem>>, vector<64x128xbf16>
    %416 = arith.truncf %414 : vector<2x64xf32> to vector<2x64xbf16>
    %cst_267 = arith.constant dense<0.000000e+00> : vector<2x128xf32>
    %417 = tpu.matmul %416, %415, %cst_267 {dimension_numbers = #tpu.dot_dimension_numbers<[1], [0], [0], [1], [0, 0, 1, 1], [], []>} : vector<2x64xbf16>, vector<64x128xbf16>, vector<2x128xf32> -> vector<2x128xf32>
    %c0_268 = arith.constant 0 : index
    %c0_269 = arith.constant 0 : index
    %418 = vector.load %arg39[%c0_268, %c0_269] : memref<1x128xf32, #tpu.memory_space<vmem>>, vector<1x128xf32>
    %419 = vector.broadcast %418 : vector<1x128xf32> to vector<2x128xf32>
    %420 = arith.addf %417, %419 : vector<2x128xf32>
    %cst_270 = arith.constant 0.000000e+00 : f32
    %421 = vector.broadcast %cst_270 : f32 to vector<2x128xf32>
    %422 = arith.cmpf ogt, %420, %421 : vector<2x128xf32>
    %cst_271 = arith.constant 0.000000e+00 : f32
    %423 = vector.broadcast %cst_271 : f32 to vector<2x128xf32>
    %424 = arith.minimumf %420, %423 : vector<2x128xf32>
    %425 = math.exp %424 : vector<2x128xf32>
    %cst_272 = arith.constant 1.000000e+00 : f32
    %426 = vector.broadcast %cst_272 : f32 to vector<2x128xf32>
    %427 = arith.subf %425, %426 : vector<2x128xf32>
    %428 = arith.select %422, %420, %427 : vector<2x128xi1>, vector<2x128xf32>
    %c0_273 = arith.constant 0 : index
    %c0_274 = arith.constant 0 : index
    %429 = vector.load %arg42[%c0_273, %c0_274] : memref<128x2xbf16, #tpu.memory_space<vmem>>, vector<128x2xbf16>
    %430 = arith.truncf %428 : vector<2x128xf32> to vector<2x128xbf16>
    %cst_275 = arith.constant dense<0.000000e+00> : vector<2x2xf32>
    %431 = tpu.matmul %430, %429, %cst_275 {dimension_numbers = #tpu.dot_dimension_numbers<[1], [0], [0], [1], [0, 0, 1, 1], [], []>} : vector<2x128xbf16>, vector<128x2xbf16>, vector<2x2xf32> -> vector<2x2xf32>
    %c0_276 = arith.constant 0 : index
    %c0_277 = arith.constant 0 : index
    %432 = vector.load %arg40[%c0_276, %c0_277] : memref<1x2xf32, #tpu.memory_space<vmem>>, vector<1x2xf32>
    %433 = vector.broadcast %432 : vector<1x2xf32> to vector<2x2xf32>
    %434 = arith.addf %431, %433 : vector<2x2xf32>
    %c0_278 = arith.constant 0 : index
    %c0_279 = arith.constant 0 : index
    %435 = vector.load %arg61[%c0_278, %c0_279] : memref<2x2xf32, #tpu.memory_space<vmem>>, vector<2x2xf32>
    tpu.vector_store %arg61[%c0_278, %c0_279], %434 {strides = array<i32>} : memref<2x2xf32, #tpu.memory_space<vmem>>, vector<2x2xf32>,
    return
  }
}

</mosaic_0001>

<bundles_post_ra>
// kernel: gln_forward.1
= control target key start
LH: loop header
LB: loop body
LE: loop exit
PB: predicated region body
PF: predicated region fallthrough
CT: control target
= control target key end

     0   :  { %s5895_s6 = smov 1   ;;  %s5896_s10 = smov 2   ;;  %s6987_s0 = inlined_call_operand.smem [shape: u32[62], index: -1, kind: input, shape index: {}] }
   0x1   :  { %s5969_s5 = sld [smem:[%s6987_s0]]   ;;  %s5897_s14 = smov 4  }
   0x2   :  { %s4721_s9 = sld [smem:[%s6987_s0 + %s5895_s6]]   ;;  %s5898_s18 = smov 5  }
   0x3   :  { %s5977_s13 = sld [smem:[%s6987_s0 + %s5896_s10]]   ;;  %s5899_s22 = smov 6  }
   0x4   :  { %s5982_s17 = sld [smem:[%s6987_s0 + %s5897_s14]]   ;;  %s5900_s26 = smov 7  }
   0x5   :  { %s5987_s21 = sld [smem:[%s6987_s0 + %s5898_s18]]   ;;  %s5901_s30 = smov 8  }
   0x6   :  { %s5992_s25 = sld [smem:[%s6987_s0 + %s5899_s22]]   ;;  %s5902_s4 = smov 10  }
   0x7   :  { %s5997_s29 = sld [smem:[%s6987_s0 + %s5900_s26]]   ;;  %s5903_s10 = smov 12  }
   0x8   :  { %s6002_s3 = sld [smem:[%s6987_s0 + %s5901_s30]]   ;;  %v128_v0 = vstv %s4721_s9  ;;  %s5904_s15 = smov 13  }
   0x9   :  { %7009 = sst [smem:[#allocation15_spill]] %s5977_s13  ;;  %129 = vst [vmem:[#allocation2] sm:$0x1] %v128_v0  ;;  %s5905_s9 = smov 14  }
   0xa   :  { %s6007_s8 = sld [smem:[%s6987_s0 + %s5902_s4]]   ;;  %s5906_s24 = smov 15  }
   0xb   :  { %s6012_s14 = sld [smem:[%s6987_s0 + %s5903_s10]]   ;;  %s5907_s30 = smov 17  }
   0xc   :  { %s6017_s19 = sld [smem:[%s6987_s0 + %s5904_s15]]   ;;  %s5908_s6 = smov 19  }
   0xd   :  { %s6022_s23 = sld [smem:[%s6987_s0 + %s5905_s9]]   ;;  %s5909_s12 = smov 20  }
   0xe   :  { %7010 = sst [smem:[#allocation16_spill]] %s6002_s3  ;;  %s5910_s9 = smov 21  }
   0xf   :  { %s6027_s28 = sld [smem:[%s6987_s0 + %s5906_s24]]   ;;  %s5911_s26 = smov 22  }
  0x10   :  { %7011 = sst [smem:[#allocation17_spill]] %s6007_s8  ;;  %s5912_s2 = smov 24  }
  0x11   :  { %7012 = sst [smem:[#allocation18_spill]] %s6012_s14  ;;  %s5949_s3 = smov 11  }
  0x12   :  { %7013 = sst [smem:[#allocation19_spill]] %s6017_s19  ;;  %s5951_s22 = smov 18  }
  0x13   :  { %7014 = sst [smem:[#allocation20_spill]] %s6022_s23  ;;  %s5952_s27 = smov 23  }
  0x14   :  { %s6032_s4 = sld [smem:[%s6987_s0 + %s5907_s30]]   ;;  %s5954_s14 = smov 31  }
  0x15   :  { %7015 = sst [smem:[#allocation21_spill]] %s6027_s28 }
  0x16   :  { %s6037_s11 = sld [smem:[%s6987_s0 + %s5908_s6]]   ;;  %s5948_s6 = smov 9  }
  0x17   :  { %s6042_s18 = sld [smem:[%s6987_s0 + %s5909_s12]]   ;;  %s5913_s12 = smov 26  }
  0x18   :  { %s6047_s24 = sld [smem:[%s6987_s0 + %s5910_s9]]   ;;  %s5914_s9 = smov 27  }
  0x19   :  { %s6052_s1 = sld [smem:[%s6987_s0 + %s5911_s26]]   ;;  %s5915_s26 = smov 28  }
  0x1a   :  { %7016 = sst [smem:[#allocation22_spill]] %s6032_s4 }
  0x1b   :  { %s6057_s10 = sld [smem:[%s6987_s0 + %s5912_s2]]   ;;  %s5916_s2 = smov 29  }
  0x1c   :  { %7017 = sst [smem:[#allocation23_spill]] %s6037_s11 }
  0x1d   :  { %7018 = sst [smem:[#allocation24_spill]] %s6042_s18 }
  0x1e   :  { %7019 = sst [smem:[#allocation25_spill]] %s6047_s24 }
  0x1f   :  { %7020 = sst [smem:[#allocation26_spill]] %s6052_s1 }
  0x20   :  { %s6062_s4 = sld [smem:[%s6987_s0 + %s5913_s12]]   ;;  %s5917_s12 = smov 30  }
  0x21   :  { %7021 = sst [smem:[#allocation27_spill]] %s6057_s10 }
  0x22   :  { %s6067_s18 = sld [smem:[%s6987_s0 + %s5914_s9]]   ;;  %s5918_s9 = smov 32  }
  0x23   :  { %s6072_s1 = sld [smem:[%s6987_s0 + %s5915_s26]]   ;;  %s5919_s26 = smov 33  }
  0x24   :  { %s6077_s10 = sld [smem:[%s6987_s0 + %s5916_s2]]   ;;  %s5920_s2 = smov 34  }
  0x25   :  { %s6097_s28 = sld [smem:[%s6987_s0 + %s5920_s2]]   ;;  %s5924_s2 = smov 39  }
  0x26   :  { %7022 = sst [smem:[#allocation28_spill]] %s6062_s4 }
  0x27   :  { %s6082_s4 = sld [smem:[%s6987_s0 + %s5917_s12]]   ;;  %s5921_s12 = smov 35  }
  0x28   :  { %7023 = sst [smem:[#allocation29_spill]] %s6067_s18 }
  0x29   :  { %7024 = sst [smem:[#allocation30_spill]] %s6072_s1 }
  0x2a   :  { %7025 = sst [smem:[#allocation31_spill]] %s6077_s10 }
  0x2b   :  { %s6087_s18 = sld [smem:[%s6987_s0 + %s5918_s9]]   ;;  %s5922_s9 = smov 37  }
  0x2c   :  { %s6092_s1 = sld [smem:[%s6987_s0 + %s5919_s26]]   ;;  %s5923_s26 = smov 38  }
  0x2d   :  { %7026 = sst [smem:[#allocation32_spill]] %s6082_s4 }
  0x2e   :  { %7029 = sst [smem:[#allocation35_spill]] %s6097_s28 }
  0x2f   :  { %s6102_s11 = sld [smem:[%s6987_s0 + %s5921_s12]]   ;;  %s5925_s12 = smov 40  }
  0x30   :  { %s6107_s24 = sld [smem:[%s6987_s0 + %s5922_s9]]   ;;  %s5926_s9 = smov 41  }
  0x31   :  { %7027 = sst [smem:[#allocation33_spill]] %s6087_s18 }
  0x32   :  { %7028 = sst [smem:[#allocation34_spill]] %s6092_s1 }
  0x33   :  { %s6112_s10 = sld [smem:[%s6987_s0 + %s5923_s26]]   ;;  %s5927_s26 = smov 42  }
  0x34   :  { %s6117_s28 = sld [smem:[%s6987_s0 + %s5924_s2]]   ;;  %s5928_s2 = smov 43  }
  0x35   :  { %7030 = sst [smem:[#allocation36_spill]] %s6102_s11 }
  0x36   :  { %7031 = sst [smem:[#allocation37_spill]] %s6107_s24 }
  0x37   :  { %s6122_s11 = sld [smem:[%s6987_s0 + %s5925_s12]]   ;;  %s5929_s12 = smov 44  }
  0x38   :  { %s6127_s24 = sld [smem:[%s6987_s0 + %s5926_s9]]   ;;  %s5930_s9 = smov 45  }
  0x39   :  { %7032 = sst [smem:[#allocation38_spill]] %s6112_s10 }
  0x3a   :  { %7033 = sst [smem:[#allocation39_spill]] %s6117_s28 }
  0x3b   :  { %s6132_s10 = sld [smem:[%s6987_s0 + %s5927_s26]]   ;;  %s5931_s26 = smov 46  }
  0x3c   :  { %s6137_s28 = sld [smem:[%s6987_s0 + %s5928_s2]]   ;;  %s5932_s2 = smov 47  }
  0x3d   :  { %7034 = sst [smem:[#allocation40_spill]] %s6122_s11 }
  0x3e   :  { %7035 = sst [smem:[#allocation41_spill]] %s6127_s24 }
  0x3f   :  { %s6142_s11 = sld [smem:[%s6987_s0 + %s5929_s12]]   ;;  %s5933_s12 = smov 48  }
  0x40   :  { %s6147_s24 = sld [smem:[%s6987_s0 + %s5930_s9]]   ;;  %s5934_s9 = smov 49  }
  0x41   :  { %7036 = sst [smem:[#allocation42_spill]] %s6132_s10 }
  0x42   :  { %s6152_s10 = sld [smem:[%s6987_s0 + %s5931_s26]]   ;;  %s5935_s26 = smov 50  }
  0x43   :  { %s6157_s1 = sld [smem:[%s6987_s0 + %s5932_s2]]   ;;  %s5936_s2 = smov 51  }
  0x44   :  { %s6162_s4 = sld [smem:[%s6987_s0 + %s5933_s12]]   ;;  %s5937_s12 = smov 52  }
  0x45   :  { %s6167_s18 = sld [smem:[%s6987_s0 + %s5934_s9]]   ;;  %s5938_s9 = smov 53  }
  0x46   :  { %s6187_s8 = sld [smem:[%s6987_s0 + %s5938_s9]]   ;;  %s5942_s9 = smov 57  }
  0x47   :  { %s4731_s16 = sld [smem:[%s6987_s0 + %s5949_s3]]  }
  0x48   :  { %7037 = sst [smem:[#allocation43_spill]] %s6152_s10 }
  0x49   :  { %7038 = sst [smem:[#allocation44_spill]] %s6157_s1 }
  0x4a   :  { %7039 = sst [smem:[#allocation45_spill]] %s6162_s4 }
  0x4b   :  { %s6172_s10 = sld [smem:[%s6987_s0 + %s5935_s26]]   ;;  %s5939_s26 = smov 54  }
  0x4c   :  { %s6177_s1 = sld [smem:[%s6987_s0 + %s5936_s2]]   ;;  %s5940_s2 = smov 55  }
  0x4d   :  { %s6182_s4 = sld [smem:[%s6987_s0 + %s5937_s12]]   ;;  %s5941_s12 = smov 56   ;;  %v134_v3 = vstv %s4731_s16 }
  0x4e   :  { %7043 = sst [smem:[#allocation49_spill]] %s6187_s8  ;;  %135 = vst [vmem:[#allocation5] sm:$0x1] %v134_v3 }
  0x4f   :  { %s6207_s8 = sld [smem:[%s6987_s0 + %s5942_s9]]   ;;  %s5946_s9 = smov 61  }
  0x50   :  { %s4751_s20 = sld [smem:[%s6987_s0 + %s5954_s14]]  }
  0x51   :  { %7040 = sst [smem:[#allocation46_spill]] %s6172_s10 }
  0x52   :  { %7041 = sst [smem:[#allocation47_spill]] %s6177_s1 }
  0x53   :  { %7042 = sst [smem:[#allocation48_spill]] %s6182_s4 }
  0x54   :  { %s6192_s10 = sld [smem:[%s6987_s0 + %s5939_s26]]   ;;  %s5943_s26 = smov 58  }
  0x55   :  { %s6197_s1 = sld [smem:[%s6987_s0 + %s5940_s2]]   ;;  %s5944_s2 = smov 59  }
  0x56   :  { %s6202_s4 = sld [smem:[%s6987_s0 + %s5941_s12]]   ;;  %s5945_s12 = smov 60   ;;  %v144_v8 = vstv %s4751_s20 }
  0x57   :  { %7047 = sst [smem:[#allocation53_spill]] %s6207_s8  ;;  %145 = vst [vmem:[#allocation10] sm:$0x1] %v144_v8 }
  0x58   :  { %s6217_s19 = sld [smem:[%s6987_s0 + %s5944_s2]]   ;;  %s5953_s2 = smov 25  }
  0x59   :  { %s6227_s8 = sld [smem:[%s6987_s0 + %s5946_s9]]  }
  0x5a   :  { %7044 = sst [smem:[#allocation50_spill]] %s6192_s10 }
  0x5b   :  { %7045 = sst [smem:[#allocation51_spill]] %s6197_s1  ;;  %s5950_s1 = smov 16  }
  0x5c   :  { %7046 = sst [smem:[#allocation52_spill]] %s6202_s4 }
  0x5d   :  { %s6212_s10 = sld [smem:[%s6987_s0 + %s5943_s26]]   ;;  %s5947_s26 = smov 3  }
  0x5e   :  { %7049 = sst [smem:[#allocation55_spill]] %s6217_s19 }
  0x5f   :  { %s6222_s4 = sld [smem:[%s6987_s0 + %s5945_s12]]  }
  0x60   :  { %7050 = sst [smem:[#allocation56_spill]] %s6227_s8  ;;  %s5955_s8 = smov 36  }
  0x61   :  { %s4729_s19 = sld [smem:[%s6987_s0 + %s5948_s6]]  }
  0x62   :  { %s4736_s9 = sld [smem:[%s6987_s0 + %s5950_s1]]  }
  0x63   :  { %7048 = sst [smem:[#allocation54_spill]] %s6212_s10 }
  0x64   :  { %s4723_s10 = sld [smem:[%s6987_s0 + %s5947_s26]]  }
  0x65   :  { %s4738_s26 = sld [smem:[%s6987_s0 + %s5951_s22]]  }
  0x66   :  { %s4743_s6 = sld [smem:[%s6987_s0 + %s5952_s27]]  }
  0x67   :  { %s4745_s3 = sld [smem:[%s6987_s0 + %s5953_s2]]   ;;  %v132_v2 = vstv %s4729_s19 }
  0x68   :  { %133 = vst [vmem:[#allocation4] sm:$0x1] %v132_v2  ;;  %s4756_s13 = sld [smem:[%s6987_s0 + %s5955_s8]]   ;;  %v136_v4 = vstv %s4736_s9 }
  0x69   :  { %137 = vst [vmem:[#allocation6] sm:$0x1] %v136_v4 }
  0x6a   :  { %v130_v1 = vstv %s4723_s10 }
  0x6b   :  { %131 = vst [vmem:[#allocation3] sm:$0x1] %v130_v1  ;;  %v138_v5 = vstv %s4738_s26 }
  0x6c   :  { %139 = vst [vmem:[#allocation7] sm:$0x1] %v138_v5  ;;  %v140_v6 = vstv %s4743_s6 }
  0x6d   :  { %141 = vst [vmem:[#allocation8] sm:$0x1] %v140_v6  ;;  %v142_v7 = vstv %s4745_s3 }
  0x6e   :  { %143 = vst [vmem:[#allocation9] sm:$0x1] %v142_v7  ;;  %v146_v9 = vstv %s4756_s13 }
  0x6f   :  { %147 = vst [vmem:[#allocation11] sm:$0x1] %v146_v9 }
  0x70   :  { %v5708_v10 = vld [vmem:[%s5997_s29] sm:$0xff]   ;;  %v5956_v11 = vmov 0.0   ;;  %vm5957_vm0 = vmmov 0   ;;  %v273_v14 = vld [vmem:[%s6222_s4 + $0x8] sm:$0x3]  ;;  %vm283_vm1 = vcmask 130048  }
  0x71   :  { %5158 = vmatprep.subr.bf16.mxu0 %v5956_v11  ;;  %5164 = vmatprep.subr.bf16.mxu1 %v5956_v11  ;;  %v5709_v12 = vld [vmem:[%s5982_s17] sm:$0xff]  }
  0x72   :  { %5159 = vmatpush3.bf16.msra.mxu0 %v5708_v10  ;;  %5160 = vmatprep.mubr.msk.bf16.mxu0 %vm5957_vm0, %v5956_v11  ;;  %v272_v13 = vld [vmem:[%s6222_s4] sm:$0xff] }
  0x73   :  { %5165 = vmatpush3.bf16.msra.mxu1 %v5709_v12  ;;  %5166 = vmatprep.mubr.msk.bf16.mxu1 %vm5957_vm0, %v5956_v11  ;;  %v6266_v15 = vpack.c.bf16 %v273_v14, %v272_v13 }
  0x75   :  { %5161 = vmatmul.mubr.msk.bf16.vlgmr.msra.gmra.mxu0 %vm283_vm1, %v6266_v15 }
  0x76   :  { %5167 = vmatmul.mubr.msk.bf16.vlgmr.msra.gmra.mxu1 %vm283_vm1, %v6266_v15 }
  0x77   :  { %148 = vsyncpa [#allocation13], 0  ;;  %v6273_v16 = vld [vmem:[%s6137_s28] sm:$0xff]   ;;  %vm389_vm2 = vcmask 80896   ;;  %vm396_vm3 = vcmask 1044480   ;;  %v6304_v33 = vld [vmem:[%s6167_s18 + $0x18] sm:$0xff] }
  0x78   :  { %v6276_v17 = vld [vmem:[%s6142_s11] sm:$0xff]   ;;  %5178 = vmatprep.mubr.msk.bf16.mxu1 %vm389_vm2, %v6273_v16  ;;  %v6283_v25 = vld [vmem:[%s6137_s28 + $0x8] sm:$0xf]  ;;  %v6309_v34 = vld [vmem:[%s6167_s18 + $0x10] sm:$0xff]  ;;  %vm543_vm5 = vcmask 261120   ;;  %vm659_vm8 = vcmask 195584  }
  0x79   :  { %5172 = vmatprep.mubr.msk.bf16.mxu0 %vm389_vm2, %v6276_v17  ;;  %v6288_v30 = vld [vmem:[%s6142_s11 + $0x8] ss:$0 sps:$4 sm:$0xff]   ;;  %v6294_v32 = vcombine.low %v6283_v25, %v6283_v25  ;;  %v6319_v36 = vld [vmem:[%s6167_s18] sm:$0xff]  ;;  %vm753_vm9 = vcmask 1041408   ;;  %s7052_s17 = sld [smem:[#allocation20_spill]] }
  0x7a   :  { %v6314_v35 = vld [vmem:[%s6167_s18 + $0x8] sm:$0xff]  ;;  %v4794_v48 = vld [vmem:[%s5969_s5] ss:$0 sm:$0xff]  ;;  %s7051_s5 = sld [smem:[#allocation15_spill]] }
  0x7b   :  { %v6346_v5 = vld [vmem:[%s6147_s24] sm:$0xff]  ;;  %s7055_s29 = sld [smem:[#allocation16_spill]] }
  0x7c   :  { %s7056_s28 = sld [smem:[#allocation19_spill]] }
  0x7d   :  { %s7057_s4 = sld [smem:[#allocation17_spill]] }
  0x7e   :  { %s7058_s11 = sld [smem:[#allocation33_spill]] }
  0x7f   :  { %s7060_s10 = sld [smem:[#allocation46_spill]] }
  0x80   :  { %s7061_s16 = sld [smem:[#allocation47_spill]] }
  0x81   :  { %s7062_s9 = sld [smem:[#allocation34_spill]] }
  0x82   :  { %s7063_s26 = sld [smem:[#allocation31_spill]] }
  0x83   :  { %s7064_s27 = sld [smem:[#allocation25_spill]] }
  0x84   :  { %s7065_s30 = sld [smem:[#allocation53_spill]] }
  0x85   :  { %s7066_s6 = sld [smem:[#allocation23_spill]] }
  0x86   :  { %s7067_s2 = sld [smem:[#allocation44_spill]] }
  0x87   :  { %s7068_s7 = sld [smem:[#allocation43_spill]] }
  0x88   :  { %s7070_s15 = sld [smem:[#allocation45_spill]] }
  0x89   :  { %s7071_s14 = sld [smem:[#allocation24_spill]] }
  0x8a   :  { %s7072_s1 = sld [smem:[#allocation22_spill]] }
  0x8b   :  { %s7073_s12 = sld [smem:[#allocation30_spill]] }
  0x8c   :  { %s7074_s20 = sld [smem:[#allocation28_spill]] }
  0x8d   :  { %s7075_s8 = sld [smem:[#allocation26_spill]] }
  0x8e   :  { %s7076_s22 = sld [smem:[#allocation29_spill]] }
  0x8f   :  { %s7077_s13 = sld [smem:[#allocation27_spill]] }
 0x135   :  { %v321_v18 = vpop.f32.mrf.mxu0 }
 0x136   :  { %v370_v19 = vpop.f32.mrf.mxu1 }
 0x137   :  { %v5162_v20 = vpop.f32.mrf.mxu0 }
 0x138   :  { %v5168_v21 = vpop.f32.mrf.mxu1 }
 0x139   :  { %v324_v22 = vpop.f32.mrf.mxu0 }
 0x13a   :  { %v380_v23 = vpack.c.bf16 %v324_v22, %v321_v18  ;;  %v373_v24 = vpop.f32.mrf.mxu1 }
 0x13b   :  { %v451_v26 = vpack.c.bf16 %v373_v24, %v370_v19  ;;  %v5163_v27 = vpop.f32.mrf.mxu0 }
 0x13c   :  { %v398_v28 = vsel %vm396_vm3, %v380_v23, 0  ;;  %v5169_v29 = vpop.f32.mrf.mxu1  ;;  %5624 = vmatprep.subr.msk.bf16.mxu0 %vm396_vm3, %v380_v23 }
 0x13d   :  { %v467_v31 = vsel %vm396_vm3, %v451_v26, 0  ;;  %5625 = vmatprep.subr.msk.bf16.mxu1 %vm396_vm3, %v451_v26  ;;  %5171 = vmatpush3.bf16.msra.mxu0 %v398_v28  ;;  %v6351_v28 = vld [vmem:[%s6147_s24 + $0x8] sm:$0x3]  ;;  %v741_v29 = vunpack.c.l.bf16 %v6273_v16  ;;  %s7059_s24 = sld [smem:[#allocation32_spill]] }
 0x13e   :  { %5177 = vmatpush3.bf16.msra.mxu1 %v467_v31  ;;  %5182 = vmatprep.subr.mxu0 %v5956_v11 }
 0x140   :  { %5173 = vmatmul.mubr.msk.bf16.vlgmr.msra.gmra.mxu0 %vm389_vm2, %v6288_v30 }
 0x141   :  { %5179 = vmatmul.mubr.msk.bf16.vlgmr.msra.gmra.mxu1 %vm389_vm2, %v6294_v32  ;;  %5190 = vmatprep.mubr.msk.f32.mxu0 %vm5957_vm0, %v5956_v11 }
 0x142   :  { %5183 = vmatpush3.msra.mxu0 %v6304_v33  ;;  %5205 = vmatprep.mubr.msk.f32.mxu1 %vm659_vm8, %v6346_v5 }
 0x143   :  { %5184 = vmatprep.subr.mxu0 %v5956_v11 }
 0x144   :  { %5185 = vmatpush3.msra.mxu0 %v6309_v34 }
 0x145   :  { %5186 = vmatprep.subr.mxu0 %v5956_v11 }
 0x146   :  { %5187 = vmatpush3.msra.mxu0 %v6314_v35 }
 0x147   :  { %5188 = vmatprep.subr.mxu0 %v5956_v11 }
 0x148   :  { %5189 = vmatpush3.msra.mxu0 %v6319_v36 }
 0x149   :  { %5221 = vmatprep.subr.bf16.mxu0 %v5956_v11 }
 0x200   :  { %v6323_v37 = vpop.f32.mrf.mxu0 }
 0x201   :  { %v5180_v38 = vpop.f32.mrf.mxu1 }
 0x202   :  { %v6325_v39 = vpop.f32.mrf.mxu0  ;;  %v519_v44 = vadd.f32 %v5180_v38, %v6323_v37 }
 0x203   :  { %v503_v40 = vpop.f32.mrf.mxu1 }
 0x204   :  { %v517_v41 = vadd.f32 %v503_v40, %v6325_v39  ;;  %v5175_v42 = vpop.f32.mrf.mxu0  ;;  %v525_v52 = vmul.f32 0.2, %v519_v44  ;;  %vm522_vm7 = vcmp.ge.f32.partialorder %v519_v44, 0.0  ;;  %v742_v40 = vunpack.c.h.bf16 %v6273_v16 }
 0x205   :  { %v5181_v43 = vpop.f32.mrf.mxu1  ;;  %v5714_v42 = vld [vmem:[%s5992_s25] sm:$0xff]   ;;  %s7053_s25 = sld [smem:[#allocation18_spill]] }
 0x206   :  { %vm520_vm4 = vcmp.ge.f32.partialorder %v517_v41, 0.0  ;;  %v523_v45 = vmul.f32 0.2, %v517_v41  ;;  %v6329_v46 = vpop.f32.mrf.mxu0  ;;  %v528_v56 = vsel %vm522_vm7, %v519_v44, %v525_v52  ;;  %v4809_v43 = vld [vmem:[#allocation3] ss:$0 sm:$0xff]  ;;  %v5958_v44 = vmov 0  }
 0x207   :  { %v506_v47 = vpop.f32.mrf.mxu1  ;;  %v538_v57 = vmul.f32 %v4794_v48, %v528_v56  ;;  %5706 = vset.pattern.permute.xlu0 %v5958_v44  ;;  %5707 = vset.pattern.permute.xlu1 %v5958_v44  ;;  %vm2589_vm7 = vcmask 1045504  }
 0x208   :  { %v526_v49 = vsel %vm520_vm4, %v517_v41, %v523_v45  ;;  %v518_v50 = vadd.f32 %v506_v47, %v6329_v46  ;;  %v743_v41 = vunpack.c.l.bf16 %v6283_v25 }
 0x209   :  { %v536_v51 = vmul.f32 %v4794_v48, %v526_v49 }
 0x20a   :  { %vm521_vm6 = vcmp.ge.f32.partialorder %v518_v50, 0.0  ;;  %v524_v53 = vmul.f32 0.2, %v518_v50 }
 0x20b   :  { %5191 = vmatmul.mubr.msk.f32.vlgmr.msra.gmra.mxu0 %vm543_vm5, %v536_v51 }
 0x20c   :  { %v527_v54 = vsel %vm521_vm6, %v518_v50, %v524_v53  ;;  %5193 = vmatprep.mubr.msk.f32.mxu0 %vm5957_vm0, %v5956_v11  ;;  %5222 = vmatpush3.bf16.msra.mxu0 %v5714_v42 }
 0x20d   :  { %v537_v55 = vmul.f32 %v4794_v48, %v527_v54  ;;  %5236 = vmatprep.subr.bf16.mxu0 %v5956_v11 }
 0x20f   :  { %5194 = vmatmul.mubr.msk.f32.gmra.mxu0 %vm543_vm5, %v537_v55 }
 0x210   :  { %5196 = vmatprep.mubr.msk.f32.mxu0 %vm5957_vm0, %v5956_v11 }
 0x213   :  { %5197 = vmatmul.mubr.msk.f32.gmra.mxu0 %vm543_vm5, %v538_v57 }
 0x214   :  { %5223 = vmatprep.mubr.msk.bf16.mxu0 %vm5957_vm0, %v5956_v11 }
 0x217   :  { %5224 = vmatmul.mubr.msk.bf16.vlgmr.msra.gmra.mxu0 %vm283_vm1, %v6266_v15 }
 0x218   :  { %5240 = vmatprep.mubr.msk.bf16.mxu0 %vm5957_vm0, %v5956_v11 }
 0x2cb   :  { %v619_v58 = vpop.f32.mrf.mxu0 }
 0x2cc   :  { %v633_v63 = vsel %vm543_vm5, %v619_v58, -inf }
 0x2cd   :  { %v5192_v59 = vpop.f32.mrf.mxu0 }
 0x2cf   :  { %v624_v60 = vpop.f32.mrf.mxu0 }
 0x2d0   :  { %v634_v61 = vsel %vm543_vm5, %v624_v60, -inf }
 0x2d1   :  { %v5195_v62 = vpop.f32.mrf.mxu0  ;;  %v636_v1 = vmax.f32 %v633_v63, %v634_v61 }
 0x2d3   :  { %v629_v0 = vpop.f32.mrf.mxu0 }
 0x2d4   :  { %v635_v2 = vsel %vm543_vm5, %v629_v0, -inf }
 0x2d5   :  { %v5198_v3 = vpop.f32.mrf.mxu0  ;;  %v637_v4 = vmax.f32 %v636_v1, %v635_v2  ;;  %v5715_v1 = vld [vmem:[%s5987_s21 + $0x8] sm:$0xff]  }
 0x2d6   :  { %5237 = vmatpush3.bf16.msra.mxu0 %v5715_v1  ;;  %v4808_v3 = vld [vmem:[%s7051_s5] ss:$0 sm:$0xff]  ;;  %s7079_s5 = sld [smem:[#allocation52_spill]] }
 0x2d7   :  { %638 = vmax.xlane.f32.xlu0 %v637_v4  ;;  %5238 = vmatprep.subr.bf16.mxu0 %v5956_v11 }
 0x2ed   :  { %988 = vperm.xlu0 %5706, %v4809_v43  }
 0x360   :  { %v639_v6 = vpop.xlane.xlu0 %638 }
 0x361   :  { %v640_v7 = vrot.slane %v639_v6, 4 }
 0x363   :  { %v641_v8 = vmax.f32 %v639_v6, %v640_v7 }
 0x365   :  { %v642_v9 = vrot.slane %v641_v8, 2 }
 0x367   :  { %v643_v10 = vmax.f32 %v641_v8, %v642_v9 }
 0x368   :  { %v989_v7 = vpop.permute.xlu0 %988 }
 0x369   :  { %v644_v12 = vrot.slane %v643_v10, 1 }
 0x36b   :  { %v645_v13 = vmax.f32 %v643_v10, %v644_v12 }
 0x36d   :  { %5632 = vpush %v645_v13 }
 0x39e   :  { %s5633_s0 = spop %5632 }
 0x39f   :  { %v647_v14 = vstv %s5633_s0  ;;  %s7078_s0 = sld [smem:[#allocation50_spill]] }
 0x3a0   :  { %v649_v18 = vsub.f32 %v624_v60, %v647_v14  ;;  %v650_v19 = vsub.f32 %v629_v0, %v647_v14  ;;  %v648_v20 = vsub.f32 %v619_v58, %v647_v14 }
 0x3a2   :  { %v655_v21 = vmul.f32 1.442695, %v650_v19  ;;  %v653_v22 = vmul.f32 1.442695, %v649_v18  ;;  %v651_v23 = vmul.f32 1.442695, %v648_v20 }
 0x3a3   :  { %v5717_v19 = vld [vmem:[%s7052_s17 + $0x8] sm:$0xff]  }
 0x3a4   :  { %5763 = vpow2.f32 %v655_v21  ;;  %v5718_v21 = vld [vmem:[%s7052_s17] sm:$0xff]   ;;  %s7080_s17 = sld [smem:[#allocation54_spill]] }
 0x3a5   :  { %5765 = vpow2.f32 %v653_v22  ;;  %v5719_v22 = vld [vmem:[%s7053_s25 + $0x8] sm:$0xff]  }
 0x3a6   :  { %5767 = vpow2.f32 %v651_v23  ;;  %v5720_v23 = vld [vmem:[%s7053_s25] sm:$0xff]   ;;  %s7081_s25 = sld [smem:[#allocation37_spill]] }
 0x3b1   :  { %v5764_v24 = vpop.eup %5763 }
 0x3b2   :  { %5199 = vmatprep.subr.mxu1 %v5764_v24  ;;  %v5766_v26 = vpop.eup %5765 }
 0x3b3   :  { %5200 = vmatpush3.msra.mxu1 %v5764_v24  ;;  %v5768_v27 = vpop.eup %5767 }
 0x3b4   :  { %5201 = vmatprep.subr.mxu1 %v5766_v26 }
 0x3b5   :  { %5202 = vmatpush3.msra.mxu1 %v5766_v26 }
 0x3b6   :  { %5203 = vmatprep.subr.mxu1 %v5768_v27 }
 0x3b7   :  { %5204 = vmatpush3.msra.mxu1 %v5768_v27 }
 0x3b8   :  { %5206 = vmatmul.mubr.msk.f32.vlgmr.msra.gmra.mxu1 %vm659_vm8, %v6351_v28  ;;  %5208 = vmatprep.subr.mxu1 %v5956_v11 }
 0x3b9   :  { %5212 = vmatprep.mubr.msk.f32.mxu1 %vm5957_vm0, %v5956_v11 }
 0x478   :  { %v5207_v31 = vpop.f32.mrf.mxu1 }
 0x479   :  { %5209 = vmatpush3.msk.msra.mxu1 %vm753_vm9, %v5207_v31 }
 0x47a   :  { %v732_v38 = vpop.f32.mrf.mxu1  ;;  %5210 = vmatprep.subr.mxu1 %v5956_v11 }
 0x47b   :  { %5211 = vmatpush3.msra.mxu1 %v732_v38 }
 0x47c   :  { %5213 = vmatmul.mubr.msk.f32.vlgmr.msra.gmra.mxu1 %vm389_vm2, %v741_v29 }
 0x47d   :  { %5215 = vmatprep.mubr.msk.f32.mxu1 %vm5957_vm0, %v5956_v11 }
 0x480   :  { %5216 = vmatmul.mubr.msk.f32.gmra.mxu1 %vm389_vm2, %v742_v40 }
 0x481   :  { %5218 = vmatprep.mubr.msk.f32.mxu1 %vm5957_vm0, %v5956_v11 }
 0x484   :  { %5219 = vmatmul.mubr.msk.f32.gmra.mxu1 %vm389_vm2, %v743_v41 }
 0x485   :  { %5233 = vmatprep.mubr.msk.f32.mxu1 %vm659_vm8, %v6346_v5 }
 0x53c   :  { %v823_v45 = vpop.f32.mrf.mxu1 }
 0x53d   :  { %v824_v50 = vadd.f32 1e-16, %v823_v45 }
 0x53e   :  { %v5214_v47 = vpop.f32.mrf.mxu1 }
 0x540   :  { %v828_v48 = vpop.f32.mrf.mxu1 }
 0x541   :  { %v829_v49 = vadd.f32 1e-16, %v828_v48 }
 0x542   :  { %v5217_v51 = vpop.f32.mrf.mxu1 }
 0x543   :  { %5769 = vrcp.f32 %v829_v49 }
 0x544   :  { %v833_v52 = vpop.f32.mrf.mxu1  ;;  %5771 = vrcp.f32 %v824_v50 }
 0x545   :  { %v834_v53 = vadd.f32 1e-16, %v833_v52 }
 0x546   :  { %v5220_v54 = vpop.f32.mrf.mxu1 }
 0x547   :  { %5773 = vrcp.f32 %v834_v53 }
 0x550   :  { %v5770_v15 = vpop.eup %5769 }
 0x551   :  { %v5772_v55 = vpop.eup %5771  ;;  %v840_v58 = vmul.f32 %v5770_v15, %v5766_v26 }
 0x552   :  { %v838_v60 = vmul.f32 %v5772_v55, %v5768_v27 }
 0x553   :  { %v844_v61 = vmul.f32 %v840_v58, %v6329_v46 }
 0x554   :  { %v5774_v56 = vpop.eup %5773  ;;  %v843_v62 = vmul.f32 %v838_v60, %v6325_v39  ;;  %v5716_v39 = vld [vmem:[%s5987_s21] sm:$0xff]   ;;  %s7054_s21 = sld [smem:[#allocation51_spill]] }
 0x555   :  { %v842_v57 = vmul.f32 %v5774_v56, %v5764_v24  ;;  %5239 = vmatpush3.bf16.msra.mxu0 %v5716_v39  ;;  %v4810_v24 = vld [vmem:[#allocation2] ss:$0 sm:$0xff] }
 0x556   :  { %5251 = vmatprep.subr.bf16.mxu0 %v5956_v11 }
 0x557   :  { %v845_v59 = vmul.f32 %v6323_v37, %v842_v57  ;;  %v888_v37 = vpop.f32.mrf.mxu0 }
 0x559   :  { %5227 = vmatprep.subr.mxu1 %v845_v59  ;;  %v5225_v63 = vpop.f32.mrf.mxu0 }
 0x55a   :  { %5228 = vmatpush3.msra.mxu1 %v845_v59  ;;  %v6438_v63 = vld [vmem:[%s7054_s21] sm:$0x3]  ;;  %s7082_s21 = sld [smem:[#allocation36_spill]] }
 0x55b   :  { %5229 = vmatprep.subr.mxu1 %v844_v61  ;;  %v891_v46 = vpop.f32.mrf.mxu0 }
 0x55c   :  { %5230 = vmatpush3.msra.mxu1 %v844_v61 }
 0x55d   :  { %5231 = vmatprep.subr.mxu1 %v843_v62  ;;  %v5226_v0 = vpop.f32.mrf.mxu0 }
 0x55e   :  { %5232 = vmatpush3.msra.mxu1 %v843_v62 }
 0x55f   :  { %5234 = vmatmul.mubr.msk.f32.vlgmr.msra.gmra.mxu1 %vm659_vm8, %v6351_v28  ;;  %5244 = vmatprep.subr.mxu1 %v5956_v11 }
 0x560   :  { %5248 = vmatprep.mubr.msk.f32.mxu1 %vm5957_vm0, %v5956_v11 }
 0x61f   :  { %v5235_v2 = vpop.f32.mrf.mxu1 }
 0x620   :  { %v967_v4 = vadd.f32 %v5235_v2, %v891_v46 }
 0x621   :  { %v961_v6 = vpop.f32.mrf.mxu1 }
 0x622   :  { %v978_v8 = vadd.f32 %v4808_v3, %v967_v4  ;;  %v962_v9 = vadd.f32 %v961_v6, %v888_v37 }
 0x624   :  { %v977_v10 = vadd.f32 %v4808_v3, %v962_v9  ;;  %v992_v12 = vmul.f32 %v989_v7, %v978_v8  ;;  %vm980_vm10 = vcmp.ge.f32.partialorder %v978_v8, 0.0 }
 0x626   :  { %vm979_vm11 = vcmp.ge.f32.partialorder %v977_v10, 0.0  ;;  %v991_v13 = vmul.f32 %v989_v7, %v977_v10  ;;  %v6399_v18 = vsel %vm980_vm10, %v978_v8, %v992_v12  ;;  %v4826_v12 = vld [vmem:[%s7055_s29] ss:$0 sm:$0xff]  ;;  %vm2324_vm10 = vcmask 97280   ;;  %s7083_s29 = sld [smem:[#allocation48_spill]] }
 0x628   :  { %v6397_v14 = vsel %vm979_vm11, %v977_v10, %v991_v13 }
 0x629   :  { %v999_v20 = vpack.c.bf16 %v6399_v18, %v6397_v14 }
 0x62b   :  { %5241 = vmatmul.mubr.msk.bf16.vlgmr.msra.gmra.mxu0 %vm543_vm5, %v999_v20 }
 0x62c   :  { %5252 = vmatpush3.bf16.msra.mxu0 %v5717_v19  ;;  %5255 = vmatprep.mubr.msk.bf16.mxu0 %vm5957_vm0, %v5956_v11 }
 0x62d   :  { %5253 = vmatprep.subr.bf16.mxu0 %v5956_v11 }
 0x630   :  { %5254 = vmatpush3.bf16.msra.mxu0 %v5718_v21 }
 0x631   :  { %5259 = vmatprep.subr.bf16.mxu0 %v5956_v11 }
 0x633   :  { %5256 = vmatmul.mubr.msk.bf16.vlgmr.msra.gmra.mxu0 %vm543_vm5, %v999_v20 }
 0x634   :  { %5260 = vmatpush3.bf16.msra.mxu0 %v5719_v22  ;;  %5263 = vmatprep.mubr.msk.bf16.mxu0 %vm5957_vm0, %v5956_v11 }
 0x635   :  { %5261 = vmatprep.subr.bf16.mxu0 %v5956_v11 }
 0x638   :  { %5262 = vmatpush3.bf16.msra.mxu0 %v5720_v23 }
 0x63b   :  { %5264 = vmatmul.mubr.msk.bf16.vlgmr.msra.gmra.mxu0 %vm543_vm5, %v999_v20 }
 0x63c   :  { %5269 = vmatprep.mubr.msk.bf16.mxu0 %vm389_vm2, %v6276_v17 }
 0x6eb   :  { %v1056_v26 = vpop.f32.mrf.mxu0 }
 0x6ec   :  { %v1057_v27 = vadd.f32 %v4810_v24, %v1056_v26 }
 0x6ed   :  { %v5242_v31 = vpop.f32.mrf.mxu0 }
 0x6ee   :  { %v1063_v38 = vsub.f32 0.0, %v1057_v27 }
 0x6ef   :  { %v1059_v42 = vpop.f32.mrf.mxu0 }
 0x6f0   :  { %v1060_v43 = vadd.f32 %v4810_v24, %v1059_v42  ;;  %v1065_v44 = vmul.f32 1.442695, %v1063_v38 }
 0x6f1   :  { %v5243_v45 = vpop.f32.mrf.mxu0 }
 0x6f2   :  { %v1064_v47 = vsub.f32 0.0, %v1060_v43  ;;  %5775 = vpow2.f32 %v1065_v44 }
 0x6f3   :  { %v1267_v48 = vpop.f32.mrf.mxu0 }
 0x6f4   :  { %v1067_v49 = vmul.f32 1.442695, %v1064_v47 }
 0x6f5   :  { %v5257_v50 = vpop.f32.mrf.mxu0 }
 0x6f6   :  { %5777 = vpow2.f32 %v1067_v49 }
 0x6f7   :  { %v1270_v51 = vpop.f32.mrf.mxu0 }
 0x6f8   :  { %v1331_v52 = vpack.c.bf16 %v1270_v51, %v1267_v48 }
 0x6f9   :  { %v5258_v53 = vpop.f32.mrf.mxu0 }
 0x6fa   :  { %v1333_v17 = vsel %vm396_vm3, %v1331_v52, 0  ;;  %5626 = vmatprep.subr.msk.bf16.mxu0 %vm396_vm3, %v1331_v52  ;;  %v4839_v52 = vld [vmem:[#allocation5] ss:$0 sm:$0xff] }
 0x6fb   :  { %v1324_v54 = vpop.f32.mrf.mxu0  ;;  %5268 = vmatpush3.bf16.msra.mxu0 %v1333_v17 }
 0x6fc   :  { %5279 = vmatprep.subr.mxu0 %v5956_v11 }
 0x6fd   :  { %v5265_v15 = vpop.f32.mrf.mxu0 }
 0x6fe   :  { %5270 = vmatmul.mubr.msk.bf16.vlgmr.msra.gmra.mxu0 %vm389_vm2, %v6288_v30 }
 0x6ff   :  { %v1327_v55 = vpop.f32.mrf.mxu0  ;;  %5280 = vmatpush3.msra.mxu0 %v6304_v33  ;;  %5287 = vmatprep.mubr.msk.f32.mxu0 %vm5957_vm0, %v5956_v11  ;;  %v5776_v58 = vpop.eup %5775 }
 0x700   :  { %v1383_v56 = vpack.c.bf16 %v1327_v55, %v1324_v54  ;;  %5281 = vmatprep.subr.mxu0 %v5956_v11  ;;  %v1069_v30 = vadd.f32 1.0, %v5776_v58 }
 0x701   :  { %v5266_v57 = vpop.f32.mrf.mxu0  ;;  %5282 = vmatpush3.msra.mxu0 %v6309_v34 }
 0x702   :  { %5283 = vmatprep.subr.mxu0 %v5956_v11 }
 0x703   :  { %v5778_v59 = vpop.eup %5777  ;;  %5284 = vmatpush3.msra.mxu0 %v6314_v35 }
 0x704   :  { %v1070_v60 = vadd.f32 1.0, %v5778_v59  ;;  %5285 = vmatprep.subr.mxu0 %v5956_v11 }
 0x705   :  { %5286 = vmatpush3.msra.mxu0 %v6319_v36  ;;  %v1385_v36 = vsel %vm396_vm3, %v1383_v56, 0 }
 0x706   :  { %5779 = vrcp.f32 %v1070_v60 }
 0x707   :  { %5781 = vrcp.f32 %v1069_v30 }
 0x713   :  { %v5780_v33 = vpop.eup %5779 }
 0x714   :  { %1081 = vperm.xlu1 %5707, %v5780_v33   ;;  %v5782_v61 = vpop.eup %5781 }
 0x718   :  { %1076 = vperm.xlu1 %5707, %v5782_v61  }
 0x78f   :  { %v1082_v34 = vpop.permute.xlu1 %1081 }
 0x790   :  { %v1085_v62 = vmul.f32 %v1082_v34, %v6399_v18 }
 0x792   :  { %5245 = vmatpush3.msk.msra.mxu1 %vm753_vm9, %v1085_v62 }
 0x793   :  { %v1077_v37 = vpop.permute.xlu1 %1076  ;;  %5246 = vmatprep.subr.mxu1 %v5956_v11 }
 0x794   :  { %v1084_v35 = vmul.f32 %v1077_v37, %v6397_v14 }
 0x796   :  { %5247 = vmatpush3.msra.mxu1 %v1084_v35 }
 0x797   :  { %5249 = vmatmul.mubr.msk.f32.vlgmr.msra.gmra.mxu1 %vm389_vm2, %v6438_v63  ;;  %5627 = vmatprep.subr.msk.bf16.mxu1 %vm396_vm3, %v1383_v56 }
 0x798   :  { %5274 = vmatpush3.bf16.msra.mxu1 %v1385_v36  ;;  %5275 = vmatprep.mubr.msk.bf16.mxu1 %vm389_vm2, %v6273_v16 }
 0x79b   :  { %5276 = vmatmul.mubr.msk.bf16.vlgmr.msra.gmra.mxu1 %vm389_vm2, %v6294_v32 }
 0x79c   :  { %5302 = vmatprep.mubr.msk.f32.mxu1 %vm659_vm8, %v6346_v5 }
 0x7be   :  { %v6450_v46 = vpop.f32.mrf.mxu0 }
 0x7c0   :  { %v6452_v0 = vpop.f32.mrf.mxu0 }
 0x7c2   :  { %v5272_v1 = vpop.f32.mrf.mxu0 }
 0x7c4   :  { %v6458_v9 = vpop.f32.mrf.mxu0 }
 0x857   :  { %v6454_v39 = vpop.f32.mrf.mxu1 }
 0x859   :  { %v5250_v2 = vpop.f32.mrf.mxu1 }
 0x85b   :  { %v5277_v3 = vpop.f32.mrf.mxu1 }
 0x85c   :  { %v1437_v8 = vadd.f32 %v5277_v3, %v6450_v46 }
 0x85d   :  { %v1421_v4 = vpop.f32.mrf.mxu1 }
 0x85e   :  { %v1435_v6 = vadd.f32 %v1421_v4, %v6452_v0  ;;  %v1443_v21 = vmul.f32 0.2, %v1437_v8  ;;  %vm1440_vm14 = vcmp.ge.f32.partialorder %v1437_v8, 0.0 }
 0x85f   :  { %v5278_v7 = vpop.f32.mrf.mxu1 }
 0x860   :  { %vm1438_vm12 = vcmp.ge.f32.partialorder %v1435_v6, 0.0  ;;  %v1441_v32 = vmul.f32 0.2, %v1435_v6  ;;  %v1446_v26 = vsel %vm1440_vm14, %v1437_v8, %v1443_v21  ;;  %v4838_v21 = vld [vmem:[%s7057_s4] ss:$0 sm:$0xff]  ;;  %s7086_s4 = sld [smem:[#allocation35_spill]] }
 0x861   :  { %v1424_v10 = vpop.f32.mrf.mxu1  ;;  %v1456_v27 = vmul.f32 %v4826_v12, %v1446_v26 }
 0x862   :  { %v1444_v13 = vsel %vm1438_vm12, %v1435_v6, %v1441_v32  ;;  %v1436_v19 = vadd.f32 %v1424_v10, %v6458_v9 }
 0x863   :  { %v1454_v20 = vmul.f32 %v4826_v12, %v1444_v13 }
 0x864   :  { %vm1439_vm13 = vcmp.ge.f32.partialorder %v1436_v19, 0.0  ;;  %v1442_v22 = vmul.f32 0.2, %v1436_v19 }
 0x865   :  { %5288 = vmatmul.mubr.msk.f32.vlgmr.msra.gmra.mxu0 %vm543_vm5, %v1454_v20 }
 0x866   :  { %v1445_v23 = vsel %vm1439_vm13, %v1436_v19, %v1442_v22  ;;  %5290 = vmatprep.mubr.msk.f32.mxu0 %vm5957_vm0, %v5956_v11 }
 0x867   :  { %v1455_v24 = vmul.f32 %v4826_v12, %v1445_v23 }
 0x869   :  { %5291 = vmatmul.mubr.msk.f32.gmra.mxu0 %vm543_vm5, %v1455_v24 }
 0x86a   :  { %5293 = vmatprep.mubr.msk.f32.mxu0 %vm5957_vm0, %v5956_v11 }
 0x86d   :  { %5294 = vmatmul.mubr.msk.f32.gmra.mxu0 %vm543_vm5, %v1456_v27 }
 0x86e   :  { %5324 = vmatprep.mubr.msk.f32.mxu0 %vm659_vm8, %v6346_v5 }
 0x925   :  { %v1532_v31 = vpop.f32.mrf.mxu0 }
 0x926   :  { %v1546_v45 = vsel %vm543_vm5, %v1532_v31, -inf }
 0x927   :  { %v5289_v38 = vpop.f32.mrf.mxu0 }
 0x929   :  { %v1537_v42 = vpop.f32.mrf.mxu0 }
 0x92a   :  { %v1547_v43 = vsel %vm543_vm5, %v1537_v42, -inf }
 0x92b   :  { %v5292_v44 = vpop.f32.mrf.mxu0  ;;  %v1549_v47 = vmax.f32 %v1546_v45, %v1547_v43  ;;  %v4840_v45 = vld [vmem:[#allocation4] ss:$0 sm:$0xff] }
 0x92d   :  { %v1542_v48 = vpop.f32.mrf.mxu0 }
 0x92e   :  { %v1548_v49 = vsel %vm543_vm5, %v1542_v48, -inf }
 0x92f   :  { %v5295_v50 = vpop.f32.mrf.mxu0  ;;  %v1550_v51 = vmax.f32 %v1549_v47, %v1548_v49 }
 0x931   :  { %1551 = vmax.xlane.f32.xlu1 %v1550_v51 }
 0x942   :  { %1830 = vperm.xlu1 %5707, %v4839_v52  }
 0x9ba   :  { %v1552_v53 = vpop.xlane.xlu1 %1551 }
 0x9bb   :  { %v1553_v17 = vrot.slane %v1552_v53, 4 }
 0x9bd   :  { %v1554_v5 = vmax.f32 %v1552_v53, %v1553_v17 }
 0x9be   :  { %v1831_v26 = vpop.permute.xlu1 %1830 }
 0x9bf   :  { %v1555_v54 = vrot.slane %v1554_v5, 2 }
 0x9c1   :  { %v1556_v15 = vmax.f32 %v1554_v5, %v1555_v54 }
 0x9c3   :  { %v1557_v55 = vrot.slane %v1556_v15, 1 }
 0x9c5   :  { %v1558_v56 = vmax.f32 %v1556_v15, %v1557_v55 }
 0x9c7   :  { %5634 = vpush %v1558_v56 }
 0x9f8   :  { %s5635_s19 = spop %5634 }
 0x9f9   :  { %v1560_v57 = vstv %s5635_s19  ;;  %s7084_s19 = sld [smem:[#allocation49_spill]] }
 0x9fa   :  { %v1562_v58 = vsub.f32 %v1537_v42, %v1560_v57  ;;  %v1563_v59 = vsub.f32 %v1542_v48, %v1560_v57  ;;  %v1561_v60 = vsub.f32 %v1532_v31, %v1560_v57 }
 0x9fc   :  { %v1568_v30 = vmul.f32 1.442695, %v1563_v59  ;;  %v1566_v33 = vmul.f32 1.442695, %v1562_v58  ;;  %v1564_v61 = vmul.f32 1.442695, %v1561_v60 }
 0x9fe   :  { %5783 = vpow2.f32 %v1568_v30 }
 0x9ff   :  { %5785 = vpow2.f32 %v1566_v33 }
 0xa00   :  { %5787 = vpow2.f32 %v1564_v61 }
 0xa0b   :  { %v5784_v34 = vpop.eup %5783 }
 0xa0c   :  { %5296 = vmatprep.subr.mxu1 %v5784_v34  ;;  %v5786_v62 = vpop.eup %5785 }
 0xa0d   :  { %5297 = vmatpush3.msra.mxu1 %v5784_v34  ;;  %v5788_v37 = vpop.eup %5787 }
 0xa0e   :  { %5298 = vmatprep.subr.mxu1 %v5786_v62 }
 0xa0f   :  { %5299 = vmatpush3.msra.mxu1 %v5786_v62 }
 0xa10   :  { %5300 = vmatprep.subr.mxu1 %v5788_v37 }
 0xa11   :  { %5301 = vmatpush3.msra.mxu1 %v5788_v37 }
 0xa12   :  { %5303 = vmatmul.mubr.msk.f32.vlgmr.msra.gmra.mxu1 %vm659_vm8, %v6351_v28  ;;  %5305 = vmatprep.subr.mxu1 %v5956_v11 }
 0xa13   :  { %5309 = vmatprep.mubr.msk.f32.mxu1 %vm5957_vm0, %v5956_v11 }
 0xad2   :  { %v5304_v35 = vpop.f32.mrf.mxu1 }
 0xad3   :  { %5306 = vmatpush3.msk.msra.mxu1 %vm753_vm9, %v5304_v35 }
 0xad4   :  { %v1636_v36 = vpop.f32.mrf.mxu1  ;;  %5307 = vmatprep.subr.mxu1 %v5956_v11 }
 0xad5   :  { %5308 = vmatpush3.msra.mxu1 %v1636_v36  ;;  %v4846_v36 = vld [vmem:[%s7059_s24] ss:$0 sm:$0xff]  ;;  %s7088_s24 = sld [smem:[#allocation41_spill]] }
 0xad6   :  { %5310 = vmatmul.mubr.msk.f32.vlgmr.msra.gmra.mxu1 %vm389_vm2, %v741_v29  ;;  %5327 = vmatprep.subr.bf16.mxu1 %v5956_v11 }
 0xad7   :  { %5312 = vmatprep.mubr.msk.f32.mxu1 %vm5957_vm0, %v5956_v11 }
 0xada   :  { %5313 = vmatmul.mubr.msk.f32.gmra.mxu1 %vm389_vm2, %v742_v40 }
 0xadb   :  { %5315 = vmatprep.mubr.msk.f32.mxu1 %vm5957_vm0, %v5956_v11 }
 0xade   :  { %5316 = vmatmul.mubr.msk.f32.gmra.mxu1 %vm389_vm2, %v743_v41 }
 0xadf   :  { %5331 = vmatprep.mubr.msk.bf16.mxu1 %vm5957_vm0, %v5956_v11 }
 0xb96   :  { %v1714_v29 = vpop.f32.mrf.mxu1 }
 0xb97   :  { %v1715_v4 = vadd.f32 1e-16, %v1714_v29 }
 0xb98   :  { %v5311_v1 = vpop.f32.mrf.mxu1 }
 0xb9a   :  { %v1719_v2 = vpop.f32.mrf.mxu1 }
 0xb9b   :  { %v1720_v3 = vadd.f32 1e-16, %v1719_v2 }
 0xb9c   :  { %v5314_v6 = vpop.f32.mrf.mxu1 }
 0xb9d   :  { %5789 = vrcp.f32 %v1720_v3 }
 0xb9e   :  { %v1724_v7 = vpop.f32.mrf.mxu1  ;;  %5791 = vrcp.f32 %v1715_v4 }
 0xb9f   :  { %v1725_v16 = vadd.f32 1e-16, %v1724_v7 }
 0xba0   :  { %v5317_v40 = vpop.f32.mrf.mxu1 }
 0xba1   :  { %5793 = vrcp.f32 %v1725_v16  ;;  %v5725_v16 = vld [vmem:[%s7060_s10] sm:$0x3f]   ;;  %s5959_s10 = smov 32  }
 0xba2   :  { %v5726_v40 = vld [vmem:[%s7061_s16] sm:$0x3f]   ;;  %s7089_s16 = sld [smem:[#allocation42_spill]] }
 0xbaa   :  { %v5790_v8 = vpop.eup %5789 }
 0xbab   :  { %v5792_v32 = vpop.eup %5791  ;;  %v1731_v10 = vmul.f32 %v5790_v8, %v5786_v62  ;;  %v5724_v62 = vld [vmem:[%s7058_s11] sm:$0xff]   ;;  %v5727_v8 = vld [vmem:[%s7062_s9 + $0x8] sm:$0xff]  }
 0xbac   :  { %v1729_v13 = vmul.f32 %v5792_v32, %v5788_v37  ;;  %v5728_v32 = vld [vmem:[%s7062_s9] sm:$0xff]   ;;  %s7090_s9 = sld [smem:[#allocation39_spill]] }
 0xbad   :  { %v1735_v19 = vmul.f32 %v1731_v10, %v6458_v9  ;;  %v5722_v9 = vld [vmem:[%s7056_s28] sm:$0xff]  }
 0xbae   :  { %v5794_v25 = vpop.eup %5793  ;;  %v1734_v20 = vmul.f32 %v1729_v13, %v6452_v0 }
 0xbaf   :  { %v1733_v41 = vmul.f32 %v5794_v25, %v5784_v34  ;;  %v5723_v34 = vld [vmem:[%s7058_s11 + $0x8] sm:$0xff]   ;;  %s7087_s11 = sld [smem:[#allocation55_spill]] }
 0xbb1   :  { %v1736_v12 = vmul.f32 %v6450_v46, %v1733_v41  ;;  %v5721_v46 = vld [vmem:[%s7056_s28 + $0x8] sm:$0xff]   ;;  %s7085_s28 = sld [smem:[#allocation38_spill]] }
 0xbb2   :  { %5328 = vmatpush3.bf16.msra.mxu1 %v5721_v46 }
 0xbb3   :  { %5318 = vmatprep.subr.mxu0 %v1736_v12  ;;  %5329 = vmatprep.subr.bf16.mxu1 %v5956_v11 }
 0xbb4   :  { %5319 = vmatpush3.msra.mxu0 %v1736_v12 }
 0xbb5   :  { %5320 = vmatprep.subr.mxu0 %v1735_v19 }
 0xbb6   :  { %5321 = vmatpush3.msra.mxu0 %v1735_v19  ;;  %5330 = vmatpush3.bf16.msra.mxu1 %v5722_v9 }
 0xbb7   :  { %5322 = vmatprep.subr.mxu0 %v1734_v20  ;;  %5350 = vmatprep.subr.bf16.mxu1 %v5956_v11 }
 0xbb8   :  { %5323 = vmatpush3.msra.mxu0 %v1734_v20 }
 0xbb9   :  { %5325 = vmatmul.mubr.msk.f32.vlgmr.msra.gmra.mxu0 %vm659_vm8, %v6351_v28  ;;  %5335 = vmatprep.subr.mxu0 %v5956_v11 }
 0xbba   :  { %5339 = vmatprep.mubr.msk.f32.mxu0 %vm5957_vm0, %v5956_v11 }
 0xc79   :  { %v5326_v0 = vpop.f32.mrf.mxu0 }
 0xc7a   :  { %v1809_v22 = vadd.f32 %v5326_v0, %v6399_v18 }
 0xc7b   :  { %v1803_v23 = vpop.f32.mrf.mxu0 }
 0xc7c   :  { %v1820_v24 = vadd.f32 %v4838_v21, %v1809_v22  ;;  %v1804_v28 = vadd.f32 %v1803_v23, %v6397_v14 }
 0xc7e   :  { %v1834_v27 = vmul.f32 %v1831_v26, %v1820_v24  ;;  %v1819_v31 = vadd.f32 %v4838_v21, %v1804_v28  ;;  %vm1822_vm15 = vcmp.ge.f32.partialorder %v1820_v24, 0.0 }
 0xc80   :  { %vm1821_vm1 = vcmp.ge.f32.partialorder %v1819_v31, 0.0  ;;  %v1833_v38 = vmul.f32 %v1831_v26, %v1819_v31  ;;  %v6512_v42 = vsel %vm1822_vm15, %v1820_v24, %v1834_v27  ;;  %v4856_v27 = vld [vmem:[%s7063_s26] ss:$0 sm:$0xff]  ;;  %s7091_s26 = sld [smem:[#allocation40_spill]] }
 0xc82   :  { %v6514_v43 = vsel %vm1821_vm1, %v1819_v31, %v1833_v38 }
 0xc83   :  { %v1841_v44 = vpack.c.bf16 %v6512_v42, %v6514_v43 }
 0xc85   :  { %5332 = vmatmul.mubr.msk.bf16.vlgmr.msra.gmra.mxu1 %vm543_vm5, %v1841_v44 }
 0xc86   :  { %5352 = vmatprep.mubr.msk.bf16.mxu1 %vm5957_vm0, %v5956_v11 }
 0xd45   :  { %v1898_v47 = vpop.f32.mrf.mxu1 }
 0xd46   :  { %v1899_v48 = vadd.f32 %v4840_v45, %v1898_v47 }
 0xd47   :  { %v5333_v49 = vpop.f32.mrf.mxu1 }
 0xd48   :  { %v1905_v50 = vsub.f32 0.0, %v1899_v48 }
 0xd49   :  { %v1901_v51 = vpop.f32.mrf.mxu1 }
 0xd4a   :  { %v1902_v52 = vadd.f32 %v4840_v45, %v1901_v51  ;;  %v1907_v53 = vmul.f32 1.442695, %v1905_v50 }
 0xd4b   :  { %v5334_v17 = vpop.f32.mrf.mxu1 }
 0xd4c   :  { %v1906_v5 = vsub.f32 0.0, %v1902_v52  ;;  %5795 = vpow2.f32 %v1907_v53 }
 0xd4e   :  { %v1909_v54 = vmul.f32 1.442695, %v1906_v5 }
 0xd50   :  { %5797 = vpow2.f32 %v1909_v54 }
 0xd59   :  { %v5796_v15 = vpop.eup %5795 }
 0xd5a   :  { %v1911_v57 = vadd.f32 1.0, %v5796_v15 }
 0xd5d   :  { %v5798_v55 = vpop.eup %5797 }
 0xd5e   :  { %v1912_v56 = vadd.f32 1.0, %v5798_v55 }
 0xd60   :  { %5799 = vrcp.f32 %v1912_v56  ;;  %v5729_v56 = vld [vmem:[%s7064_s27 + $0x8] sm:$0xff]  }
 0xd61   :  { %5801 = vrcp.f32 %v1911_v57 }
 0xd6d   :  { %v5800_v58 = vpop.eup %5799 }
 0xd6e   :  { %1922 = vperm.xlu0 %5706, %v5800_v58   ;;  %v5802_v59 = vpop.eup %5801  ;;  %v5730_v58 = vld [vmem:[%s7064_s27] sm:$0xff]   ;;  %s5960_s27 = smov [#allocation12]  }
 0xd72   :  { %1917 = vperm.xlu0 %5706, %v5802_v59   ;;  %v4859_v59 = vld [vmem:[#allocation10] ss:$0 sm:$0xff] }
 0xde9   :  { %v1923_v60 = vpop.permute.xlu0 %1922 }
 0xdea   :  { %v1926_v30 = vmul.f32 %v1923_v60, %v6512_v42 }
 0xdec   :  { %5336 = vmatpush3.msk.msra.mxu0 %vm753_vm9, %v1926_v30  ;;  %vm2328_vm9 = vcmask 1043456  }
 0xded   :  { %v1918_v33 = vpop.permute.xlu0 %1917  ;;  %5337 = vmatprep.subr.mxu0 %v5956_v11 }
 0xdee   :  { %v1925_v61 = vmul.f32 %v1918_v33, %v6514_v43 }
 0xdf0   :  { %5338 = vmatpush3.msra.mxu0 %v1925_v61 }
 0xdf1   :  { %5340 = vmatmul.mubr.msk.f32.vlgmr.msra.gmra.mxu0 %vm389_vm2, %v6438_v63  ;;  %5342 = vmatprep.subr.bf16.mxu0 %v5956_v11 }
 0xdf2   :  { %5343 = vmatpush3.bf16.msra.mxu0 %v5723_v34  ;;  %5346 = vmatprep.mubr.msk.bf16.mxu0 %vm5957_vm0, %v5956_v11 }
 0xdf3   :  { %5344 = vmatprep.subr.bf16.mxu0 %v5956_v11 }
 0xdf6   :  { %5345 = vmatpush3.bf16.msra.mxu0 %v5724_v62 }
 0xdf7   :  { %5356 = vmatprep.subr.bf16.mxu0 %v5956_v11 }
 0xdf9   :  { %5347 = vmatmul.mubr.msk.bf16.vlgmr.msra.gmra.mxu0 %vm543_vm5, %v1841_v44 }
 0xdfa   :  { %5358 = vmatprep.mubr.msk.bf16.mxu0 %vm5957_vm0, %v5956_v11 }
 0xeb1   :  { %v6537_v63 = vpop.f32.mrf.mxu0 }
 0xeb3   :  { %v5341_v37 = vpop.f32.mrf.mxu0 }
 0xeb9   :  { %v2087_v35 = vpop.f32.mrf.mxu0 }
 0xeba   :  { %v2088_v2 = vadd.f32 %v4846_v36, %v2087_v35 }
 0xebb   :  { %v5348_v29 = vpop.f32.mrf.mxu0 }
 0xebd   :  { %v2090_v1 = vpop.f32.mrf.mxu0 }
 0xebe   :  { %v2091_v3 = vadd.f32 %v4846_v36, %v2090_v1 }
 0xebf   :  { %v5349_v4 = vpop.f32.mrf.mxu0 }
 0xec0   :  { %v2096_v6 = vpack.c.bf16 %v2091_v3, %v2088_v2 }
 0xec2   :  { %v2108_v7 = vsel %vm396_vm3, %v2096_v6, 0 }
 0xec3   :  { %5351 = vmatpush3.bf16.msra.mxu1 %v2108_v7  ;;  %5357 = vmatpush3.bf16.msra.mxu0 %v2108_v7 }
 0xec4   :  { %5362 = vmatprep.subr.bf16.mxu1 %v5956_v11  ;;  %5370 = vmatprep.subr.mxu0 %v5956_v11 }
 0xec6   :  { %5353 = vmatmul.mubr.msk.bf16.vlgmr.msra.gmra.mxu1 %vm389_vm2, %v5725_v16  ;;  %5359 = vmatmul.mubr.msk.bf16.vlgmr.msra.gmra.mxu0 %vm389_vm2, %v5726_v40 }
 0xec7   :  { %5366 = vmatprep.mubr.msk.bf16.mxu1 %vm5957_vm0, %v5956_v11  ;;  %5374 = vmatprep.mubr.msk.f32.mxu0 %vm5957_vm0, %v5956_v11 }
 0xec8   :  { %5363 = vmatpush3.bf16.msra.mxu1 %v5727_v8 }
 0xec9   :  { %5364 = vmatprep.subr.bf16.mxu1 %v5956_v11 }
 0xecc   :  { %5365 = vmatpush3.bf16.msra.mxu1 %v5728_v32 }
 0xecd   :  { %5377 = vmatprep.subr.bf16.mxu1 %v5956_v11 }
 0xf86   :  { %v2144_v25 = vpop.f32.mrf.mxu1  ;;  %v2193_v41 = vpop.f32.mrf.mxu0 }
 0xf87   :  { %v2194_v10 = vadd.f32 %v2193_v41, %v2144_v25 }
 0xf88   :  { %v5354_v12 = vpop.f32.mrf.mxu1  ;;  %v5360_v13 = vpop.f32.mrf.mxu0 }
 0xf89   :  { %v2202_v19 = vmin.f32 %v2194_v10, 0.0  ;;  %vm2200_vm2 = vcmp.gt.f32.partialorder %v2194_v10, 0.0 }
 0xf8a   :  { %v2147_v20 = vpop.f32.mrf.mxu1  ;;  %v2196_v46 = vpop.f32.mrf.mxu0 }
 0xf8b   :  { %v2204_v9 = vmul.f32 1.442695, %v2202_v19  ;;  %v2197_v0 = vadd.f32 %v2196_v46, %v2147_v20  ;;  %v6577_v46 = vld [vmem:[%s7065_s30] sm:$0x3]  ;;  %s4713_s30 = sshll.u32 %s5960_s27, 4  ;;  %s4714_s30 = int_to_ptr.vmem [resolvable:$true] %s4713_s30 }
 0xf8c   :  { %v5355_v21 = vpop.f32.mrf.mxu1  ;;  %v5361_v22 = vpop.f32.mrf.mxu0  ;;  %p5878_p1 = scmp.lt.s32.totalorder %s4714_s30, %s4714_s30 }
 0xf8d   :  { %5803 = vpow2.f32 %v2204_v9  ;;  %v2203_v23 = vmin.f32 %v2197_v0, 0.0  ;;  %vm2201_vm3 = vcmp.gt.f32.partialorder %v2197_v0, 0.0  ;;  %v5731_v9 = vld [vmem:[%s7066_s6 + $0x8] sm:$0xff]   ;;  %v6589_v21 = vld [vmem:[%s7067_s2] sm:$0xff]  }
 0xf8e   :  { %v6592_v22 = vld [vmem:[%s7067_s2 + $0x8] ss:$0 sps:$4 sm:$0xff]  }
 0xf8f   :  { %v2206_v24 = vmul.f32 1.442695, %v2203_v23  ;;  %v6599_v23 = vld [vmem:[%s6167_s18 + $0x18] sm:$0xff] }
 0xf91   :  { %5805 = vpow2.f32 %v2206_v24  ;;  %v6605_v24 = vld [vmem:[%s7068_s7] sm:$0xff]  }
 0xf9a   :  { %v5804_v28 = vpop.eup %5803 }
 0xf9b   :  { %v4854_v26 = vadd.f32 -1.0, %v5804_v28  ;;  %v6609_v28 = vld [vmem:[%s6167_s18 + $0x10] sm:$0xff] }
 0xf9d   :  { %v2210_v31 = vsel %vm2200_vm2, %v2194_v10, %v4854_v26  ;;  %v4892_v10 = vld [vmem:[#allocation7] ss:$0 sm:$0xff]  ;;  %v6616_v26 = vld [vmem:[%s6167_s18 + $0x8] sm:$0xff] }
 0xf9e   :  { %v5806_v38 = vpop.eup %5805  ;;  %v2219_v44 = vmul.f32 %v4856_v27, %v2210_v31 }
 0xf9f   :  { %v4855_v45 = vadd.f32 -1.0, %v5806_v38 }
 0xfa0   :  { %v2223_v47 = vmin.f32 %v2219_v44, 0.0  ;;  %vm2221_vm4 = vcmp.gt.f32.partialorder %v2219_v44, 0.0 }
 0xfa1   :  { %v2211_v48 = vsel %vm2201_vm3, %v2197_v0, %v4855_v45  ;;  %v5732_v0 = vld [vmem:[%s7066_s6] sm:$0xff]   ;;  %s5873_s6 = scalar_lea.vmem %s4714_s30, 32 }
 0xfa2   :  { %v2225_v49 = vmul.f32 1.442695, %v2223_v47  ;;  %v2220_v50 = vmul.f32 %v4856_v27, %v2211_v48  ;;  %v6621_v27 = vld [vmem:[%s6167_s18] sm:$0xff]  ;;  %v6627_v48 = vld [vmem:[%s7068_s7 + $0x8] sm:$0xf]  ;;  %s7069_s18 = sld [smem:[#allocation21_spill]]  ;;  %p5874_p0 = scmp.ne.s32.totalorder %s4714_s30, %s5873_s6 }
 0xfa3   :  { %p5879_p2 = scmp.lt.s32.totalorder %s5873_s6, %s5873_s6 }
 0xfa4   :  { %5807 = vpow2.f32 %v2225_v49  ;;  %v2224_v51 = vmin.f32 %v2220_v50, 0.0  ;;  %vm2222_vm6 = vcmp.gt.f32.partialorder %v2220_v50, 0.0 }
 0xfa5   :  { %p5880_p3 = por %p5879_p2, %p5878_p1 }
 0xfa6   :  { %v2227_v52 = vmul.f32 1.442695, %v2224_v51 }
 0xfa7   :  { %p5881_p4 = pnand %p5880_p3, %p5874_p0 }
 0xfa8   :  { %5809 = vpow2.f32 %v2227_v52  ;;  %v6633_v52 = vcombine.low %v6627_v48, %v6627_v48 }
 0xfb1   :  { %v5808_v53 = vpop.eup %5807 }
 0xfb2   :  { %v4857_v17 = vadd.f32 -1.0, %v5808_v53 }
 0xfb4   :  { %v6556_v15 = vsel %vm2221_vm4, %v2219_v44, %v4857_v17 }
 0xfb5   :  { %v5810_v5 = vpop.eup %5809 }
 0xfb6   :  { %v4858_v54 = vadd.f32 -1.0, %v5810_v5 }
 0xfb8   :  { %v6558_v55 = vsel %vm2222_vm6, %v2220_v50, %v4858_v54 }
 0xfb9   :  { %v2237_v57 = vpack.c.bf16 %v6558_v55, %v6556_v15 }
 0xfbb   :  { %5367 = vmatmul.mubr.msk.bf16.vlgmr.msra.gmra.mxu1 %vm543_vm5, %v2237_v57 }
 0xfbc   :  { %5378 = vmatpush3.bf16.msra.mxu1 %v5729_v56  ;;  %5381 = vmatprep.mubr.msk.bf16.mxu1 %vm5957_vm0, %v5956_v11 }
 0xfbd   :  { %5379 = vmatprep.subr.bf16.mxu1 %v5956_v11 }
 0xfc0   :  { %5380 = vmatpush3.bf16.msra.mxu1 %v5730_v58 }
 0xfc3   :  { %5382 = vmatmul.mubr.msk.bf16.vlgmr.msra.gmra.mxu1 %vm543_vm5, %v2237_v57 }
 0xfc4   :  { %5395 = vmatprep.mubr.msk.bf16.mxu1 %vm2324_vm10, %v6589_v21 }
0x107b   :  { %v2294_v60 = vpop.f32.mrf.mxu1 }
0x107c   :  { %v2295_v30 = vadd.f32 %v4859_v59, %v2294_v60 }
0x107d   :  { %v5368_v33 = vpop.f32.mrf.mxu1 }
0x107e   :  { %v2301_v61 = vsub.f32 0.0, %v2295_v30 }
0x107f   :  { %v2297_v34 = vpop.f32.mrf.mxu1 }
0x1080   :  { %v2298_v62 = vadd.f32 %v4859_v59, %v2297_v34  ;;  %v2303_v37 = vmul.f32 1.442695, %v2301_v61  ;;  %v4879_v61 = vld [vmem:[%s7069_s18] ss:$0 sm:$0xff] }
0x1081   :  { %v5369_v35 = vpop.f32.mrf.mxu1 }
0x1082   :  { %v2302_v36 = vsub.f32 0.0, %v2298_v62  ;;  %5811 = vpow2.f32 %v2303_v37 }
0x1083   :  { %v2507_v29 = vpop.f32.mrf.mxu1 }
0x1084   :  { %v2305_v1 = vmul.f32 1.442695, %v2302_v36 }
0x1085   :  { %v5383_v2 = vpop.f32.mrf.mxu1 }
0x1086   :  { %5813 = vpow2.f32 %v2305_v1 }
0x1087   :  { %v2510_v3 = vpop.f32.mrf.mxu1 }
0x1088   :  { %v2574_v4 = vpack.c.bf16 %v2510_v3, %v2507_v29 }
0x1089   :  { %v5384_v6 = vpop.f32.mrf.mxu1 }
0x108a   :  { %v2591_v7 = vsel %vm2589_vm7, %v2574_v4, 0  ;;  %5628 = vmatprep.subr.msk.bf16.mxu1 %vm2589_vm7, %v2574_v4 }
0x108b   :  { %5394 = vmatpush3.bf16.msra.mxu1 %v2591_v7 }
0x108c   :  { %5405 = vmatprep.subr.mxu1 %v5956_v11 }
0x108e   :  { %5396 = vmatmul.mubr.msk.bf16.vlgmr.msra.gmra.mxu1 %vm2324_vm10, %v6592_v22 }
0x108f   :  { %v5812_v16 = vpop.eup %5811  ;;  %5406 = vmatpush3.msra.mxu1 %v6599_v23  ;;  %5413 = vmatprep.mubr.msk.f32.mxu1 %vm5957_vm0, %v5956_v11 }
0x1090   :  { %v2307_v32 = vadd.f32 1.0, %v5812_v16  ;;  %5407 = vmatprep.subr.mxu1 %v5956_v11 }
0x1091   :  { %5408 = vmatpush3.msra.mxu1 %v6609_v28 }
0x1092   :  { %5409 = vmatprep.subr.mxu1 %v5956_v11 }
0x1093   :  { %v5814_v40 = vpop.eup %5813  ;;  %5410 = vmatpush3.msra.mxu1 %v6616_v26 }
0x1094   :  { %v2308_v8 = vadd.f32 1.0, %v5814_v40  ;;  %5411 = vmatprep.subr.mxu1 %v5956_v11 }
0x1095   :  { %5412 = vmatpush3.msra.mxu1 %v6621_v27 }
0x1096   :  { %5815 = vrcp.f32 %v2308_v8 }
0x1097   :  { %5817 = vrcp.f32 %v2307_v32 }
0x10a3   :  { %v5816_v25 = vpop.eup %5815 }
0x10a4   :  { %2319 = vperm.xlu0 %5706, %v5816_v25   ;;  %v5818_v41 = vpop.eup %5817 }
0x10a8   :  { %2314 = vperm.xlu0 %5706, %v5818_v41  }
0x10ac   :  { %3125 = vperm.xlu0 %5706, %v4892_v10  }
0x111f   :  { %v2320_v12 = vpop.permute.xlu0 %2319 }
0x1120   :  { %v2323_v13 = vmul.f32 %v2320_v12, %v6558_v55 }
0x1122   :  { %5371 = vmatpush3.msk.msra.mxu0 %vm2328_vm9, %v2323_v13  ;;  %v4922_v13 = vld [vmem:[#allocation9] ss:$0 sm:$0xff] }
0x1123   :  { %v2315_v19 = vpop.permute.xlu0 %2314  ;;  %5372 = vmatprep.subr.mxu0 %v5956_v11 }
0x1124   :  { %v2322_v20 = vmul.f32 %v2315_v19, %v6556_v15  ;;  %v6658_v19 = vld [vmem:[%s7070_s15] sm:$0xff] }
0x1126   :  { %5373 = vmatpush3.msra.mxu0 %v2322_v20 }
0x1127   :  { %5375 = vmatmul.mubr.msk.f32.vlgmr.msra.gmra.mxu0 %vm2324_vm10, %v6577_v46  ;;  %5385 = vmatprep.subr.bf16.mxu0 %v5956_v11 }
0x1128   :  { %5386 = vmatpush3.bf16.msra.mxu0 %v5731_v9  ;;  %5389 = vmatprep.mubr.msk.bf16.mxu0 %vm5957_vm0, %v5956_v11 }
0x1129   :  { %5387 = vmatprep.subr.bf16.mxu0 %v5956_v11 }
0x112c   :  { %5388 = vmatpush3.bf16.msra.mxu0 %v5732_v0 }
0x112f   :  { %5390 = vmatmul.mubr.msk.bf16.vlgmr.msra.gmra.mxu0 %vm543_vm5, %v2237_v57 }
0x1130   :  { %5401 = vmatprep.mubr.msk.bf16.mxu0 %vm2324_vm10, %v6605_v24 }
0x114e   :  { %v6637_v53 = vpop.f32.mrf.mxu1 }
0x1150   :  { %v6639_v17 = vpop.f32.mrf.mxu1 }
0x1152   :  { %v5398_v5 = vpop.f32.mrf.mxu1 }
0x1154   :  { %v6643_v30 = vpop.f32.mrf.mxu1 }
0x11e7   :  { %v6624_v31 = vpop.f32.mrf.mxu0 }
0x11e9   :  { %v5376_v38 = vpop.f32.mrf.mxu0 }
0x11ef   :  { %v2564_v44 = vpop.f32.mrf.mxu0 }
0x11f1   :  { %v5391_v45 = vpop.f32.mrf.mxu0 }
0x11f3   :  { %v2567_v47 = vpop.f32.mrf.mxu0 }
0x11f4   :  { %v2644_v49 = vpack.c.bf16 %v2567_v47, %v2564_v44 }
0x11f5   :  { %v5392_v50 = vpop.f32.mrf.mxu0 }
0x11f6   :  { %v2660_v51 = vsel %vm2589_vm7, %v2644_v49, 0  ;;  %5629 = vmatprep.subr.msk.bf16.mxu0 %vm2589_vm7, %v2644_v49 }
0x11f7   :  { %5400 = vmatpush3.bf16.msra.mxu0 %v2660_v51 }
0x11fa   :  { %5402 = vmatmul.mubr.msk.bf16.vlgmr.msra.gmra.mxu0 %vm2324_vm10, %v6633_v52 }
0x11fb   :  { %5428 = vmatprep.mubr.msk.f32.mxu0 %vm659_vm8, %v6658_v19 }
0x12ba   :  { %v5403_v54 = vpop.f32.mrf.mxu0 }
0x12bb   :  { %v2712_v59 = vadd.f32 %v5403_v54, %v6637_v53 }
0x12bc   :  { %v2696_v56 = vpop.f32.mrf.mxu0 }
0x12bd   :  { %v2710_v57 = vadd.f32 %v2696_v56, %v6639_v17  ;;  %v2718_v35 = vmul.f32 0.2, %v2712_v59  ;;  %vm2715_vm13 = vcmp.ge.f32.partialorder %v2712_v59, 0.0 }
0x12be   :  { %v5404_v58 = vpop.f32.mrf.mxu0 }
0x12bf   :  { %vm2713_vm11 = vcmp.ge.f32.partialorder %v2710_v57, 0.0  ;;  %v2716_v60 = vmul.f32 0.2, %v2710_v57  ;;  %v2721_v2 = vsel %vm2715_vm13, %v2712_v59, %v2718_v35  ;;  %v2930_v35 = vunpack.c.l.bf16 %v6627_v48 }
0x12c0   :  { %v2699_v33 = vpop.f32.mrf.mxu0  ;;  %v2731_v3 = vmul.f32 %v4879_v61, %v2721_v2  ;;  %vm4705_vm13 = vcmask 9216  }
0x12c1   :  { %v2719_v34 = vsel %vm2713_vm11, %v2710_v57, %v2716_v60  ;;  %v2711_v62 = vadd.f32 %v2699_v33, %v6643_v30  ;;  %v6665_v33 = vld [vmem:[%s7070_s15 + $0x8] sm:$0xf]  ;;  %vm1211_vm11 = vcmask 1041409  }
0x12c2   :  { %v2729_v37 = vmul.f32 %v4879_v61, %v2719_v34 }
0x12c3   :  { %vm2714_vm12 = vcmp.ge.f32.partialorder %v2711_v62, 0.0  ;;  %v2717_v36 = vmul.f32 0.2, %v2711_v62 }
0x12c4   :  { %5414 = vmatmul.mubr.msk.f32.vlgmr.msra.gmra.mxu1 %vm543_vm5, %v2729_v37  ;;  %v2929_v37 = vunpack.c.h.bf16 %v6605_v24 }
0x12c5   :  { %v2720_v29 = vsel %vm2714_vm12, %v2711_v62, %v2717_v36  ;;  %5416 = vmatprep.mubr.msk.f32.mxu1 %vm5957_vm0, %v5956_v11  ;;  %vm4543_vm12 = vcmask 523264  }
0x12c6   :  { %v2730_v1 = vmul.f32 %v4879_v61, %v2720_v29  ;;  %v2928_v61 = vunpack.c.l.bf16 %v6605_v24 }
0x12c8   :  { %5417 = vmatmul.mubr.msk.f32.gmra.mxu1 %vm543_vm5, %v2730_v1 }
0x12c9   :  { %5419 = vmatprep.mubr.msk.f32.mxu1 %vm5957_vm0, %v5956_v11 }
0x12cc   :  { %5420 = vmatmul.mubr.msk.f32.gmra.mxu1 %vm543_vm5, %v2731_v3 }
0x12cd   :  { %5450 = vmatprep.mubr.msk.f32.mxu1 %vm659_vm8, %v6658_v19 }
0x1384   :  { %v2807_v4 = vpop.f32.mrf.mxu1 }
0x1385   :  { %v2821_v8 = vsel %vm543_vm5, %v2807_v4, -inf }
0x1386   :  { %v5415_v6 = vpop.f32.mrf.mxu1 }
0x1388   :  { %v2812_v7 = vpop.f32.mrf.mxu1 }
0x1389   :  { %v2822_v16 = vsel %vm543_vm5, %v2812_v7, -inf }
0x138a   :  { %v5418_v40 = vpop.f32.mrf.mxu1  ;;  %v2824_v32 = vmax.f32 %v2821_v8, %v2822_v16 }
0x138c   :  { %v2817_v25 = vpop.f32.mrf.mxu1 }
0x138d   :  { %v2823_v41 = vsel %vm543_vm5, %v2817_v25, -inf }
0x138e   :  { %v5421_v10 = vpop.f32.mrf.mxu1  ;;  %v2825_v12 = vmax.f32 %v2824_v32, %v2823_v41 }
0x1390   :  { %2826 = vmax.xlane.f32.xlu1 %v2825_v12 }
0x13a1   :  { %3938 = vperm.xlu1 %5707, %v4922_v13  }
0x1419   :  { %v2827_v20 = vpop.xlane.xlu1 %2826 }
0x141a   :  { %v2828_v9 = vrot.slane %v2827_v20, 4 }
0x141c   :  { %v2829_v0 = vmax.f32 %v2827_v20, %v2828_v9  ;;  %v4891_v9 = vld [vmem:[%s7072_s1] ss:$0 sm:$0xff] }
0x141e   :  { %v2830_v38 = vrot.slane %v2829_v0, 2 }
0x1420   :  { %v2831_v44 = vmax.f32 %v2829_v0, %v2830_v38 }
0x1422   :  { %v2832_v45 = vrot.slane %v2831_v44, 1 }
0x1424   :  { %v2833_v47 = vmax.f32 %v2831_v44, %v2832_v45 }
0x1426   :  { %5636 = vpush %v2833_v47  ;;  %v3126_v47 = vpop.permute.xlu0 %3125 }
0x1457   :  { %s5637_s3 = spop %5636 }
0x1458   :  { %v2835_v49 = vstv %s5637_s3 }
0x1459   :  { %v2837_v50 = vsub.f32 %v2812_v7, %v2835_v49  ;;  %v2838_v51 = vsub.f32 %v2817_v25, %v2835_v49  ;;  %v2836_v5 = vsub.f32 %v2807_v4, %v2835_v49 }
0x145b   :  { %v2843_v54 = vmul.f32 1.442695, %v2838_v51  ;;  %v2841_v56 = vmul.f32 1.442695, %v2837_v50  ;;  %v2839_v57 = vmul.f32 1.442695, %v2836_v5 }
0x145d   :  { %5819 = vpow2.f32 %v2843_v54 }
0x145e   :  { %5821 = vpow2.f32 %v2841_v56  ;;  %v5739_v56 = vld [vmem:[%s7073_s12 + $0x8] sm:$0xff]  }
0x145f   :  { %5823 = vpow2.f32 %v2839_v57 }
0x146a   :  { %v5820_v58 = vpop.eup %5819 }
0x146b   :  { %5422 = vmatprep.subr.mxu0 %v5820_v58  ;;  %v5822_v59 = vpop.eup %5821 }
0x146c   :  { %5423 = vmatpush3.msra.mxu0 %v5820_v58  ;;  %v5824_v60 = vpop.eup %5823 }
0x146d   :  { %5424 = vmatprep.subr.mxu0 %v5822_v59 }
0x146e   :  { %5425 = vmatpush3.msra.mxu0 %v5822_v59 }
0x146f   :  { %5426 = vmatprep.subr.mxu0 %v5824_v60 }
0x1470   :  { %5427 = vmatpush3.msra.mxu0 %v5824_v60 }
0x1471   :  { %5429 = vmatmul.mubr.msk.f32.vlgmr.msra.gmra.mxu0 %vm659_vm8, %v6665_v33  ;;  %5431 = vmatprep.subr.mxu0 %v5956_v11 }
0x1472   :  { %5435 = vmatprep.mubr.msk.f32.mxu0 %vm5957_vm0, %v5956_v11 }
0x1531   :  { %v5430_v34 = vpop.f32.mrf.mxu0 }
0x1532   :  { %5432 = vmatpush3.msk.msra.mxu0 %vm2328_vm9, %v5430_v34 }
0x1533   :  { %v2919_v62 = vpop.f32.mrf.mxu0  ;;  %5433 = vmatprep.subr.mxu0 %v5956_v11 }
0x1534   :  { %5434 = vmatpush3.msra.mxu0 %v2919_v62 }
0x1535   :  { %5436 = vmatmul.mubr.msk.f32.vlgmr.msra.gmra.mxu0 %vm2324_vm10, %v2928_v61  ;;  %5461 = vmatprep.subr.mxu0 %v5956_v11 }
0x1536   :  { %5438 = vmatprep.mubr.msk.f32.mxu0 %vm5957_vm0, %v5956_v11 }
0x1539   :  { %5439 = vmatmul.mubr.msk.f32.gmra.mxu0 %vm2324_vm10, %v2929_v37 }
0x153a   :  { %5441 = vmatprep.mubr.msk.f32.mxu0 %vm5957_vm0, %v5956_v11 }
0x153d   :  { %5442 = vmatmul.mubr.msk.f32.gmra.mxu0 %vm2324_vm10, %v2930_v35 }
0x153e   :  { %5465 = vmatprep.mubr.msk.f32.mxu0 %vm5957_vm0, %v5956_v11 }
0x15f5   :  { %v3009_v36 = vpop.f32.mrf.mxu0 }
0x15f6   :  { %v3010_v3 = vadd.f32 1e-16, %v3009_v36 }
0x15f7   :  { %v5437_v29 = vpop.f32.mrf.mxu0 }
0x15f9   :  { %v3014_v1 = vpop.f32.mrf.mxu0 }
0x15fa   :  { %v3015_v2 = vadd.f32 1e-16, %v3014_v1 }
0x15fb   :  { %v5440_v4 = vpop.f32.mrf.mxu0 }
0x15fc   :  { %5825 = vrcp.f32 %v3015_v2 }
0x15fd   :  { %v3019_v6 = vpop.f32.mrf.mxu0  ;;  %5827 = vrcp.f32 %v3010_v3 }
0x15fe   :  { %v3020_v7 = vadd.f32 1e-16, %v3019_v6 }
0x15ff   :  { %v5443_v16 = vpop.f32.mrf.mxu0 }
0x1600   :  { %5829 = vrcp.f32 %v3020_v7 }
0x1609   :  { %v5826_v40 = vpop.eup %5825 }
0x160a   :  { %v5828_v8 = vpop.eup %5827  ;;  %v3026_v41 = vmul.f32 %v5826_v40, %v5822_v59  ;;  %v4893_v59 = vld [vmem:[#allocation6] ss:$0 sm:$0xff] }
0x160b   :  { %v3024_v12 = vmul.f32 %v5828_v8, %v5824_v60 }
0x160c   :  { %v3030_v13 = vmul.f32 %v3026_v41, %v6643_v30  ;;  %v5738_v30 = vld [vmem:[%s7071_s14] sm:$0xff]  }
0x160d   :  { %v5830_v32 = vpop.eup %5829  ;;  %v3029_v20 = vmul.f32 %v3024_v12, %v6639_v17 }
0x160e   :  { %v3028_v25 = vmul.f32 %v5830_v32, %v5820_v58  ;;  %v5740_v58 = vld [vmem:[%s7073_s12] sm:$0xff]  }
0x1610   :  { %v3031_v10 = vmul.f32 %v6637_v53, %v3028_v25  ;;  %v5737_v53 = vld [vmem:[%s7071_s14 + $0x8] sm:$0xff]  }
0x1612   :  { %5444 = vmatprep.subr.mxu1 %v3031_v10 }
0x1613   :  { %5445 = vmatpush3.msra.mxu1 %v3031_v10 }
0x1614   :  { %5446 = vmatprep.subr.mxu1 %v3030_v13 }
0x1615   :  { %5447 = vmatpush3.msra.mxu1 %v3030_v13 }
0x1616   :  { %5448 = vmatprep.subr.mxu1 %v3029_v20 }
0x1617   :  { %5449 = vmatpush3.msra.mxu1 %v3029_v20 }
0x1618   :  { %5451 = vmatmul.mubr.msk.f32.vlgmr.msra.gmra.mxu1 %vm659_vm8, %v6665_v33  ;;  %5453 = vmatprep.subr.bf16.mxu1 %v5956_v11 }
0x1619   :  { %5457 = vmatprep.mubr.msk.bf16.mxu1 %vm5957_vm0, %v5956_v11  ;;  %5454 = vmatpush3.bf16.msra.mxu1 %v5737_v53  ;;  %v5741_v53 = vld [vmem:[%s7074_s20 + $0x8] sm:$0xff]  }
0x161a   :  { %5455 = vmatprep.subr.bf16.mxu1 %v5956_v11 }
0x161d   :  { %5456 = vmatpush3.bf16.msra.mxu1 %v5738_v30 }
0x161e   :  { %5468 = vmatprep.subr.bf16.mxu1 %v5956_v11 }
0x16d8   :  { %v5452_v17 = vpop.f32.mrf.mxu1 }
0x16d9   :  { %v3104_v0 = vadd.f32 %v5452_v17, %v6558_v55 }
0x16da   :  { %v3098_v38 = vpop.f32.mrf.mxu1 }
0x16db   :  { %v3115_v44 = vadd.f32 %v4891_v9, %v3104_v0  ;;  %v3099_v45 = vadd.f32 %v3098_v38, %v6556_v15 }
0x16dd   :  { %v3129_v49 = vmul.f32 %v3126_v47, %v3115_v44  ;;  %v3114_v50 = vadd.f32 %v4891_v9, %v3099_v45  ;;  %vm3117_vm14 = vcmp.ge.f32.partialorder %v3115_v44, 0.0 }
0x16df   :  { %vm3116_vm15 = vcmp.ge.f32.partialorder %v3114_v50, 0.0  ;;  %v3128_v51 = vmul.f32 %v3126_v47, %v3114_v50  ;;  %v6708_v5 = vsel %vm3117_vm14, %v3115_v44, %v3129_v49 }
0x16e1   :  { %v6710_v54 = vsel %vm3116_vm15, %v3114_v50, %v3128_v51 }
0x16e2   :  { %v6715_v57 = vpack.c.bf16 %v6708_v5, %v6710_v54 }
0x16e4   :  { %5458 = vmatmul.mubr.msk.bf16.vlgmr.msra.gmra.mxu1 %vm543_vm5, %v6715_v57 }
0x16e5   :  { %5469 = vmatpush3.bf16.msra.mxu1 %v5739_v56  ;;  %5472 = vmatprep.mubr.msk.bf16.mxu1 %vm5957_vm0, %v5956_v11 }
0x16e6   :  { %5470 = vmatprep.subr.bf16.mxu1 %v5956_v11 }
0x16e9   :  { %5471 = vmatpush3.bf16.msra.mxu1 %v5740_v58 }
0x16ec   :  { %5473 = vmatmul.mubr.msk.bf16.vlgmr.msra.gmra.mxu1 %vm543_vm5, %v6715_v57 }
0x16ed   :  { %5486 = vmatprep.mubr.msk.bf16.mxu1 %vm2324_vm10, %v6589_v21 }
0x17a4   :  { %v3193_v60 = vpop.f32.mrf.mxu1 }
0x17a5   :  { %v3194_v34 = vadd.f32 %v4893_v59, %v3193_v60 }
0x17a6   :  { %v5459_v62 = vpop.f32.mrf.mxu1 }
0x17a7   :  { %v3200_v36 = vsub.f32 0.0, %v3194_v34 }
0x17a8   :  { %v3196_v29 = vpop.f32.mrf.mxu1 }
0x17a9   :  { %v3197_v1 = vadd.f32 %v4893_v59, %v3196_v29  ;;  %v3202_v2 = vmul.f32 1.442695, %v3200_v36  ;;  %v4909_v29 = vld [vmem:[%s7075_s8] ss:$0 sm:$0xff] }
0x17aa   :  { %v5460_v3 = vpop.f32.mrf.mxu1 }
0x17ab   :  { %v3201_v4 = vsub.f32 0.0, %v3197_v1  ;;  %5831 = vpow2.f32 %v3202_v2 }
0x17ac   :  { %v3375_v6 = vpop.f32.mrf.mxu1 }
0x17ad   :  { %v3204_v7 = vmul.f32 1.442695, %v3201_v4 }
0x17ae   :  { %v5474_v16 = vpop.f32.mrf.mxu1 }
0x17af   :  { %5833 = vpow2.f32 %v3204_v7 }
0x17b0   :  { %v3378_v40 = vpop.f32.mrf.mxu1 }
0x17b1   :  { %v3439_v8 = vpack.c.bf16 %v3378_v40, %v3375_v6 }
0x17b2   :  { %v5475_v32 = vpop.f32.mrf.mxu1 }
0x17b3   :  { %v3441_v21 = vsel %vm2589_vm7, %v3439_v8, 0  ;;  %5630 = vmatprep.subr.msk.bf16.mxu1 %vm2589_vm7, %v3439_v8 }
0x17b4   :  { %5485 = vmatpush3.bf16.msra.mxu1 %v3441_v21 }
0x17b5   :  { %5496 = vmatprep.subr.mxu1 %v5956_v11 }
0x17b7   :  { %5487 = vmatmul.mubr.msk.bf16.vlgmr.msra.gmra.mxu1 %vm2324_vm10, %v6592_v22 }
0x17b8   :  { %5497 = vmatpush3.msra.mxu1 %v6599_v23  ;;  %5504 = vmatprep.mubr.msk.f32.mxu1 %vm5957_vm0, %v5956_v11  ;;  %v5832_v25 = vpop.eup %5831 }
0x17b9   :  { %5498 = vmatprep.subr.mxu1 %v5956_v11  ;;  %v3206_v22 = vadd.f32 1.0, %v5832_v25 }
0x17ba   :  { %5499 = vmatpush3.msra.mxu1 %v6609_v28 }
0x17bb   :  { %5500 = vmatprep.subr.mxu1 %v5956_v11 }
0x17bc   :  { %v5834_v41 = vpop.eup %5833  ;;  %5501 = vmatpush3.msra.mxu1 %v6616_v26 }
0x17bd   :  { %v3207_v10 = vadd.f32 1.0, %v5834_v41  ;;  %5502 = vmatprep.subr.mxu1 %v5956_v11 }
0x17be   :  { %5503 = vmatpush3.msra.mxu1 %v6621_v27  ;;  %v5742_v27 = vld [vmem:[%s7074_s20] sm:$0xff]  }
0x17bf   :  { %5835 = vrcp.f32 %v3207_v10 }
0x17c0   :  { %5837 = vrcp.f32 %v3206_v22 }
0x17cc   :  { %v5836_v23 = vpop.eup %5835 }
0x17cd   :  { %3217 = vperm.xlu0 %5706, %v5836_v23   ;;  %v5838_v12 = vpop.eup %5837 }
0x17d1   :  { %3212 = vperm.xlu0 %5706, %v5838_v12  }
0x1848   :  { %v3218_v28 = vpop.permute.xlu0 %3217 }
0x1849   :  { %v3221_v13 = vmul.f32 %v3218_v28, %v6708_v5 }
0x184b   :  { %5462 = vmatpush3.msk.msra.mxu0 %vm2328_vm9, %v3221_v13 }
0x184c   :  { %v3213_v26 = vpop.permute.xlu0 %3212  ;;  %5463 = vmatprep.subr.mxu0 %v5956_v11 }
0x184d   :  { %v3220_v20 = vmul.f32 %v3213_v26, %v6710_v54 }
0x184f   :  { %5464 = vmatpush3.msra.mxu0 %v3220_v20 }
0x1850   :  { %5466 = vmatmul.mubr.msk.f32.vlgmr.msra.gmra.mxu0 %vm2324_vm10, %v6577_v46  ;;  %5476 = vmatprep.subr.bf16.mxu0 %v5956_v11 }
0x1851   :  { %5477 = vmatpush3.bf16.msra.mxu0 %v5741_v53  ;;  %5480 = vmatprep.mubr.msk.bf16.mxu0 %vm5957_vm0, %v5956_v11 }
0x1852   :  { %5478 = vmatprep.subr.bf16.mxu0 %v5956_v11 }
0x1855   :  { %5479 = vmatpush3.bf16.msra.mxu0 %v5742_v27 }
0x1858   :  { %5481 = vmatmul.mubr.msk.bf16.vlgmr.msra.gmra.mxu0 %vm543_vm5, %v6715_v57 }
0x1859   :  { %5492 = vmatprep.mubr.msk.bf16.mxu0 %vm2324_vm10, %v6605_v24 }
0x1877   :  { %v6757_v30 = vpop.f32.mrf.mxu1 }
0x1879   :  { %v6759_v17 = vpop.f32.mrf.mxu1 }
0x187b   :  { %v5489_v9 = vpop.f32.mrf.mxu1 }
0x187d   :  { %v6771_v62 = vpop.f32.mrf.mxu1 }
0x1910   :  { %v6761_v0 = vpop.f32.mrf.mxu0 }
0x1912   :  { %v5467_v38 = vpop.f32.mrf.mxu0 }
0x1918   :  { %v3432_v44 = vpop.f32.mrf.mxu0 }
0x191a   :  { %v5482_v45 = vpop.f32.mrf.mxu0 }
0x191c   :  { %v3435_v47 = vpop.f32.mrf.mxu0 }
0x191d   :  { %v3491_v49 = vpack.c.bf16 %v3435_v47, %v3432_v44 }
0x191e   :  { %v5483_v50 = vpop.f32.mrf.mxu0 }
0x191f   :  { %v3493_v51 = vsel %vm2589_vm7, %v3491_v49, 0  ;;  %5631 = vmatprep.subr.msk.bf16.mxu0 %vm2589_vm7, %v3491_v49 }
0x1920   :  { %5491 = vmatpush3.bf16.msra.mxu0 %v3493_v51 }
0x1923   :  { %5493 = vmatmul.mubr.msk.bf16.vlgmr.msra.gmra.mxu0 %vm2324_vm10, %v6633_v52 }
0x1924   :  { %5519 = vmatprep.mubr.msk.f32.mxu0 %vm659_vm8, %v6658_v19 }
0x19e3   :  { %v5494_v56 = vpop.f32.mrf.mxu0 }
0x19e4   :  { %v3545_v60 = vadd.f32 %v5494_v56, %v6757_v30 }
0x19e5   :  { %v3529_v57 = vpop.f32.mrf.mxu0 }
0x19e6   :  { %v3543_v58 = vadd.f32 %v3529_v57, %v6759_v17  ;;  %v3551_v3 = vmul.f32 0.2, %v3545_v60  ;;  %vm3548_vm3 = vcmp.ge.f32.partialorder %v3545_v60, 0.0 }
0x19e7   :  { %v5495_v59 = vpop.f32.mrf.mxu0 }
0x19e8   :  { %vm3546_vm1 = vcmp.ge.f32.partialorder %v3543_v58, 0.0  ;;  %v3549_v34 = vmul.f32 0.2, %v3543_v58  ;;  %v3554_v16 = vsel %vm3548_vm3, %v3545_v60, %v3551_v3 }
0x19e9   :  { %v3532_v36 = vpop.f32.mrf.mxu0  ;;  %v3564_v40 = vmul.f32 %v4909_v29, %v3554_v16 }
0x19ea   :  { %v3552_v1 = vsel %vm3546_vm1, %v3543_v58, %v3549_v34  ;;  %v3544_v2 = vadd.f32 %v3532_v36, %v6771_v62 }
0x19eb   :  { %v3562_v52 = vmul.f32 %v4909_v29, %v3552_v1 }
0x19ec   :  { %vm3547_vm2 = vcmp.ge.f32.partialorder %v3544_v2, 0.0  ;;  %v3550_v4 = vmul.f32 0.2, %v3544_v2 }
0x19ed   :  { %5505 = vmatmul.mubr.msk.f32.vlgmr.msra.gmra.mxu1 %vm543_vm5, %v3562_v52 }
0x19ee   :  { %v3553_v6 = vsel %vm3547_vm2, %v3544_v2, %v3550_v4  ;;  %5507 = vmatprep.mubr.msk.f32.mxu1 %vm5957_vm0, %v5956_v11 }
0x19ef   :  { %v3563_v7 = vmul.f32 %v4909_v29, %v3553_v6 }
0x19f1   :  { %5508 = vmatmul.mubr.msk.f32.gmra.mxu1 %vm543_vm5, %v3563_v7 }
0x19f2   :  { %5510 = vmatprep.mubr.msk.f32.mxu1 %vm5957_vm0, %v5956_v11 }
0x19f5   :  { %5511 = vmatmul.mubr.msk.f32.gmra.mxu1 %vm543_vm5, %v3564_v40 }
0x19f6   :  { %5541 = vmatprep.mubr.msk.f32.mxu1 %vm659_vm8, %v6658_v19 }
0x1aad   :  { %v3640_v8 = vpop.f32.mrf.mxu1 }
0x1aae   :  { %v3654_v10 = vsel %vm543_vm5, %v3640_v8, -inf }
0x1aaf   :  { %v5506_v32 = vpop.f32.mrf.mxu1 }
0x1ab1   :  { %v3645_v21 = vpop.f32.mrf.mxu1 }
0x1ab2   :  { %v3655_v25 = vsel %vm543_vm5, %v3645_v21, -inf }
0x1ab3   :  { %v5509_v41 = vpop.f32.mrf.mxu1  ;;  %v3657_v22 = vmax.f32 %v3654_v10, %v3655_v25 }
0x1ab5   :  { %v3650_v23 = vpop.f32.mrf.mxu1 }
0x1ab6   :  { %v3656_v12 = vsel %vm543_vm5, %v3650_v23, -inf }
0x1ab7   :  { %v5512_v28 = vpop.f32.mrf.mxu1  ;;  %v3658_v13 = vmax.f32 %v3657_v22, %v3656_v12  ;;  %v3939_v22 = vpop.permute.xlu1 %3938 }
0x1ab9   :  { %3659 = vmax.xlane.f32.xlu0 %v3658_v13 }
0x1b42   :  { %v3660_v26 = vpop.xlane.xlu0 %3659 }
0x1b43   :  { %v3661_v20 = vrot.slane %v3660_v26, 4 }
0x1b45   :  { %v3662_v53 = vmax.f32 %v3660_v26, %v3661_v20 }
0x1b47   :  { %v3663_v27 = vrot.slane %v3662_v53, 2 }
0x1b49   :  { %v3664_v19 = vmax.f32 %v3662_v53, %v3663_v27  ;;  %v4923_v53 = vld [vmem:[#allocation8] ss:$0 sm:$0xff] }
0x1b4b   :  { %v3665_v9 = vrot.slane %v3664_v19, 1 }
0x1b4d   :  { %v3666_v38 = vmax.f32 %v3664_v19, %v3665_v9 }
0x1b4f   :  { %5638 = vpush %v3666_v38 }
0x1b80   :  { %s5639_s23 = spop %5638 }
0x1b81   :  { %v3668_v44 = vstv %s5639_s23 }
0x1b82   :  { %v3670_v45 = vsub.f32 %v3645_v21, %v3668_v44  ;;  %v3671_v47 = vsub.f32 %v3650_v23, %v3668_v44  ;;  %v3669_v49 = vsub.f32 %v3640_v8, %v3668_v44  ;;  %v4921_v21 = vld [vmem:[%s7077_s13] ss:$0 sm:$0xff] }
0x1b84   :  { %v3676_v50 = vmul.f32 1.442695, %v3671_v47  ;;  %v3674_v51 = vmul.f32 1.442695, %v3670_v45  ;;  %v3672_v56 = vmul.f32 1.442695, %v3669_v49 }
0x1b86   :  { %5839 = vpow2.f32 %v3676_v50 }
0x1b87   :  { %5841 = vpow2.f32 %v3674_v51 }
0x1b88   :  { %5843 = vpow2.f32 %v3672_v56 }
0x1b93   :  { %v5840_v57 = vpop.eup %5839 }
0x1b94   :  { %5513 = vmatprep.subr.mxu0 %v5840_v57  ;;  %v5842_v58 = vpop.eup %5841 }
0x1b95   :  { %5514 = vmatpush3.msra.mxu0 %v5840_v57  ;;  %v5844_v59 = vpop.eup %5843 }
0x1b96   :  { %5515 = vmatprep.subr.mxu0 %v5842_v58 }
0x1b97   :  { %5516 = vmatpush3.msra.mxu0 %v5842_v58 }
0x1b98   :  { %5517 = vmatprep.subr.mxu0 %v5844_v59 }
0x1b99   :  { %5518 = vmatpush3.msra.mxu0 %v5844_v59 }
0x1b9a   :  { %5520 = vmatmul.mubr.msk.f32.vlgmr.msra.gmra.mxu0 %vm659_vm8, %v6665_v33  ;;  %5522 = vmatprep.subr.mxu0 %v5956_v11 }
0x1b9b   :  { %5526 = vmatprep.mubr.msk.f32.mxu0 %vm5957_vm0, %v5956_v11 }
0x1c5a   :  { %v5521_v60 = vpop.f32.mrf.mxu0 }
0x1c5b   :  { %5523 = vmatpush3.msk.msra.mxu0 %vm2328_vm9, %v5521_v60 }
0x1c5c   :  { %v3744_v34 = vpop.f32.mrf.mxu0  ;;  %5524 = vmatprep.subr.mxu0 %v5956_v11 }
0x1c5d   :  { %5525 = vmatpush3.msra.mxu0 %v3744_v34 }
0x1c5e   :  { %5527 = vmatmul.mubr.msk.f32.vlgmr.msra.gmra.mxu0 %vm2324_vm10, %v2928_v61  ;;  %5544 = vmatprep.subr.bf16.mxu0 %v5956_v11 }
0x1c5f   :  { %5529 = vmatprep.mubr.msk.f32.mxu0 %vm5957_vm0, %v5956_v11 }
0x1c62   :  { %5530 = vmatmul.mubr.msk.f32.gmra.mxu0 %vm2324_vm10, %v2929_v37 }
0x1c63   :  { %5532 = vmatprep.mubr.msk.f32.mxu0 %vm5957_vm0, %v5956_v11 }
0x1c66   :  { %5533 = vmatmul.mubr.msk.f32.gmra.mxu0 %vm2324_vm10, %v2930_v35 }
0x1c67   :  { %5548 = vmatprep.mubr.msk.bf16.mxu0 %vm5957_vm0, %v5956_v11 }
0x1d1e   :  { %v3822_v61 = vpop.f32.mrf.mxu0 }
0x1d1f   :  { %v3823_v2 = vadd.f32 1e-16, %v3822_v61  ;;  %v1164_v61 = vld [vmem:[%s7078_s0 + $0x10] sm:$0xff] }
0x1d20   :  { %v5528_v36 = vpop.f32.mrf.mxu0 }
0x1d21   :  { %v2402_v36 = vld [vmem:[%s7079_s5] sm:$0xff] }
0x1d22   :  { %v3827_v29 = vpop.f32.mrf.mxu0 }
0x1d23   :  { %v3828_v1 = vadd.f32 1e-16, %v3827_v29  ;;  %v2404_v29 = vld [vmem:[%s7079_s5 + $0x10] sm:$0xff] }
0x1d24   :  { %v5531_v52 = vpop.f32.mrf.mxu0 }
0x1d25   :  { %5845 = vrcp.f32 %v3828_v1  ;;  %v4467_v1 = vld [vmem:[%s7080_s17] sm:$0xff] }
0x1d26   :  { %v3832_v3 = vpop.f32.mrf.mxu0  ;;  %5847 = vrcp.f32 %v3823_v2 }
0x1d27   :  { %v3833_v24 = vadd.f32 1e-16, %v3832_v3 }
0x1d28   :  { %v5534_v37 = vpop.f32.mrf.mxu0 }
0x1d29   :  { %5849 = vrcp.f32 %v3833_v24  ;;  %v5745_v37 = vld [vmem:[%s7081_s25 + $0x8] sm:$0xff]  }
0x1d32   :  { %v5846_v4 = vpop.eup %5845 }
0x1d33   :  { %v5848_v6 = vpop.eup %5847  ;;  %v3839_v7 = vmul.f32 %v5846_v4, %v5842_v58  ;;  %v5746_v4 = vld [vmem:[%s7081_s25] sm:$0xff]  }
0x1d34   :  { %v3837_v40 = vmul.f32 %v5848_v6, %v5844_v59 }
0x1d35   :  { %v3843_v8 = vmul.f32 %v3839_v7, %v6771_v62  ;;  %v5744_v62 = vld [vmem:[%s7076_s22] sm:$0xff]  }
0x1d36   :  { %v5850_v48 = vpop.eup %5849  ;;  %v3842_v32 = vmul.f32 %v3837_v40, %v6759_v17 }
0x1d37   :  { %v3841_v35 = vmul.f32 %v5850_v48, %v5840_v57 }
0x1d39   :  { %v3844_v16 = vmul.f32 %v6757_v30, %v3841_v35  ;;  %v5743_v30 = vld [vmem:[%s7076_s22 + $0x8] sm:$0xff]   ;;  %v4929_v35 = vld [vmem:[%s7082_s21] ss:$0 sm:$0xff] }
0x1d3a   :  { %5545 = vmatpush3.bf16.msra.mxu0 %v5743_v30 }
0x1d3b   :  { %5535 = vmatprep.subr.mxu1 %v3844_v16  ;;  %5546 = vmatprep.subr.bf16.mxu0 %v5956_v11 }
0x1d3c   :  { %5536 = vmatpush3.msra.mxu1 %v3844_v16 }
0x1d3d   :  { %5537 = vmatprep.subr.mxu1 %v3843_v8 }
0x1d3e   :  { %5538 = vmatpush3.msra.mxu1 %v3843_v8  ;;  %5547 = vmatpush3.bf16.msra.mxu0 %v5744_v62 }
0x1d3f   :  { %5539 = vmatprep.subr.mxu1 %v3842_v32  ;;  %5567 = vmatprep.subr.bf16.mxu0 %v5956_v11 }
0x1d40   :  { %5540 = vmatpush3.msra.mxu1 %v3842_v32 }
0x1d41   :  { %5542 = vmatmul.mubr.msk.f32.vlgmr.msra.gmra.mxu1 %vm659_vm8, %v6665_v33  ;;  %5552 = vmatprep.subr.mxu1 %v5956_v11 }
0x1d42   :  { %5556 = vmatprep.mubr.msk.f32.mxu1 %vm5957_vm0, %v5956_v11 }
0x1e01   :  { %v5543_v17 = vpop.f32.mrf.mxu1 }
0x1e02   :  { %v3917_v25 = vadd.f32 %v5543_v17, %v6708_v5  ;;  %v4204_v17 = vld [vmem:[%s7083_s29] sm:$0xf] }
0x1e03   :  { %v3911_v41 = vpop.f32.mrf.mxu1 }
0x1e04   :  { %v3928_v10 = vadd.f32 %v4921_v21, %v3917_v25  ;;  %v3912_v33 = vadd.f32 %v3911_v41, %v6710_v54  ;;  %v5747_v25 = vld [vmem:[%s7085_s28 + $0x8] sm:$0xff]   ;;  %v5748_v41 = vld [vmem:[%s7085_s28] sm:$0xff]  }
0x1e06   :  { %v3942_v23 = vmul.f32 %v3939_v22, %v3928_v10  ;;  %v3927_v12 = vadd.f32 %v4921_v21, %v3912_v33  ;;  %vm3930_vm8 = vcmp.ge.f32.partialorder %v3928_v10, 0.0  ;;  %v4202_v21 = vld [vmem:[%s7084_s19] sm:$0xf] }
0x1e08   :  { %vm3929_vm4 = vcmp.ge.f32.partialorder %v3927_v12, 0.0  ;;  %v3941_v28 = vmul.f32 %v3939_v22, %v3927_v12  ;;  %v6825_v13 = vsel %vm3930_vm8, %v3928_v10, %v3942_v23 }
0x1e0a   :  { %v6827_v26 = vsel %vm3929_vm4, %v3927_v12, %v3941_v28 }
0x1e0b   :  { %v3949_v20 = vpack.c.bf16 %v6825_v13, %v6827_v26 }
0x1e0d   :  { %5549 = vmatmul.mubr.msk.bf16.vlgmr.msra.gmra.mxu0 %vm543_vm5, %v3949_v20 }
0x1e0e   :  { %5569 = vmatprep.mubr.msk.bf16.mxu0 %vm5957_vm0, %v5956_v11 }
0x1ecd   :  { %v4006_v27 = vpop.f32.mrf.mxu0 }
0x1ece   :  { %v4007_v19 = vadd.f32 %v4923_v53, %v4006_v27 }
0x1ecf   :  { %v5550_v9 = vpop.f32.mrf.mxu0 }
0x1ed0   :  { %v4013_v38 = vsub.f32 0.0, %v4007_v19 }
0x1ed1   :  { %v4009_v44 = vpop.f32.mrf.mxu0 }
0x1ed2   :  { %v4015_v45 = vmul.f32 1.442695, %v4013_v38  ;;  %v4010_v47 = vadd.f32 %v4923_v53, %v4009_v44 }
0x1ed3   :  { %v5551_v49 = vpop.f32.mrf.mxu0 }
0x1ed4   :  { %5851 = vpow2.f32 %v4015_v45  ;;  %v4014_v50 = vsub.f32 0.0, %v4010_v47  ;;  %v4936_v45 = vld [vmem:[%s7086_s4] ss:$0 sm:$0xff] }
0x1ed6   :  { %v4017_v51 = vmul.f32 1.442695, %v4014_v50 }
0x1ed8   :  { %5853 = vpow2.f32 %v4017_v51 }
0x1ee1   :  { %v5852_v56 = vpop.eup %5851 }
0x1ee2   :  { %v4019_v57 = vadd.f32 1.0, %v5852_v56 }
0x1ee4   :  { %5855 = vrcp.f32 %v4019_v57 }
0x1ee5   :  { %v5854_v58 = vpop.eup %5853 }
0x1ee6   :  { %v4020_v59 = vadd.f32 1.0, %v5854_v58 }
0x1ee8   :  { %5857 = vrcp.f32 %v4020_v59 }
0x1ef1   :  { %v5856_v60 = vpop.eup %5855 }
0x1ef2   :  { %4025 = vperm.xlu1 %5707, %v5856_v60   ;;  %v4938_v60 = vld [vmem:[#allocation11] ss:$0 sm:$0xff] }
0x1ef5   :  { %v5858_v34 = vpop.eup %5857 }
0x1ef6   :  { %4030 = vperm.xlu0 %5706, %v5858_v34  }
0x1efa   :  { %1178 = vperm.xlu0 %5706, %v1164_v61  }
0x1efe   :  { %2408 = vperm.xlu0 %5706, %v2402_v36  }
0x1f02   :  { %2418 = vperm.xlu0 %5706, %v2404_v29  }
0x1f06   :  { %4471 = vperm.xlu0 %5706, %v4467_v1  }
0x1f6d   :  { %v4026_v2 = vpop.permute.xlu1 %4025 }
0x1f6e   :  { %v4033_v24 = vmul.f32 %v4026_v2, %v6827_v26 }
0x1f71   :  { %v4031_v52 = vpop.permute.xlu0 %4030 }
0x1f72   :  { %v4034_v3 = vmul.f32 %v4031_v52, %v6825_v13 }
0x1f74   :  { %5553 = vmatpush3.msk.msra.mxu1 %vm2328_vm9, %v4034_v3  ;;  %vm4393_vm9 = vcmask 64512  }
0x1f75   :  { %5554 = vmatprep.subr.mxu1 %v5956_v11 }
0x1f76   :  { %5555 = vmatpush3.msra.mxu1 %v4033_v24 }
0x1f77   :  { %5557 = vmatmul.mubr.msk.f32.vlgmr.msra.gmra.mxu1 %vm2324_vm10, %v6577_v46  ;;  %5559 = vmatprep.subr.bf16.mxu1 %v5956_v11 }
0x1f78   :  { %5560 = vmatpush3.bf16.msra.mxu1 %v5745_v37  ;;  %5563 = vmatprep.mubr.msk.bf16.mxu1 %vm5957_vm0, %v5956_v11 }
0x1f79   :  { %5561 = vmatprep.subr.bf16.mxu1 %v5956_v11 }
0x1f7c   :  { %5562 = vmatpush3.bf16.msra.mxu1 %v5746_v4  ;;  %v1162_v4 = vld [vmem:[%s7078_s0] sm:$0xff] }
0x1f7d   :  { %5573 = vmatprep.subr.bf16.mxu1 %v5956_v11 }
0x1f7f   :  { %5564 = vmatmul.mubr.msk.bf16.vlgmr.msra.gmra.mxu1 %vm543_vm5, %v3949_v20 }
0x1f80   :  { %5575 = vmatprep.mubr.msk.bf16.mxu1 %vm5957_vm0, %v5956_v11 }
0x2037   :  { %v6854_v46 = vpop.f32.mrf.mxu1 }
0x2039   :  { %v5558_v6 = vpop.f32.mrf.mxu1 }
0x203a   :  { %v1163_v6 = vld [vmem:[%s7078_s0 + $0x8] sm:$0x3] }
0x203f   :  { %v4195_v48 = vpop.f32.mrf.mxu1 }
0x2040   :  { %v4196_v40 = vadd.f32 %v4929_v35, %v4195_v48  ;;  %v1165_v48 = vld [vmem:[%s7078_s0 + $0x18] sm:$0x3] }
0x2041   :  { %v5565_v7 = vpop.f32.mrf.mxu1 }
0x2042   :  { %v2405_v7 = vld [vmem:[%s7079_s5 + $0x18] sm:$0xf] }
0x2043   :  { %v4198_v16 = vpop.f32.mrf.mxu1 }
0x2044   :  { %v4199_v8 = vadd.f32 %v4929_v35, %v4198_v16  ;;  %v2403_v35 = vld [vmem:[%s7079_s5 + $0x8] sm:$0xf] }
0x2045   :  { %v5566_v32 = vpop.f32.mrf.mxu1  ;;  %v4468_v16 = vld [vmem:[%s7080_s17 + $0x8] sm:$0xff] }
0x2046   :  { %v4203_v30 = vpack.c.bf16 %v4199_v8, %v4196_v40  ;;  %v1179_v40 = vpop.permute.xlu0 %1178 }
0x2048   :  { %v4209_v62 = vsel %vm2589_vm7, %v4203_v30, 0 }
0x2049   :  { %5568 = vmatpush3.bf16.msra.mxu0 %v4209_v62  ;;  %5574 = vmatpush3.bf16.msra.mxu1 %v4209_v62 }
0x204a   :  { %5579 = vmatprep.subr.bf16.mxu0 %v5956_v11  ;;  %5587 = vmatprep.subr.mxu1 %v5956_v11  ;;  %v2409_v8 = vpop.permute.xlu0 %2408 }
0x204c   :  { %5570 = vmatmul.mubr.msk.bf16.vlgmr.msra.gmra.mxu0 %vm2324_vm10, %v4204_v17  ;;  %5576 = vmatmul.mubr.msk.bf16.vlgmr.msra.gmra.mxu1 %vm2324_vm10, %v4202_v21  ;;  %vm1191_vm10 = vcmask 254976  }
0x204d   :  { %5583 = vmatprep.mubr.msk.bf16.mxu0 %vm5957_vm0, %v5956_v11  ;;  %5589 = vmatprep.mubr.msk.f32.mxu1 %vm5957_vm0, %v5956_v11 }
0x204e   :  { %5580 = vmatpush3.bf16.msra.mxu0 %v5747_v25  ;;  %v2419_v32 = vpop.permute.xlu0 %2418  ;;  %v4386_v25 = vld [vmem:[%s7087_s11] sm:$0x3] }
0x204f   :  { %5581 = vmatprep.subr.bf16.mxu0 %v5956_v11 }
0x2052   :  { %5582 = vmatpush3.bf16.msra.mxu0 %v5748_v41  ;;  %v4472_v30 = vpop.permute.xlu0 %4471 }
0x2053   :  { %5592 = vmatprep.subr.bf16.mxu0 %v5956_v11 }
0x210c   :  { %v4245_v10 = vpop.f32.mrf.mxu0  ;;  %v4288_v33 = vpop.f32.mrf.mxu1 }
0x210d   :  { %v4289_v22 = vadd.f32 %v4288_v33, %v4245_v10  ;;  %v1188_v33 = vadd.f32 %v1179_v40, %v6397_v14 }
0x210e   :  { %v5571_v23 = vpop.f32.mrf.mxu0  ;;  %v5577_v12 = vpop.f32.mrf.mxu1 }
0x210f   :  { %v4295_v28 = vmin.f32 %v4289_v22, 0.0  ;;  %vm4294_vm6 = vcmp.gt.f32.partialorder %v4289_v22, 0.0 }
0x2110   :  { %v4248_v20 = vpop.f32.mrf.mxu0  ;;  %v4291_v53 = vpop.f32.mrf.mxu1 }
0x2111   :  { %v4296_v27 = vmul.f32 1.442695, %v4295_v28  ;;  %v2426_v20 = vadd.f32 %v2409_v8, %v6556_v15  ;;  %v3295_v53 = vadd.f32 %v6710_v54, %v2409_v8 }
0x2112   :  { %v5572_v19 = vpop.f32.mrf.mxu0  ;;  %v5578_v9 = vpop.f32.mrf.mxu1 }
0x2113   :  { %5859 = vpow2.f32 %v4296_v27  ;;  %v1200_v19 = vsel %vm543_vm5, %v1188_v33, -inf  ;;  %v4108_v9 = vadd.f32 %v6827_v26, %v2409_v8 }
0x2120   :  { %v5860_v38 = vpop.eup %5859 }
0x2121   :  { %v4935_v44 = vadd.f32 -1.0, %v5860_v38 }
0x2123   :  { %v4299_v47 = vsel %vm4294_vm6, %v4289_v22, %v4935_v44  ;;  %v2002_v22 = vadd.f32 %v6514_v43, %v1179_v40 }
0x2124   :  { %v4307_v49 = vmul.f32 %v4936_v45, %v4299_v47 }
0x2125   :  { %v2013_v45 = vsel %vm543_vm5, %v2002_v22, -inf }
0x2126   :  { %v4309_v50 = vmin.f32 %v4307_v49, 0.0  ;;  %vm4308_vm7 = vcmp.gt.f32.partialorder %v4307_v49, 0.0 }
0x2128   :  { %v4310_v51 = vmul.f32 1.442695, %v4309_v50 }
0x212a   :  { %5861 = vpow2.f32 %v4310_v51 }
0x2137   :  { %v5862_v56 = vpop.eup %5861 }
0x2138   :  { %v4937_v57 = vadd.f32 -1.0, %v5862_v56 }
0x213a   :  { %v6873_v58 = vsel %vm4308_vm7, %v4307_v49, %v4937_v57  ;;  %v2430_v57 = vsel %vm543_vm5, %v2426_v20, -inf }
0x213b   :  { %v4318_v59 = vpack.c.bf16 %v6873_v58, %v6873_v58  ;;  %v4479_v62 = vadd.f32 %v4472_v30, %v6873_v58 }
0x213d   :  { %5584 = vmatmul.mubr.msk.bf16.vlgmr.msra.gmra.mxu0 %vm543_vm5, %v4318_v59  ;;  %v4481_v41 = vsel %vm543_vm5, %v4479_v62, -inf  ;;  %v3299_v59 = vsel %vm543_vm5, %v3295_v53, -inf }
0x213e   :  { %5600 = vmatprep.mubr.msk.bf16.mxu0 %vm5957_vm0, %v5956_v11  ;;  %v4482_v23 = vrot.slane %v4481_v41, 4 }
0x2140   :  { %v4483_v47 = vmax.f32 %v4481_v41, %v4482_v23 }
0x21fd   :  { %v4375_v34 = vpop.f32.mrf.mxu0 }
0x21fe   :  { %v4376_v61 = vadd.f32 %v4938_v60, %v4375_v34 }
0x21ff   :  { %v5585_v36 = vpop.f32.mrf.mxu0 }
0x2200   :  { %v4381_v29 = vsub.f32 0.0, %v4376_v61 }
0x2201   :  { %v4378_v1 = vpop.f32.mrf.mxu0 }
0x2202   :  { %v4382_v2 = vmul.f32 1.442695, %v4381_v29 }
0x2203   :  { %v5586_v52 = vpop.f32.mrf.mxu0 }
0x2204   :  { %5863 = vpow2.f32 %v4382_v2 }
0x2211   :  { %v5864_v3 = vpop.eup %5863 }
0x2212   :  { %v4384_v24 = vadd.f32 1.0, %v5864_v3  ;;  %v4484_v3 = vrot.slane %v4483_v47, 2 }
0x2214   :  { %5865 = vrcp.f32 %v4384_v24  ;;  %v6924_v62 = vmax.f32 %v4483_v47, %v4484_v3 }
0x2221   :  { %v5866_v37 = vpop.eup %5865 }
0x2222   :  { %4389 = vperm.xlu1 %5707, %v5866_v37  }
0x2226   :  { %1168 = vperm.xlu1 %5707, %v1162_v4  }
0x222a   :  { %1173 = vperm.xlu1 %5707, %v1163_v6  }
0x222e   :  { %1183 = vperm.xlu1 %5707, %v1165_v48  }
0x2232   :  { %2413 = vperm.xlu1 %5707, %v2403_v35  }
0x2236   :  { %2423 = vperm.xlu1 %5707, %v2405_v7  }
0x223a   :  { %4476 = vperm.xlu1 %5707, %v4468_v16  }
0x229d   :  { %v4390_v17 = vpop.permute.xlu1 %4389 }
0x229e   :  { %v4392_v21 = vmul.f32 %v4390_v17, %v6873_v58 }
0x22a0   :  { %5588 = vmatpush3.msra.mxu1 %v4392_v21 }
0x22a1   :  { %5590 = vmatmul.mubr.msk.f32.vlgmr.msra.gmra.mxu1 %vm4393_vm9, %v4386_v25  ;;  %v1169_v10 = vpop.permute.xlu1 %1168  ;;  %5604 = vmatprep.subr.bf16.mxu1 %v5956_v11 }
0x22a2   :  { %5620 = vmatprep.mubr.msk.bf16.mxu1 %vm5957_vm0, %v5956_v11  ;;  %v1186_v12 = vadd.f32 %v1169_v10, %v6397_v14  ;;  %v2000_v28 = vadd.f32 %v6514_v43, %v1169_v10  ;;  %v2428_v14 = vadd.f32 %v2419_v32, %v6556_v15  ;;  %v3297_v43 = vadd.f32 %v6710_v54, %v2419_v32 }
0x22a3   :  { %v4112_v15 = vsel %vm543_vm5, %v4108_v9, -inf  ;;  %v4110_v54 = vadd.f32 %v6827_v26, %v2419_v32  ;;  %vm2431_vm0 = vcmask 257024  }
0x22a4   :  { %v1190_v49 = vsel %vm543_vm5, %v1186_v12, -inf  ;;  %v2004_v50 = vsel %vm543_vm5, %v2000_v28, -inf  ;;  %v2440_v1 = vsel %vm543_vm5, %v2428_v14, -inf  ;;  %v3308_v24 = vsel %vm543_vm5, %v3297_v43, -inf }
0x22a5   :  { %v1174_v27 = vpop.permute.xlu1 %1173 }
0x22a6   :  { %v1187_v38 = vadd.f32 %v1174_v27, %v6399_v18  ;;  %v2001_v44 = vadd.f32 %v6512_v42, %v1174_v27 }
0x22a8   :  { %v1192_v51 = vsel %vm1191_vm10, %v1187_v38, -inf  ;;  %v2005_v56 = vsel %vm1191_vm10, %v2001_v44, -inf }
0x22a9   :  { %v1193_v60 = vmax.f32 %v1190_v49, %v1192_v51  ;;  %v2006_v34 = vmax.f32 %v2004_v50, %v2005_v56  ;;  %v1184_v61 = vpop.permute.xlu1 %1183 }
0x22aa   :  { %v1189_v36 = vadd.f32 %v1184_v61, %v6399_v18  ;;  %v2003_v29 = vadd.f32 %v6512_v42, %v1184_v61  ;;  %v4121_v18 = vsel %vm543_vm5, %v4110_v54, -inf }
0x22ab   :  { %v1194_v2 = vrot.slane %v1193_v60, 4  ;;  %v2007_v52 = vrot.slane %v2006_v34, 4 }
0x22ac   :  { %v1201_v37 = vsel %vm1191_vm10, %v1189_v36, -inf  ;;  %v2014_v4 = vsel %vm1191_vm10, %v2003_v29, -inf }
0x22ad   :  { %v1195_v6 = vmax.f32 %v1193_v60, %v1194_v2  ;;  %v2008_v48 = vmax.f32 %v2006_v34, %v2007_v52  ;;  %v1202_v35 = vmax.f32 %v1200_v19, %v1201_v37  ;;  %v2015_v26 = vmax.f32 %v2013_v45, %v2014_v4  ;;  %v2414_v7 = vpop.permute.xlu1 %2413 }
0x22ae   :  { %v2427_v42 = vadd.f32 %v2414_v7, %v6558_v55  ;;  %v3296_v16 = vadd.f32 %v6708_v5, %v2414_v7  ;;  %v4109_v40 = vadd.f32 %v6825_v13, %v2414_v7 }
0x22af   :  { %v1196_v8 = vrot.slane %v1195_v6, 2  ;;  %v1203_v32 = vrot.slane %v1202_v35, 4  ;;  %v2016_v30 = vrot.slane %v2015_v26, 4  ;;  %v2009_v17 = vrot.slane %v2008_v48, 2 }
0x22b0   :  { %v2432_v21 = vsel %vm2431_vm0, %v2427_v42, -inf  ;;  %v3300_v25 = vsel %vm2431_vm0, %v3296_v16, -inf  ;;  %v4113_v41 = vsel %vm2431_vm0, %v4109_v40, -inf }
0x22b1   :  { %v1204_v10 = vmax.f32 %v1202_v35, %v1203_v32  ;;  %v2017_v33 = vmax.f32 %v2015_v26, %v2016_v30  ;;  %v2433_v22 = vmax.f32 %v2430_v57, %v2432_v21  ;;  %v3301_v23 = vmax.f32 %v3299_v59, %v3300_v25  ;;  %v2424_v12 = vpop.permute.xlu1 %2423 }
0x22b2   :  { %v4114_v28 = vmax.f32 %v4112_v15, %v4113_v41  ;;  %v2429_v20 = vadd.f32 %v2424_v12, %v6558_v55  ;;  %v3298_v53 = vadd.f32 %v6708_v5, %v2424_v12  ;;  %v4111_v27 = vadd.f32 %v6825_v13, %v2424_v12 }
0x22b3   :  { %v1205_v19 = vrot.slane %v1204_v10, 2  ;;  %v2018_v9 = vrot.slane %v2017_v33, 2  ;;  %v2434_v38 = vrot.slane %v2433_v22, 4  ;;  %v3302_v44 = vrot.slane %v3301_v23, 4 }
0x22b4   :  { %v4115_v45 = vrot.slane %v4114_v28, 4  ;;  %v2441_v14 = vsel %vm2431_vm0, %v2429_v20, -inf  ;;  %v3309_v43 = vsel %vm2431_vm0, %v3298_v53, -inf  ;;  %v4122_v47 = vsel %vm2431_vm0, %v4111_v27, -inf }
0x22b5   :  { %v2435_v49 = vmax.f32 %v2433_v22, %v2434_v38  ;;  %v3303_v50 = vmax.f32 %v3301_v23, %v3302_v44  ;;  %v2442_v51 = vmax.f32 %v2440_v1, %v2441_v14  ;;  %v3310_v55 = vmax.f32 %v3308_v24, %v3309_v43  ;;  %v4477_v56 = vpop.permute.xlu1 %4476  ;;  %v5750_v22 = vld [vmem:[%s7088_s24 + $0x10] sm:$0xff]  }
0x22b6   :  { %v4116_v5 = vmax.f32 %v4114_v28, %v4115_v45  ;;  %v4123_v57 = vmax.f32 %v4121_v18, %v4122_v47  ;;  %v4480_v13 = vadd.f32 %v4477_v56, %v6873_v58  ;;  %v1197_v59 = vmax.f32 %v1195_v6, %v1196_v8  ;;  %v5749_v8 = vld [vmem:[%s7088_s24 + $0x18] sm:$0xff]  }
0x22b7   :  { %v2443_v60 = vrot.slane %v2442_v51, 4  ;;  %v3311_v34 = vrot.slane %v3310_v55, 4  ;;  %v1206_v61 = vmax.f32 %v1204_v10, %v1205_v19  ;;  %v2010_v15 = vmax.f32 %v2008_v48, %v2009_v17  ;;  %5593 = vmatpush3.bf16.msra.mxu0 %v5749_v8  ;;  %v5760_v8 = vld [vmem:[%s7089_s16] sm:$0xff]  }
0x22b8   :  { %v4124_v54 = vrot.slane %v4123_v57, 4  ;;  %v4488_v36 = vsel %vm543_vm5, %v4480_v13, -inf  ;;  %v1198_v29 = vrot.slane %v1197_v59, 1  ;;  %v2019_v2 = vmax.f32 %v2017_v33, %v2018_v9  ;;  %5594 = vmatprep.subr.bf16.mxu0 %v5956_v11 }
0x22b9   :  { %v2444_v52 = vmax.f32 %v2442_v51, %v2443_v60  ;;  %v3312_v3 = vmax.f32 %v3310_v55, %v3311_v34  ;;  %v4489_v1 = vrot.slane %v4488_v36, 4  ;;  %v1207_v24 = vrot.slane %v1206_v61, 1 }
0x22ba   :  { %v4125_v37 = vmax.f32 %v4123_v57, %v4124_v54  ;;  %v1199_v4 = vmax.f32 %v1197_v59, %v1198_v29  ;;  %v2011_v35 = vrot.slane %v2010_v15, 1  ;;  %v2020_v26 = vrot.slane %v2019_v2, 1  ;;  %v5754_v54 = vld [vmem:[%s7089_s16 + $0x30] sm:$0xff]  }
0x22bb   :  { %v4490_v58 = vmax.f32 %v4488_v36, %v4489_v1  ;;  %v1208_v6 = vmax.f32 %v1206_v61, %v1207_v24  ;;  %v2436_v7 = vrot.slane %v2435_v49, 2  ;;  %v2445_v18 = vrot.slane %v2444_v52, 2  ;;  %5595 = vmatpush3.bf16.msra.mxu0 %v5750_v22  ;;  %v5752_v61 = vld [vmem:[%s7088_s24] sm:$0xff]  }
0x22bc   :  { %v2012_v42 = vmax.f32 %v2010_v15, %v2011_v35  ;;  %v2021_v48 = vmax.f32 %v2019_v2, %v2020_v26  ;;  %v3304_v16 = vrot.slane %v3303_v50, 2  ;;  %v3313_v40 = vrot.slane %v3312_v3, 2  ;;  %5596 = vmatprep.subr.bf16.mxu0 %v5956_v11  ;;  %v5753_v15 = vld [vmem:[%s7089_s16 + $0x38] sm:$0xff]  }
0x22bd   :  { %v4491_v32 = vrot.slane %v4490_v58, 2  ;;  %v1212_v30 = vsel %vm1211_vm11, %v1208_v6, %v1199_v4  ;;  %v2437_v17 = vmax.f32 %v2435_v49, %v2436_v7  ;;  %v2446_v21 = vmax.f32 %v2444_v52, %v2445_v18  ;;  %5605 = vmatpush3.bf16.msra.mxu1 %v5753_v15 }
0x22be   :  { %1213 = vrot.lane.b32.xlu0 %v1212_v30, %s5959_s10  ;;  %v2024_v25 = vsel %vm1211_vm11, %v2021_v48, %v2012_v42  ;;  %v3305_v41 = vmax.f32 %v3303_v50, %v3304_v16  ;;  %v3314_v10 = vmax.f32 %v3312_v3, %v3313_v40  ;;  %v4117_v33 = vrot.slane %v4116_v5, 2  ;;  %v5751_v50 = vld [vmem:[%s7088_s24 + $0x8] sm:$0xff]   ;;  %5606 = vmatprep.subr.bf16.mxu1 %v5956_v11  ;;  %v5758_v16 = vld [vmem:[%s7089_s16 + $0x10] sm:$0xff]  }
0x22bf   :  { %v4492_v23 = vmax.f32 %v4490_v58, %v4491_v32  ;;  %2025 = vrot.lane.b32.xlu1 %v2024_v25, %s5959_s10  ;;  %v2438_v12 = vrot.slane %v2437_v17, 1  ;;  %v2447_v28 = vrot.slane %v2446_v21, 1  ;;  %v4126_v20 = vrot.slane %v4125_v37, 2  ;;  %5597 = vmatpush3.bf16.msra.mxu0 %v5751_v50  ;;  %v5755_v48 = vld [vmem:[%s7089_s16 + $0x28] sm:$0xff]   ;;  %v4943_v32 = vld [vmem:[%s7090_s9] ss:$0 sm:$0xff] }
0x22c0   :  { %v3306_v53 = vrot.slane %v3305_v41, 1  ;;  %v3315_v27 = vrot.slane %v3314_v10, 1  ;;  %v4118_v19 = vmax.f32 %v4116_v5, %v4117_v33  ;;  %v4486_v49 = vrot.slane %v6924_v62, 1  ;;  %5598 = vmatprep.subr.bf16.mxu0 %v5956_v11  ;;  %v5759_v40 = vld [vmem:[%s7089_s16 + $0x8] sm:$0xff]  }
0x22c1   :  { %v4493_v9 = vrot.slane %v4492_v23, 1  ;;  %v2439_v38 = vmax.f32 %v2437_v17, %v2438_v12  ;;  %v2448_v44 = vmax.f32 %v2446_v21, %v2447_v28  ;;  %v4127_v45 = vmax.f32 %v4125_v37, %v4126_v20  ;;  %5607 = vmatpush3.bf16.msra.mxu1 %v5754_v54  ;;  %v4950_v20 = vld [vmem:[%s7091_s26] ss:$0 sm:$0xff] }
0x22c2   :  { %v3307_v14 = vmax.f32 %v3305_v41, %v3306_v53  ;;  %v3316_v43 = vmax.f32 %v3314_v10, %v3315_v27  ;;  %v4119_v47 = vrot.slane %v4118_v19, 1  ;;  %v4487_v59 = vmax.f32 %v6924_v62, %v4486_v49  ;;  %5608 = vmatprep.subr.bf16.mxu1 %v5956_v11 }
0x22c3   :  { %v2451_v51 = vsel %vm1211_vm11, %v2448_v44, %v2439_v38  ;;  %v4128_v55 = vrot.slane %v4127_v45, 1  ;;  %v4494_v5 = vmax.f32 %v4492_v23, %v4493_v9  ;;  %5599 = vmatpush3.bf16.msra.mxu0 %v5752_v61 }
0x22c4   :  { %2452 = vrot.lane.b32.xlu0 %v2451_v51, %s5959_s10  ;;  %v3319_v56 = vsel %vm1211_vm11, %v3316_v43, %v3307_v14  ;;  %v4120_v57 = vmax.f32 %v4118_v19, %v4119_v47 }
0x22c5   :  { %3320 = vrot.lane.b32.xlu1 %v3319_v56, %s5959_s10  ;;  %v4129_v13 = vmax.f32 %v4127_v45, %v4128_v55  ;;  %v4497_v34 = vsel %vm1211_vm11, %v4494_v5, %v4487_v59  ;;  %5609 = vmatpush3.bf16.msra.mxu1 %v5755_v48 }
0x22c6   :  { %5610 = vmatprep.subr.bf16.mxu1 %v5956_v11 }
0x22c7   :  { %v4132_v60 = vsel %vm1211_vm11, %v4129_v13, %v4120_v57 }
0x22c8   :  { %4133 = vrot.lane.b32.xlu0 %v4132_v60, %s5959_s10 }
0x22c9   :  { %4498 = vrot.lane.b32.xlu1 %v4497_v34, %s5959_s10 }
0x2330   :  { %v1214_v62 = vpop.permute.xlu0 %1213 }
0x2331   :  { %v2026_v36 = vpop.permute.xlu1 %2025  ;;  %v1216_v2 = vsel %vm543_vm5, %v6454_v39, %v1214_v62 }
0x2332   :  { %v2028_v52 = vsel %vm543_vm5, %v6537_v63, %v2026_v36 }
0x2333   :  { %v2029_v1 = vadd.f32 %v2028_v52, %v1216_v2 }
0x2336   :  { %v2453_v29 = vpop.permute.xlu0 %2452 }
0x2337   :  { %v2455_v3 = vsel %vm543_vm5, %v6624_v31, %v2453_v29  ;;  %v3321_v37 = vpop.permute.xlu1 %3320 }
0x2338   :  { %v2456_v24 = vadd.f32 %v2455_v3, %v2029_v1  ;;  %v3323_v35 = vsel %vm543_vm5, %v6761_v0, %v3321_v37  ;;  %v5756_v0 = vld [vmem:[%s7089_s16 + $0x20] sm:$0xff]  }
0x2339   :  { %5611 = vmatpush3.bf16.msra.mxu1 %v5756_v0 }
0x233a   :  { %v4134_v4 = vpop.permute.xlu0 %4133  ;;  %v3324_v26 = vadd.f32 %v3323_v35, %v2456_v24  ;;  %5612 = vmatprep.subr.bf16.mxu1 %v5956_v11 }
0x233b   :  { %v4136_v58 = vsel %vm543_vm5, %v6854_v46, %v4134_v4  ;;  %v4499_v6 = vpop.permute.xlu1 %4498  ;;  %v5757_v46 = vld [vmem:[%s7089_s16 + $0x18] sm:$0xff]  }
0x233c   :  { %v4137_v39 = vadd.f32 %v4136_v58, %v3324_v26 }
0x233d   :  { %5613 = vmatpush3.bf16.msra.mxu1 %v5757_v46 }
0x233e   :  { %5614 = vmatprep.subr.bf16.mxu1 %v5956_v11 }
0x2341   :  { %5615 = vmatpush3.bf16.msra.mxu1 %v5758_v16 }
0x2342   :  { %5616 = vmatprep.subr.bf16.mxu1 %v5956_v11 }
0x2345   :  { %5617 = vmatpush3.bf16.msra.mxu1 %v5759_v40 }
0x2346   :  { %5618 = vmatprep.subr.bf16.mxu1 %v5956_v11 }
0x2349   :  { %5619 = vmatpush3.bf16.msra.mxu1 %v5760_v8 }
0x2361   :  { %v4463_v63 = vpop.f32.mrf.mxu1 }
0x2362   :  { %v4501_v31 = vsel %vm543_vm5, %v4463_v63, %v4499_v6 }
0x2363   :  { %v4502_v7 = vadd.f32 %v4501_v31, %v4137_v39  ;;  %v5591_v18 = vpop.f32.mrf.mxu1 }
0x2365   :  { %v4511_v42 = vpack.c.bf16 %v4502_v7, %v4502_v7 }
0x2367   :  { %5601 = vmatmul.mubr.msk.bf16.vlgmr.msra.gmra.mxu0 %vm4543_vm12, %v4511_v42 }
0x2427   :  { %v4581_v30 = vpop.f32.mrf.mxu0 }
0x2428   :  { %v4582_v17 = vadd.f32 %v4943_v32, %v4581_v30 }
0x2429   :  { %v5602_v21 = vpop.f32.mrf.mxu0 }
0x242a   :  { %v4588_v25 = vmin.f32 %v4582_v17, 0.0  ;;  %vm4587_vm5 = vcmp.gt.f32.partialorder %v4582_v17, 0.0 }
0x242b   :  { %v4584_v41 = vpop.f32.mrf.mxu0 }
0x242c   :  { %v4589_v10 = vmul.f32 1.442695, %v4588_v25 }
0x242d   :  { %v5603_v33 = vpop.f32.mrf.mxu0 }
0x242e   :  { %5867 = vpow2.f32 %v4589_v10 }
0x243b   :  { %v5868_v22 = vpop.eup %5867 }
0x243c   :  { %v4949_v23 = vadd.f32 -1.0, %v5868_v22 }
0x243e   :  { %v4592_v12 = vsel %vm4587_vm5, %v4582_v17, %v4949_v23 }
0x243f   :  { %v4609_v28 = vpack.c.bf16 %v4592_v12, %v4592_v12 }
0x2441   :  { %5621 = vmatmul.mubr.bf16.vlgmr.msra.gmra.mxu1 %v4609_v28 }
0x2501   :  { %v4699_v11 = vpop.f32.mrf.mxu1 }
0x2502   :  { %v4700_v53 = vadd.f32 %v4950_v20, %v4699_v11 }
0x2503   :  { %v5622_v27 = vpop.f32.mrf.mxu1 }
0x2504   :  { %4706 = vst.msk [vmem:[#allocation12] sm:$0x3] %vm4705_vm13, %v4700_v53 }
0x2505   :  { %v4702_v19 = vpop.f32.mrf.mxu1 }
0x2506   :  { %5884 = shalt.err (!%p5881_p4)
}
0x2507   :  { %s7092_s2 = sld [smem:[#allocation56_spill]]  ;;  %v5623_v9 = vpop.f32.mrf.mxu1 }
0x250d   :  { %4716 = dma.vmem_to_hbm [thread:$0]  %s4714_s30, 32, %s7092_s2, [#allocation13]  }
0x250e   :  { %5893 = dma.done.wait [#allocation13], 32  }
0x250f   :  { %5894 = vsyncadd [#allocation13], 4294967264 }
0x2510   :  { %4720 = vsyncpa [#allocation13], 1 }

</bundles_post_ra>
